<compile_context>
chip_gen: v7x
topology: tpu7x:2x2x1
jax: 0.10.0
libtpu: 0.0.40
codegen_flags: <defaults>
</compile_context>

<pallas_src>
import functools

import jax
import jax.numpy as jnp
from jax.experimental import pallas as pl
from jax.experimental.pallas import tpu as pltpu  # noqa: F401 (VMEM default placement)

# ----------------------------- small config ---------------------------------
HIDDEN = 128
HEADS = 4
HEAD_DIM = HIDDEN // HEADS
INTER = 256
LN_EPS = 1e-12
BIT = 8
ACT_QMAX = float(2 ** BIT - 1)                                        # [0, 255]
W_QMIN, W_QMAX = float(-(2 ** (BIT - 1))), float(2 ** (BIT - 1) - 1)  # [-128, 127]
NEG_INF = -1e30


# ---------------------------- in-kernel helpers ------------------------------
def _gmin(x):
    return jnp.min(jnp.min(x, axis=1, keepdims=True), axis=0, keepdims=True)


def _gmax(x):
    return jnp.max(jnp.max(x, axis=1, keepdims=True), axis=0, keepdims=True)


def _act_fq_parts(x):
    """FakeQuantize (training pass), split as (x_c, s) with fq(x) == x_c * s.

    When quantization applies, x_c = x_int - zero_point is integer-valued in
    [-255, 255] (exactly representable in bf16) and s is the scalar scale.
    TODO(synk): in the degenerate (range < 1e-8) case x_c = x is not exactly
    bf16-representable; the reference returns x unquantized there.
    """
    mn = _gmin(x)                                   # (1,1)
    mx = _gmax(x)                                   # (1,1)
    rng = mx - mn
    apply = rng >= 1e-8
    scale = jnp.where(apply, rng * (1.0 / ACT_QMAX), 1.0)
    zp = jnp.clip(-jnp.round(mn / scale), 0.0, ACT_QMAX)   # scalar divide
    inv_scale = 1.0 / scale                                 # scalar divide (once)
    x_int = jnp.clip(jnp.round(x * inv_scale + zp), 0.0, ACT_QMAX)
    x_c = jnp.where(apply, x_int - zp, x)
    s = jnp.where(apply, scale, 1.0)
    return x_c, s


def _act_fq(x):
    x_c, s = _act_fq_parts(x)
    return x_c * s


def _weight_fq_parts(wt):
    """ChannelWiseFakeQuantize on a pre-transposed (K, N) weight.

    Returns (w_int, scales): w_int integer-valued in [-128, 127], scales (1, N)
    per output channel; the fake-quantized (transposed) weight is w_int*scales.
    """
    ranges = jnp.max(jnp.abs(wt), axis=0, keepdims=True)    # (1, N)
    scales = jnp.maximum(ranges / W_QMAX, 1e-8)             # tiny exact divide
    inv = 1.0 / scales                                      # (1, N) divide (once)
    w_int = jnp.clip(jnp.round(wt * inv), W_QMIN, W_QMAX)
    return w_int, scales


def _add_ln(x, r, g, b):
    y = x + r
    mu = jnp.mean(y, axis=-1, keepdims=True)
    var = jnp.mean((y - mu) ** 2, axis=-1, keepdims=True)
    return (y - mu) * jax.lax.rsqrt(var + LN_EPS) * g + b


def _gelu(x):
    # tanh-approx GELU (single EUP tanh); ~1e-3 deviation from exact erf GELU,
    # far below the 8-bit fake-quant noise immediately upstream.
    c = 0.7978845608028654  # sqrt(2/pi)
    return 0.5 * x * (1.0 + jnp.tanh(c * (x + 0.044715 * x * x * x)))


# ------------------------- fused whole-layer kernel ---------------------------
def bitbert_layer_kernel(h_ref, wqkv_ref, bqkv_ref, wo_ref, wi_ref, bi_ref,
                         w2_ref, vec_ref, out_ref, *, batch, heads, head_dim):
    f32 = jnp.float32
    H = heads * head_dim
    M = h_ref.shape[0]

    h = h_ref[...]                                   # (M, H), row i = s*B + b
    vecs = vec_ref[...]                              # (6, H) packed small params
    bo, g1, be1, b2, g2, be2 = (vecs[i:i + 1, :] for i in range(6))

    # --- BitBertSelfAttention: fused Q|K|V projection -------------------------
    qk_in = _act_fq(h)                               # in_fake_quant -> q = k
    x_cat = jnp.concatenate([qk_in, h], axis=1)      # (M, 2H) lane concat
    qkv = jnp.dot(x_cat, wqkv_ref[...],
                  preferred_element_type=f32) + bqkv_ref[...]     # (M, 3H)
    q = qkv[:, :H]
    k = qkv[:, H:2 * H]
    v = qkv[:, 2 * H:]

    # static cross-batch score bias: token row i belongs to batch (i % batch)
    rb = jax.lax.broadcasted_iota(jnp.int32, (M, M), 0) % batch
    cb = jax.lax.broadcasted_iota(jnp.int32, (M, M), 1) % batch
    xbias = jnp.where(rb == cb, 0.0, NEG_INF)

    lane = jax.lax.broadcasted_iota(jnp.int32, (1, H), 1)
    inv_sqrt_d = 1.0 / float(head_dim) ** 0.5

    attn = jnp.zeros((M, H), f32)                    # register-resident output
    for hh in range(heads):                          # static unroll, full-lane
        lo, hi = hh * head_dim, (hh + 1) * head_dim
        hmask = jnp.where((lane >= lo) & (lane < hi), 1.0, 0.0)
        s = jax.lax.dot_general(q, k * hmask, (((1,), (1,)), ((), ())),
                                preferred_element_type=f32)       # (M, M)
        s = s * inv_sqrt_d + xbias
        s = s - jnp.max(s, axis=-1, keepdims=True)
        p = jnp.exp(s)
        p = p * pl.reciprocal(jnp.sum(p, axis=-1, keepdims=True), approx=True)
        # TODO(synk): attention-prob dropout (training p=0.1) treated as identity.
        attn = attn + jnp.dot(p, v * hmask, preferred_element_type=f32)

    attn = jnp.dot(attn, wo_ref[...], preferred_element_type=f32) + bo  # out_proj
    attn = _act_fq(attn)                             # out_fake_quant

    # --- BitBertSelfOutput: dropout(identity) + LN(attn + hidden) -------------
    # TODO(synk): hidden dropout treated as identity.
    h1 = _add_ln(attn, h, g1, be1)

    # --- BitBertIntermediate: AdvancedBitLinear(H -> I) + gelu ----------------
    xc, sx = _act_fq_parts(h1)
    wi_int, swi = _weight_fq_parts(wi_ref[...])
    inter = jnp.dot(xc.astype(jnp.bfloat16), wi_int.astype(jnp.bfloat16),
                    preferred_element_type=f32) * (sx * swi) + bi_ref[...]
    inter = _gelu(_act_fq(inter))

    # --- BitBertOutput: AdvancedBitLinear(I -> H) + dropout + LN(+h1) ---------
    x2c, sx2 = _act_fq_parts(inter)
    w2_int, sw2 = _weight_fq_parts(w2_ref[...])
    out = jnp.dot(x2c.astype(jnp.bfloat16), w2_int.astype(jnp.bfloat16),
                  preferred_element_type=f32) * (sx2 * sw2) + b2
    out = _act_fq(out)
    out_ref[...] = _add_ln(out, h1, g2, be2)         # lane-dense (M,128) store


# ------------------------------ JAX-side wrapper -------------------------------
def bitbert_layer(hidden_sbh, params):
    """hidden_sbh: (S, B, H) as in torch batch_first=False MultiheadAttention."""
    S, B, H = hidden_sbh.shape
    M = S * B
    # Free reshape (contiguous): row i = s*B + b; no XLA transpose needed since
    # batch membership is handled in-kernel by the cross-batch score bias.
    h2d = hidden_sbh.reshape(M, H)

    # Host-side weight plumbing: pre-transpose to (K, N) and pack QKV as a
    # block-diagonal (2H, 3H) weight so q/k use the fake-quantized input and
    # v uses the raw hidden in a single fused matmul.
    W = params['in_proj_w']                          # (3H, H) = [Wq; Wk; Wv]
    wq_t, wk_t, wv_t = W[:H].T, W[H:2 * H].T, W[2 * H:].T
    z = jnp.zeros((H, H), jnp.float32)
    wqkv = jnp.concatenate(
        [jnp.concatenate([wq_t, wk_t, z], axis=1),
         jnp.concatenate([z, z, wv_t], axis=1)], axis=0)          # (2H, 3H)
    bqkv = params['in_proj_b'].reshape(1, 3 * H)

    wo_t = params['out_proj_w'].T                    # (H, H)
    wi_t = params['inter_w'].T                       # (H, I)
    bi = params['inter_b'].reshape(1, INTER)
    w2_t = params['out_w'].T                         # (I, H)
    vecs = jnp.stack([params['out_proj_b'], params['ln1_g'], params['ln1_b'],
                      params['out_b'], params['ln2_g'], params['ln2_b']],
                     axis=0)                          # (6, H) packed

    kern = functools.partial(bitbert_layer_kernel,
                             batch=B, heads=HEADS, head_dim=HEAD_DIM)
    # NOTE(v7x): a single grid=() block uses one TensorCore; at M=B*S=16 the
    # layer is issue/latency-bound and a cross-core reduction of the global
    # fake-quant min/max statistics would cost more than the 2nd core saves.
    out2d = pl.pallas_call(
        kern,
        out_shape=jax.ShapeDtypeStruct((M, H), jnp.float32),
    )(h2d, wqkv, bqkv, wo_t, wi_t, bi, w2_t, vecs)

    return out2d.reshape(S, B, H)                    # free reshape back


# ------------------------------ param init ------------------------------------
def init_params(key):
    ks = jax.random.split(key, 6)

    def nrm(k, shape):
        return jax.random.normal(k, shape, dtype=jnp.float32) * 0.02

    return {
        'in_proj_w': nrm(ks[0], (3 * HIDDEN, HIDDEN)),
        'in_proj_b': nrm(ks[1], (3 * HIDDEN,)),
        'out_proj_w': nrm(ks[2], (HIDDEN, HIDDEN)),
        'out_proj_b': nrm(ks[3], (HIDDEN,)),
        'ln1_g': jnp.ones((HIDDEN,), jnp.float32),
        'ln1_b': jnp.zeros((HIDDEN,), jnp.float32),
        'inter_w': nrm(ks[4], (INTER, HIDDEN)),
        'inter_b': jnp.zeros((INTER,), jnp.float32),
        'out_w': nrm(ks[5], (HIDDEN, INTER)),
        'out_b': jnp.zeros((HIDDEN,), jnp.float32),
        'ln2_g': jnp.ones((HIDDEN,), jnp.float32),
        'ln2_b': jnp.zeros((HIDDEN,), jnp.float32),
    }


# ---------------------------------- main ---------------------------------------
if __name__ == "__main__":
    key = jax.random.PRNGKey(0)
    pkey, hkey = jax.random.split(key)
    params = init_params(pkey)

    S, B = 8, 2
    hidden_states = jax.random.normal(hkey, (S, B, HIDDEN), dtype=jnp.float32)
    # attention_mask = None (reference call with no key_padding_mask)

    out = jax.jit(bitbert_layer)(hidden_states, params)
    jax.block_until_ready(out)

    assert out.shape == (S, B, HIDDEN), out.shape
    assert bool(jnp.all(jnp.isfinite(out)))
    print("KERNEL_OK")
</pallas_src>

<mosaic_0001>
module attributes {stable_mosaic.version = 11 : i64} {
  func.func @bitbert_layer_kernel(%arg0: memref<16x128xf32, #tpu.memory_space<vmem>>, %arg1: memref<256x384xf32, #tpu.memory_space<vmem>>, %arg2: memref<1x384xf32, #tpu.memory_space<vmem>>, %arg3: memref<128x128xf32, #tpu.memory_space<vmem>>, %arg4: memref<128x256xf32, #tpu.memory_space<vmem>>, %arg5: memref<1x256xf32, #tpu.memory_space<vmem>>, %arg6: memref<256x128xf32, #tpu.memory_space<vmem>>, %arg7: memref<6x128xf32, #tpu.memory_space<vmem>>, %arg8: memref<16x128xf32, #tpu.memory_space<vmem>>) attributes {dimension_semantics = [], scalar_prefetch = 0 : i64, scratch_operands = 0 : i64, tpu.core_type = #tpu.core_type<tc>} {
    %c0 = arith.constant 0 : index
    %c0_0 = arith.constant 0 : index
    %0 = vector.load %arg0[%c0, %c0_0] : memref<16x128xf32, #tpu.memory_space<vmem>>, vector<16x128xf32>
    %c0_1 = arith.constant 0 : index
    %c0_2 = arith.constant 0 : index
    %1 = vector.load %arg7[%c0_1, %c0_2] : memref<6x128xf32, #tpu.memory_space<vmem>>, vector<6x128xf32>
    %2 = vector.extract_strided_slice %1 {offsets = [0, 0], sizes = [1, 128], strides = [1, 1]} : vector<6x128xf32> to vector<1x128xf32>
    %3 = vector.extract_strided_slice %1 {offsets = [1, 0], sizes = [1, 128], strides = [1, 1]} : vector<6x128xf32> to vector<1x128xf32>
    %4 = vector.extract_strided_slice %1 {offsets = [2, 0], sizes = [1, 128], strides = [1, 1]} : vector<6x128xf32> to vector<1x128xf32>
    %5 = vector.extract_strided_slice %1 {offsets = [3, 0], sizes = [1, 128], strides = [1, 1]} : vector<6x128xf32> to vector<1x128xf32>
    %6 = vector.extract_strided_slice %1 {offsets = [4, 0], sizes = [1, 128], strides = [1, 1]} : vector<6x128xf32> to vector<1x128xf32>
    %7 = vector.extract_strided_slice %1 {offsets = [5, 0], sizes = [1, 128], strides = [1, 1]} : vector<6x128xf32> to vector<1x128xf32>
    %cst = arith.constant dense<0x7F800000> : vector<16xf32>
    %8 = vector.multi_reduction <minimumf>, %0, %cst [1] : vector<16x128xf32> to vector<16xf32>
    %9 = vector.shape_cast %8 : vector<16xf32> to vector<16x1xf32>
    %cst_3 = arith.constant dense<0x7F800000> : vector<1xf32>
    %10 = vector.multi_reduction <minimumf>, %9, %cst_3 [0] : vector<16x1xf32> to vector<1xf32>
    %11 = vector.shape_cast %10 : vector<1xf32> to vector<1x1xf32>
    %cst_4 = arith.constant dense<0xFF800000> : vector<16xf32>
    %12 = vector.multi_reduction <maximumf>, %0, %cst_4 [1] : vector<16x128xf32> to vector<16xf32>
    %13 = vector.shape_cast %12 : vector<16xf32> to vector<16x1xf32>
    %cst_5 = arith.constant dense<0xFF800000> : vector<1xf32>
    %14 = vector.multi_reduction <maximumf>, %13, %cst_5 [0] : vector<16x1xf32> to vector<1xf32>
    %15 = vector.shape_cast %14 : vector<1xf32> to vector<1x1xf32>
    %16 = arith.subf %15, %11 : vector<1x1xf32>
    %cst_6 = arith.constant 9.99999993E-9 : f32
    %17 = vector.broadcast %cst_6 : f32 to vector<1x1xf32>
    %18 = arith.cmpf oge, %16, %17 : vector<1x1xf32>
    %cst_7 = arith.constant 0.00392156886 : f32
    %19 = vector.broadcast %cst_7 : f32 to vector<1x1xf32>
    %20 = arith.mulf %16, %19 : vector<1x1xf32>
    %cst_8 = arith.constant 1.000000e+00 : f32
    %21 = vector.broadcast %cst_8 : f32 to vector<1x1xf32>
    %22 = arith.select %18, %20, %21 : vector<1x1xi1>, vector<1x1xf32>
    %23 = arith.divf %11, %22 : vector<1x1xf32>
    %24 = math.roundeven %23 : vector<1x1xf32>
    %cst_9 = arith.constant 0.000000e+00 : f32
    %25 = vector.broadcast %cst_9 : f32 to vector<1x1xf32>
    %26 = arith.subf %25, %24 : vector<1x1xf32>
    %cst_10 = arith.constant 0.000000e+00 : f32
    %cst_11 = arith.constant 2.550000e+02 : f32
    %27 = vector.broadcast %cst_10 : f32 to vector<1x1xf32>
    %28 = arith.maximumf %27, %26 : vector<1x1xf32>
    %29 = vector.broadcast %cst_11 : f32 to vector<1x1xf32>
    %30 = arith.minimumf %29, %28 : vector<1x1xf32>
    %cst_12 = arith.constant 1.000000e+00 : f32
    %31 = vector.broadcast %cst_12 : f32 to vector<1x1xf32>
    %32 = arith.divf %31, %22 : vector<1x1xf32>
    %33 = vector.broadcast %32 : vector<1x1xf32> to vector<16x128xf32>
    %34 = arith.mulf %0, %33 : vector<16x128xf32>
    %35 = vector.broadcast %30 : vector<1x1xf32> to vector<16x128xf32>
    %36 = arith.addf %34, %35 : vector<16x128xf32>
    %37 = math.roundeven %36 : vector<16x128xf32>
    %cst_13 = arith.constant 0.000000e+00 : f32
    %cst_14 = arith.constant 2.550000e+02 : f32
    %38 = vector.broadcast %cst_13 : f32 to vector<16x128xf32>
    %39 = arith.maximumf %38, %37 : vector<16x128xf32>
    %40 = vector.broadcast %cst_14 : f32 to vector<16x128xf32>
    %41 = arith.minimumf %40, %39 : vector<16x128xf32>
    %42 = vector.broadcast %30 : vector<1x1xf32> to vector<16x128xf32>
    %43 = arith.subf %41, %42 : vector<16x128xf32>
    %44 = vector.shape_cast %18 : vector<1x1xi1> to vector<1x1xi1>
    %45 = vector.broadcast %44 : vector<1x1xi1> to vector<16x128xi1>
    %46 = arith.select %45, %43, %0 : vector<16x128xi1>, vector<16x128xf32>
    %cst_15 = arith.constant 1.000000e+00 : f32
    %47 = vector.broadcast %cst_15 : f32 to vector<1x1xf32>
    %48 = arith.select %18, %22, %47 : vector<1x1xi1>, vector<1x1xf32>
    %49 = vector.broadcast %48 : vector<1x1xf32> to vector<16x128xf32>
    %50 = arith.mulf %46, %49 : vector<16x128xf32>
    %51 = tpu.concatenate %50, %0 in 1 : vector<16x128xf32>, vector<16x128xf32> -> vector<16x256xf32>
    %c0_16 = arith.constant 0 : index
    %c0_17 = arith.constant 0 : index
    %52 = vector.load %arg1[%c0_16, %c0_17] : memref<256x384xf32, #tpu.memory_space<vmem>>, vector<256x384xf32>
    %cst_18 = arith.constant dense<0.000000e+00> : vector<16x384xf32>
    %53 = tpu.matmul %51, %52, %cst_18 {dimension_numbers = #tpu.dot_dimension_numbers<[1], [0], [0], [1], [0, 0, 1, 1], [], []>} : vector<16x256xf32>, vector<256x384xf32>, vector<16x384xf32> -> vector<16x384xf32>
    %c0_19 = arith.constant 0 : index
    %c0_20 = arith.constant 0 : index
    %54 = vector.load %arg2[%c0_19, %c0_20] : memref<1x384xf32, #tpu.memory_space<vmem>>, vector<1x384xf32>
    %55 = vector.broadcast %54 : vector<1x384xf32> to vector<16x384xf32>
    %56 = arith.addf %53, %55 : vector<16x384xf32>
    %57 = vector.extract_strided_slice %56 {offsets = [0, 0], sizes = [16, 128], strides = [1, 1]} : vector<16x384xf32> to vector<16x128xf32>
    %58 = vector.extract_strided_slice %56 {offsets = [0, 128], sizes = [16, 128], strides = [1, 1]} : vector<16x384xf32> to vector<16x128xf32>
    %59 = vector.extract_strided_slice %56 {offsets = [0, 256], sizes = [16, 128], strides = [1, 1]} : vector<16x384xf32> to vector<16x128xf32>
    %60 = tpu.iota {dimensions = array<i32: 0>} : vector<16x16xi32>
    %c2_i32 = arith.constant 2 : i32
    %c0_i32 = arith.constant 0 : i32
    %61 = arith.cmpi eq, %c2_i32, %c0_i32 : i32
    %c1_i32 = arith.constant 1 : i32
    %62 = arith.select %61, %c1_i32, %c2_i32 : i32
    %63 = vector.broadcast %62 : i32 to vector<16x16xi32>
    %64 = arith.remsi %60, %63 : vector<16x16xi32>
    %c0_i32_21 = arith.constant 0 : i32
    %65 = vector.broadcast %c0_i32_21 : i32 to vector<16x16xi32>
    %66 = arith.cmpi ne, %64, %65 : vector<16x16xi32>
    %c0_i32_22 = arith.constant 0 : i32
    %67 = vector.broadcast %c0_i32_22 : i32 to vector<16x16xi32>
    %68 = arith.cmpi slt, %64, %67 : vector<16x16xi32>
    %c0_i32_23 = arith.constant 0 : i32
    %69 = arith.cmpi slt, %62, %c0_i32_23 : i32
    %70 = vector.broadcast %69 : i1 to vector<16x16xi1>
    %71 = vector.broadcast %70 : vector<16x16xi1> to vector<16x16xi1>
    %72 = arith.xori %68, %71 : vector<16x16xi1>
    %73 = arith.andi %72, %66 : vector<16x16xi1>
    %74 = vector.broadcast %62 : i32 to vector<16x16xi32>
    %75 = arith.addi %64, %74 : vector<16x16xi32>
    %76 = arith.select %73, %75, %64 : vector<16x16xi1>, vector<16x16xi32>
    %77 = tpu.iota {dimensions = array<i32: 1>} : vector<16x16xi32>
    %c2_i32_24 = arith.constant 2 : i32
    %c0_i32_25 = arith.constant 0 : i32
    %78 = arith.cmpi eq, %c2_i32_24, %c0_i32_25 : i32
    %c1_i32_26 = arith.constant 1 : i32
    %79 = arith.select %78, %c1_i32_26, %c2_i32_24 : i32
    %80 = vector.broadcast %79 : i32 to vector<16x16xi32>
    %81 = arith.remsi %77, %80 : vector<16x16xi32>
    %c0_i32_27 = arith.constant 0 : i32
    %82 = vector.broadcast %c0_i32_27 : i32 to vector<16x16xi32>
    %83 = arith.cmpi ne, %81, %82 : vector<16x16xi32>
    %c0_i32_28 = arith.constant 0 : i32
    %84 = vector.broadcast %c0_i32_28 : i32 to vector<16x16xi32>
    %85 = arith.cmpi slt, %81, %84 : vector<16x16xi32>
    %c0_i32_29 = arith.constant 0 : i32
    %86 = arith.cmpi slt, %79, %c0_i32_29 : i32
    %87 = vector.broadcast %86 : i1 to vector<16x16xi1>
    %88 = vector.broadcast %87 : vector<16x16xi1> to vector<16x16xi1>
    %89 = arith.xori %85, %88 : vector<16x16xi1>
    %90 = arith.andi %89, %83 : vector<16x16xi1>
    %91 = vector.broadcast %79 : i32 to vector<16x16xi32>
    %92 = arith.addi %81, %91 : vector<16x16xi32>
    %93 = arith.select %90, %92, %81 : vector<16x16xi1>, vector<16x16xi32>
    %94 = arith.cmpi eq, %76, %93 : vector<16x16xi32>
    %cst_30 = arith.constant 0.000000e+00 : f32
    %cst_31 = arith.constant -1.000000e+30 : f32
    %95 = vector.broadcast %cst_30 : f32 to vector<16x16xf32>
    %96 = vector.broadcast %cst_31 : f32 to vector<16x16xf32>
    %97 = arith.select %94, %95, %96 : vector<16x16xi1>, vector<16x16xf32>
    %98 = tpu.iota {dimensions = array<i32: 1>} : vector<1x128xi32>
    %cst_32 = arith.constant 0.000000e+00 : f32
    %99 = vector.broadcast %cst_32 : f32 to vector<16x128xf32>
    %c0_i32_33 = arith.constant 0 : i32
    %100 = vector.broadcast %c0_i32_33 : i32 to vector<1x128xi32>
    %101 = arith.cmpi sge, %98, %100 : vector<1x128xi32>
    %c32_i32 = arith.constant 32 : i32
    %102 = vector.broadcast %c32_i32 : i32 to vector<1x128xi32>
    %103 = arith.cmpi slt, %98, %102 : vector<1x128xi32>
    %104 = arith.andi %101, %103 : vector<1x128xi1>
    %cst_34 = arith.constant 1.000000e+00 : f32
    %cst_35 = arith.constant 0.000000e+00 : f32
    %105 = vector.broadcast %cst_34 : f32 to vector<1x128xf32>
    %106 = vector.broadcast %cst_35 : f32 to vector<1x128xf32>
    %107 = arith.select %104, %105, %106 : vector<1x128xi1>, vector<1x128xf32>
    %108 = vector.broadcast %107 : vector<1x128xf32> to vector<16x128xf32>
    %109 = arith.mulf %58, %108 : vector<16x128xf32>
    %cst_36 = arith.constant dense<0.000000e+00> : vector<16x16xf32>
    %110 = tpu.matmul %57, %109, %cst_36 {dimension_numbers = #tpu.dot_dimension_numbers<[1], [1], [0], [0], [0, 0, 1, 0], [], []>} : vector<16x128xf32>, vector<16x128xf32>, vector<16x16xf32> -> vector<16x16xf32>
    %cst_37 = arith.constant 0.176776692 : f32
    %111 = vector.broadcast %cst_37 : f32 to vector<16x16xf32>
    %112 = arith.mulf %110, %111 : vector<16x16xf32>
    %113 = arith.addf %112, %97 : vector<16x16xf32>
    %cst_38 = arith.constant dense<0xFF800000> : vector<16xf32>
    %114 = vector.multi_reduction <maximumf>, %113, %cst_38 [1] : vector<16x16xf32> to vector<16xf32>
    %115 = vector.shape_cast %114 : vector<16xf32> to vector<16x1xf32>
    %116 = vector.broadcast %115 : vector<16x1xf32> to vector<16x16xf32>
    %117 = arith.subf %113, %116 : vector<16x16xf32>
    %118 = math.exp %117 : vector<16x16xf32>
    %cst_39 = arith.constant dense<0.000000e+00> : vector<16xf32>
    %119 = vector.multi_reduction <add>, %118, %cst_39 [1] : vector<16x16xf32> to vector<16xf32>
    %120 = vector.shape_cast %119 : vector<16xf32> to vector<16x1xf32>
    %121 = tpu.reciprocal %120 {approx = true} : vector<16x1xf32> -> vector<16x1xf32>
    %122 = vector.broadcast %121 : vector<16x1xf32> to vector<16x16xf32>
    %123 = arith.mulf %118, %122 : vector<16x16xf32>
    %124 = vector.broadcast %107 : vector<1x128xf32> to vector<16x128xf32>
    %125 = arith.mulf %59, %124 : vector<16x128xf32>
    %cst_40 = arith.constant dense<0.000000e+00> : vector<16x128xf32>
    %126 = tpu.matmul %123, %125, %cst_40 {dimension_numbers = #tpu.dot_dimension_numbers<[1], [0], [0], [1], [0, 0, 1, 1], [], []>} : vector<16x16xf32>, vector<16x128xf32>, vector<16x128xf32> -> vector<16x128xf32>
    %127 = arith.addf %99, %126 : vector<16x128xf32>
    %c32_i32_41 = arith.constant 32 : i32
    %128 = vector.broadcast %c32_i32_41 : i32 to vector<1x128xi32>
    %129 = arith.cmpi sge, %98, %128 : vector<1x128xi32>
    %c64_i32 = arith.constant 64 : i32
    %130 = vector.broadcast %c64_i32 : i32 to vector<1x128xi32>
    %131 = arith.cmpi slt, %98, %130 : vector<1x128xi32>
    %132 = arith.andi %129, %131 : vector<1x128xi1>
    %cst_42 = arith.constant 1.000000e+00 : f32
    %cst_43 = arith.constant 0.000000e+00 : f32
    %133 = vector.broadcast %cst_42 : f32 to vector<1x128xf32>
    %134 = vector.broadcast %cst_43 : f32 to vector<1x128xf32>
    %135 = arith.select %132, %133, %134 : vector<1x128xi1>, vector<1x128xf32>
    %136 = vector.broadcast %135 : vector<1x128xf32> to vector<16x128xf32>
    %137 = arith.mulf %58, %136 : vector<16x128xf32>
    %cst_44 = arith.constant dense<0.000000e+00> : vector<16x16xf32>
    %138 = tpu.matmul %57, %137, %cst_44 {dimension_numbers = #tpu.dot_dimension_numbers<[1], [1], [0], [0], [0, 0, 1, 0], [], []>} : vector<16x128xf32>, vector<16x128xf32>, vector<16x16xf32> -> vector<16x16xf32>
    %cst_45 = arith.constant 0.176776692 : f32
    %139 = vector.broadcast %cst_45 : f32 to vector<16x16xf32>
    %140 = arith.mulf %138, %139 : vector<16x16xf32>
    %141 = arith.addf %140, %97 : vector<16x16xf32>
    %cst_46 = arith.constant dense<0xFF800000> : vector<16xf32>
    %142 = vector.multi_reduction <maximumf>, %141, %cst_46 [1] : vector<16x16xf32> to vector<16xf32>
    %143 = vector.shape_cast %142 : vector<16xf32> to vector<16x1xf32>
    %144 = vector.broadcast %143 : vector<16x1xf32> to vector<16x16xf32>
    %145 = arith.subf %141, %144 : vector<16x16xf32>
    %146 = math.exp %145 : vector<16x16xf32>
    %cst_47 = arith.constant dense<0.000000e+00> : vector<16xf32>
    %147 = vector.multi_reduction <add>, %146, %cst_47 [1] : vector<16x16xf32> to vector<16xf32>
    %148 = vector.shape_cast %147 : vector<16xf32> to vector<16x1xf32>
    %149 = tpu.reciprocal %148 {approx = true} : vector<16x1xf32> -> vector<16x1xf32>
    %150 = vector.broadcast %149 : vector<16x1xf32> to vector<16x16xf32>
    %151 = arith.mulf %146, %150 : vector<16x16xf32>
    %152 = vector.broadcast %135 : vector<1x128xf32> to vector<16x128xf32>
    %153 = arith.mulf %59, %152 : vector<16x128xf32>
    %cst_48 = arith.constant dense<0.000000e+00> : vector<16x128xf32>
    %154 = tpu.matmul %151, %153, %cst_48 {dimension_numbers = #tpu.dot_dimension_numbers<[1], [0], [0], [1], [0, 0, 1, 1], [], []>} : vector<16x16xf32>, vector<16x128xf32>, vector<16x128xf32> -> vector<16x128xf32>
    %155 = arith.addf %127, %154 : vector<16x128xf32>
    %c64_i32_49 = arith.constant 64 : i32
    %156 = vector.broadcast %c64_i32_49 : i32 to vector<1x128xi32>
    %157 = arith.cmpi sge, %98, %156 : vector<1x128xi32>
    %c96_i32 = arith.constant 96 : i32
    %158 = vector.broadcast %c96_i32 : i32 to vector<1x128xi32>
    %159 = arith.cmpi slt, %98, %158 : vector<1x128xi32>
    %160 = arith.andi %157, %159 : vector<1x128xi1>
    %cst_50 = arith.constant 1.000000e+00 : f32
    %cst_51 = arith.constant 0.000000e+00 : f32
    %161 = vector.broadcast %cst_50 : f32 to vector<1x128xf32>
    %162 = vector.broadcast %cst_51 : f32 to vector<1x128xf32>
    %163 = arith.select %160, %161, %162 : vector<1x128xi1>, vector<1x128xf32>
    %164 = vector.broadcast %163 : vector<1x128xf32> to vector<16x128xf32>
    %165 = arith.mulf %58, %164 : vector<16x128xf32>
    %cst_52 = arith.constant dense<0.000000e+00> : vector<16x16xf32>
    %166 = tpu.matmul %57, %165, %cst_52 {dimension_numbers = #tpu.dot_dimension_numbers<[1], [1], [0], [0], [0, 0, 1, 0], [], []>} : vector<16x128xf32>, vector<16x128xf32>, vector<16x16xf32> -> vector<16x16xf32>
    %cst_53 = arith.constant 0.176776692 : f32
    %167 = vector.broadcast %cst_53 : f32 to vector<16x16xf32>
    %168 = arith.mulf %166, %167 : vector<16x16xf32>
    %169 = arith.addf %168, %97 : vector<16x16xf32>
    %cst_54 = arith.constant dense<0xFF800000> : vector<16xf32>
    %170 = vector.multi_reduction <maximumf>, %169, %cst_54 [1] : vector<16x16xf32> to vector<16xf32>
    %171 = vector.shape_cast %170 : vector<16xf32> to vector<16x1xf32>
    %172 = vector.broadcast %171 : vector<16x1xf32> to vector<16x16xf32>
    %173 = arith.subf %169, %172 : vector<16x16xf32>
    %174 = math.exp %173 : vector<16x16xf32>
    %cst_55 = arith.constant dense<0.000000e+00> : vector<16xf32>
    %175 = vector.multi_reduction <add>, %174, %cst_55 [1] : vector<16x16xf32> to vector<16xf32>
    %176 = vector.shape_cast %175 : vector<16xf32> to vector<16x1xf32>
    %177 = tpu.reciprocal %176 {approx = true} : vector<16x1xf32> -> vector<16x1xf32>
    %178 = vector.broadcast %177 : vector<16x1xf32> to vector<16x16xf32>
    %179 = arith.mulf %174, %178 : vector<16x16xf32>
    %180 = vector.broadcast %163 : vector<1x128xf32> to vector<16x128xf32>
    %181 = arith.mulf %59, %180 : vector<16x128xf32>
    %cst_56 = arith.constant dense<0.000000e+00> : vector<16x128xf32>
    %182 = tpu.matmul %179, %181, %cst_56 {dimension_numbers = #tpu.dot_dimension_numbers<[1], [0], [0], [1], [0, 0, 1, 1], [], []>} : vector<16x16xf32>, vector<16x128xf32>, vector<16x128xf32> -> vector<16x128xf32>
    %183 = arith.addf %155, %182 : vector<16x128xf32>
    %c96_i32_57 = arith.constant 96 : i32
    %184 = vector.broadcast %c96_i32_57 : i32 to vector<1x128xi32>
    %185 = arith.cmpi sge, %98, %184 : vector<1x128xi32>
    %c128_i32 = arith.constant 128 : i32
    %186 = vector.broadcast %c128_i32 : i32 to vector<1x128xi32>
    %187 = arith.cmpi slt, %98, %186 : vector<1x128xi32>
    %188 = arith.andi %185, %187 : vector<1x128xi1>
    %cst_58 = arith.constant 1.000000e+00 : f32
    %cst_59 = arith.constant 0.000000e+00 : f32
    %189 = vector.broadcast %cst_58 : f32 to vector<1x128xf32>
    %190 = vector.broadcast %cst_59 : f32 to vector<1x128xf32>
    %191 = arith.select %188, %189, %190 : vector<1x128xi1>, vector<1x128xf32>
    %192 = vector.broadcast %191 : vector<1x128xf32> to vector<16x128xf32>
    %193 = arith.mulf %58, %192 : vector<16x128xf32>
    %cst_60 = arith.constant dense<0.000000e+00> : vector<16x16xf32>
    %194 = tpu.matmul %57, %193, %cst_60 {dimension_numbers = #tpu.dot_dimension_numbers<[1], [1], [0], [0], [0, 0, 1, 0], [], []>} : vector<16x128xf32>, vector<16x128xf32>, vector<16x16xf32> -> vector<16x16xf32>
    %cst_61 = arith.constant 0.176776692 : f32
    %195 = vector.broadcast %cst_61 : f32 to vector<16x16xf32>
    %196 = arith.mulf %194, %195 : vector<16x16xf32>
    %197 = arith.addf %196, %97 : vector<16x16xf32>
    %cst_62 = arith.constant dense<0xFF800000> : vector<16xf32>
    %198 = vector.multi_reduction <maximumf>, %197, %cst_62 [1] : vector<16x16xf32> to vector<16xf32>
    %199 = vector.shape_cast %198 : vector<16xf32> to vector<16x1xf32>
    %200 = vector.broadcast %199 : vector<16x1xf32> to vector<16x16xf32>
    %201 = arith.subf %197, %200 : vector<16x16xf32>
    %202 = math.exp %201 : vector<16x16xf32>
    %cst_63 = arith.constant dense<0.000000e+00> : vector<16xf32>
    %203 = vector.multi_reduction <add>, %202, %cst_63 [1] : vector<16x16xf32> to vector<16xf32>
    %204 = vector.shape_cast %203 : vector<16xf32> to vector<16x1xf32>
    %205 = tpu.reciprocal %204 {approx = true} : vector<16x1xf32> -> vector<16x1xf32>
    %206 = vector.broadcast %205 : vector<16x1xf32> to vector<16x16xf32>
    %207 = arith.mulf %202, %206 : vector<16x16xf32>
    %208 = vector.broadcast %191 : vector<1x128xf32> to vector<16x128xf32>
    %209 = arith.mulf %59, %208 : vector<16x128xf32>
    %cst_64 = arith.constant dense<0.000000e+00> : vector<16x128xf32>
    %210 = tpu.matmul %207, %209, %cst_64 {dimension_numbers = #tpu.dot_dimension_numbers<[1], [0], [0], [1], [0, 0, 1, 1], [], []>} : vector<16x16xf32>, vector<16x128xf32>, vector<16x128xf32> -> vector<16x128xf32>
    %211 = arith.addf %183, %210 : vector<16x128xf32>
    %c0_65 = arith.constant 0 : index
    %c0_66 = arith.constant 0 : index
    %212 = vector.load %arg3[%c0_65, %c0_66] : memref<128x128xf32, #tpu.memory_space<vmem>>, vector<128x128xf32>
    %cst_67 = arith.constant dense<0.000000e+00> : vector<16x128xf32>
    %213 = tpu.matmul %211, %212, %cst_67 {dimension_numbers = #tpu.dot_dimension_numbers<[1], [0], [0], [1], [0, 0, 1, 1], [], []>} : vector<16x128xf32>, vector<128x128xf32>, vector<16x128xf32> -> vector<16x128xf32>
    %214 = vector.broadcast %2 : vector<1x128xf32> to vector<16x128xf32>
    %215 = arith.addf %213, %214 : vector<16x128xf32>
    %cst_68 = arith.constant dense<0x7F800000> : vector<16xf32>
    %216 = vector.multi_reduction <minimumf>, %215, %cst_68 [1] : vector<16x128xf32> to vector<16xf32>
    %217 = vector.shape_cast %216 : vector<16xf32> to vector<16x1xf32>
    %cst_69 = arith.constant dense<0x7F800000> : vector<1xf32>
    %218 = vector.multi_reduction <minimumf>, %217, %cst_69 [0] : vector<16x1xf32> to vector<1xf32>
    %219 = vector.shape_cast %218 : vector<1xf32> to vector<1x1xf32>
    %cst_70 = arith.constant dense<0xFF800000> : vector<16xf32>
    %220 = vector.multi_reduction <maximumf>, %215, %cst_70 [1] : vector<16x128xf32> to vector<16xf32>
    %221 = vector.shape_cast %220 : vector<16xf32> to vector<16x1xf32>
    %cst_71 = arith.constant dense<0xFF800000> : vector<1xf32>
    %222 = vector.multi_reduction <maximumf>, %221, %cst_71 [0] : vector<16x1xf32> to vector<1xf32>
    %223 = vector.shape_cast %222 : vector<1xf32> to vector<1x1xf32>
    %224 = arith.subf %223, %219 : vector<1x1xf32>
    %cst_72 = arith.constant 9.99999993E-9 : f32
    %225 = vector.broadcast %cst_72 : f32 to vector<1x1xf32>
    %226 = arith.cmpf oge, %224, %225 : vector<1x1xf32>
    %cst_73 = arith.constant 0.00392156886 : f32
    %227 = vector.broadcast %cst_73 : f32 to vector<1x1xf32>
    %228 = arith.mulf %224, %227 : vector<1x1xf32>
    %cst_74 = arith.constant 1.000000e+00 : f32
    %229 = vector.broadcast %cst_74 : f32 to vector<1x1xf32>
    %230 = arith.select %226, %228, %229 : vector<1x1xi1>, vector<1x1xf32>
    %231 = arith.divf %219, %230 : vector<1x1xf32>
    %232 = math.roundeven %231 : vector<1x1xf32>
    %cst_75 = arith.constant 0.000000e+00 : f32
    %233 = vector.broadcast %cst_75 : f32 to vector<1x1xf32>
    %234 = arith.subf %233, %232 : vector<1x1xf32>
    %cst_76 = arith.constant 0.000000e+00 : f32
    %cst_77 = arith.constant 2.550000e+02 : f32
    %235 = vector.broadcast %cst_76 : f32 to vector<1x1xf32>
    %236 = arith.maximumf %235, %234 : vector<1x1xf32>
    %237 = vector.broadcast %cst_77 : f32 to vector<1x1xf32>
    %238 = arith.minimumf %237, %236 : vector<1x1xf32>
    %cst_78 = arith.constant 1.000000e+00 : f32
    %239 = vector.broadcast %cst_78 : f32 to vector<1x1xf32>
    %240 = arith.divf %239, %230 : vector<1x1xf32>
    %241 = vector.broadcast %240 : vector<1x1xf32> to vector<16x128xf32>
    %242 = arith.mulf %215, %241 : vector<16x128xf32>
    %243 = vector.broadcast %238 : vector<1x1xf32> to vector<16x128xf32>
    %244 = arith.addf %242, %243 : vector<16x128xf32>
    %245 = math.roundeven %244 : vector<16x128xf32>
    %cst_79 = arith.constant 0.000000e+00 : f32
    %cst_80 = arith.constant 2.550000e+02 : f32
    %246 = vector.broadcast %cst_79 : f32 to vector<16x128xf32>
    %247 = arith.maximumf %246, %245 : vector<16x128xf32>
    %248 = vector.broadcast %cst_80 : f32 to vector<16x128xf32>
    %249 = arith.minimumf %248, %247 : vector<16x128xf32>
    %250 = vector.broadcast %238 : vector<1x1xf32> to vector<16x128xf32>
    %251 = arith.subf %249, %250 : vector<16x128xf32>
    %252 = vector.shape_cast %226 : vector<1x1xi1> to vector<1x1xi1>
    %253 = vector.broadcast %252 : vector<1x1xi1> to vector<16x128xi1>
    %254 = arith.select %253, %251, %215 : vector<16x128xi1>, vector<16x128xf32>
    %cst_81 = arith.constant 1.000000e+00 : f32
    %255 = vector.broadcast %cst_81 : f32 to vector<1x1xf32>
    %256 = arith.select %226, %230, %255 : vector<1x1xi1>, vector<1x1xf32>
    %257 = vector.broadcast %256 : vector<1x1xf32> to vector<16x128xf32>
    %258 = arith.mulf %254, %257 : vector<16x128xf32>
    %259 = arith.addf %258, %0 : vector<16x128xf32>
    %cst_82 = arith.constant dense<0.000000e+00> : vector<16xf32>
    %260 = vector.multi_reduction <add>, %259, %cst_82 [1] : vector<16x128xf32> to vector<16xf32>
    %261 = vector.shape_cast %260 : vector<16xf32> to vector<16x1xf32>
    %cst_83 = arith.constant 1.280000e+02 : f32
    %262 = vector.broadcast %cst_83 : f32 to vector<16x1xf32>
    %263 = arith.divf %261, %262 : vector<16x1xf32>
    %264 = vector.broadcast %263 : vector<16x1xf32> to vector<16x128xf32>
    %265 = arith.subf %259, %264 : vector<16x128xf32>
    %266 = arith.mulf %265, %265 : vector<16x128xf32>
    %cst_84 = arith.constant dense<0.000000e+00> : vector<16xf32>
    %267 = vector.multi_reduction <add>, %266, %cst_84 [1] : vector<16x128xf32> to vector<16xf32>
    %268 = vector.shape_cast %267 : vector<16xf32> to vector<16x1xf32>
    %cst_85 = arith.constant 1.280000e+02 : f32
    %269 = vector.broadcast %cst_85 : f32 to vector<16x1xf32>
    %270 = arith.divf %268, %269 : vector<16x1xf32>
    %271 = vector.broadcast %263 : vector<16x1xf32> to vector<16x128xf32>
    %272 = arith.subf %259, %271 : vector<16x128xf32>
    %cst_86 = arith.constant 9.99999996E-13 : f32
    %273 = vector.broadcast %cst_86 : f32 to vector<16x1xf32>
    %274 = arith.addf %270, %273 : vector<16x1xf32>
    %275 = math.rsqrt %274 : vector<16x1xf32>
    %276 = vector.broadcast %275 : vector<16x1xf32> to vector<16x128xf32>
    %277 = arith.mulf %272, %276 : vector<16x128xf32>
    %278 = vector.broadcast %3 : vector<1x128xf32> to vector<16x128xf32>
    %279 = arith.mulf %277, %278 : vector<16x128xf32>
    %280 = vector.broadcast %4 : vector<1x128xf32> to vector<16x128xf32>
    %281 = arith.addf %279, %280 : vector<16x128xf32>
    %cst_87 = arith.constant dense<0x7F800000> : vector<16xf32>
    %282 = vector.multi_reduction <minimumf>, %281, %cst_87 [1] : vector<16x128xf32> to vector<16xf32>
    %283 = vector.shape_cast %282 : vector<16xf32> to vector<16x1xf32>
    %cst_88 = arith.constant dense<0x7F800000> : vector<1xf32>
    %284 = vector.multi_reduction <minimumf>, %283, %cst_88 [0] : vector<16x1xf32> to vector<1xf32>
    %285 = vector.shape_cast %284 : vector<1xf32> to vector<1x1xf32>
    %cst_89 = arith.constant dense<0xFF800000> : vector<16xf32>
    %286 = vector.multi_reduction <maximumf>, %281, %cst_89 [1] : vector<16x128xf32> to vector<16xf32>
    %287 = vector.shape_cast %286 : vector<16xf32> to vector<16x1xf32>
    %cst_90 = arith.constant dense<0xFF800000> : vector<1xf32>
    %288 = vector.multi_reduction <maximumf>, %287, %cst_90 [0] : vector<16x1xf32> to vector<1xf32>
    %289 = vector.shape_cast %288 : vector<1xf32> to vector<1x1xf32>
    %290 = arith.subf %289, %285 : vector<1x1xf32>
    %cst_91 = arith.constant 9.99999993E-9 : f32
    %291 = vector.broadcast %cst_91 : f32 to vector<1x1xf32>
    %292 = arith.cmpf oge, %290, %291 : vector<1x1xf32>
    %cst_92 = arith.constant 0.00392156886 : f32
    %293 = vector.broadcast %cst_92 : f32 to vector<1x1xf32>
    %294 = arith.mulf %290, %293 : vector<1x1xf32>
    %cst_93 = arith.constant 1.000000e+00 : f32
    %295 = vector.broadcast %cst_93 : f32 to vector<1x1xf32>
    %296 = arith.select %292, %294, %295 : vector<1x1xi1>, vector<1x1xf32>
    %297 = arith.divf %285, %296 : vector<1x1xf32>
    %298 = math.roundeven %297 : vector<1x1xf32>
    %cst_94 = arith.constant 0.000000e+00 : f32
    %299 = vector.broadcast %cst_94 : f32 to vector<1x1xf32>
    %300 = arith.subf %299, %298 : vector<1x1xf32>
    %cst_95 = arith.constant 0.000000e+00 : f32
    %cst_96 = arith.constant 2.550000e+02 : f32
    %301 = vector.broadcast %cst_95 : f32 to vector<1x1xf32>
    %302 = arith.maximumf %301, %300 : vector<1x1xf32>
    %303 = vector.broadcast %cst_96 : f32 to vector<1x1xf32>
    %304 = arith.minimumf %303, %302 : vector<1x1xf32>
    %cst_97 = arith.constant 1.000000e+00 : f32
    %305 = vector.broadcast %cst_97 : f32 to vector<1x1xf32>
    %306 = arith.divf %305, %296 : vector<1x1xf32>
    %307 = vector.broadcast %306 : vector<1x1xf32> to vector<16x128xf32>
    %308 = arith.mulf %281, %307 : vector<16x128xf32>
    %309 = vector.broadcast %304 : vector<1x1xf32> to vector<16x128xf32>
    %310 = arith.addf %308, %309 : vector<16x128xf32>
    %311 = math.roundeven %310 : vector<16x128xf32>
    %cst_98 = arith.constant 0.000000e+00 : f32
    %cst_99 = arith.constant 2.550000e+02 : f32
    %312 = vector.broadcast %cst_98 : f32 to vector<16x128xf32>
    %313 = arith.maximumf %312, %311 : vector<16x128xf32>
    %314 = vector.broadcast %cst_99 : f32 to vector<16x128xf32>
    %315 = arith.minimumf %314, %313 : vector<16x128xf32>
    %316 = vector.broadcast %304 : vector<1x1xf32> to vector<16x128xf32>
    %317 = arith.subf %315, %316 : vector<16x128xf32>
    %318 = vector.shape_cast %292 : vector<1x1xi1> to vector<1x1xi1>
    %319 = vector.broadcast %318 : vector<1x1xi1> to vector<16x128xi1>
    %320 = arith.select %319, %317, %281 : vector<16x128xi1>, vector<16x128xf32>
    %cst_100 = arith.constant 1.000000e+00 : f32
    %321 = vector.broadcast %cst_100 : f32 to vector<1x1xf32>
    %322 = arith.select %292, %296, %321 : vector<1x1xi1>, vector<1x1xf32>
    %c0_101 = arith.constant 0 : index
    %c0_102 = arith.constant 0 : index
    %323 = vector.load %arg4[%c0_101, %c0_102] : memref<128x256xf32, #tpu.memory_space<vmem>>, vector<128x256xf32>
    %324 = math.absf %323 : vector<128x256xf32>
    %cst_103 = arith.constant dense<0xFF800000> : vector<256xf32>
    %325 = vector.multi_reduction <maximumf>, %324, %cst_103 [0] : vector<128x256xf32> to vector<256xf32>
    %326 = vector.shape_cast %325 : vector<256xf32> to vector<1x256xf32>
    %cst_104 = arith.constant 1.270000e+02 : f32
    %327 = vector.broadcast %cst_104 : f32 to vector<1x256xf32>
    %328 = arith.divf %326, %327 : vector<1x256xf32>
    %cst_105 = arith.constant 9.99999993E-9 : f32
    %329 = vector.broadcast %cst_105 : f32 to vector<1x256xf32>
    %330 = arith.maximumf %328, %329 : vector<1x256xf32>
    %cst_106 = arith.constant 1.000000e+00 : f32
    %331 = vector.broadcast %cst_106 : f32 to vector<1x256xf32>
    %332 = arith.divf %331, %330 : vector<1x256xf32>
    %333 = vector.broadcast %332 : vector<1x256xf32> to vector<128x256xf32>
    %334 = arith.mulf %323, %333 : vector<128x256xf32>
    %335 = math.roundeven %334 : vector<128x256xf32>
    %cst_107 = arith.constant -1.280000e+02 : f32
    %cst_108 = arith.constant 1.270000e+02 : f32
    %336 = vector.broadcast %cst_107 : f32 to vector<128x256xf32>
    %337 = arith.maximumf %336, %335 : vector<128x256xf32>
    %338 = vector.broadcast %cst_108 : f32 to vector<128x256xf32>
    %339 = arith.minimumf %338, %337 : vector<128x256xf32>
    %340 = arith.truncf %320 : vector<16x128xf32> to vector<16x128xbf16>
    %341 = arith.truncf %339 : vector<128x256xf32> to vector<128x256xbf16>
    %cst_109 = arith.constant dense<0.000000e+00> : vector<16x256xf32>
    %342 = tpu.matmul %340, %341, %cst_109 {dimension_numbers = #tpu.dot_dimension_numbers<[1], [0], [0], [1], [0, 0, 1, 1], [], []>} : vector<16x128xbf16>, vector<128x256xbf16>, vector<16x256xf32> -> vector<16x256xf32>
    %343 = vector.broadcast %322 : vector<1x1xf32> to vector<1x256xf32>
    %344 = arith.mulf %343, %330 : vector<1x256xf32>
    %345 = vector.broadcast %344 : vector<1x256xf32> to vector<16x256xf32>
    %346 = arith.mulf %342, %345 : vector<16x256xf32>
    %c0_110 = arith.constant 0 : index
    %c0_111 = arith.constant 0 : index
    %347 = vector.load %arg5[%c0_110, %c0_111] : memref<1x256xf32, #tpu.memory_space<vmem>>, vector<1x256xf32>
    %348 = vector.broadcast %347 : vector<1x256xf32> to vector<16x256xf32>
    %349 = arith.addf %346, %348 : vector<16x256xf32>
    %cst_112 = arith.constant dense<0x7F800000> : vector<16xf32>
    %350 = vector.multi_reduction <minimumf>, %349, %cst_112 [1] : vector<16x256xf32> to vector<16xf32>
    %351 = vector.shape_cast %350 : vector<16xf32> to vector<16x1xf32>
    %cst_113 = arith.constant dense<0x7F800000> : vector<1xf32>
    %352 = vector.multi_reduction <minimumf>, %351, %cst_113 [0] : vector<16x1xf32> to vector<1xf32>
    %353 = vector.shape_cast %352 : vector<1xf32> to vector<1x1xf32>
    %cst_114 = arith.constant dense<0xFF800000> : vector<16xf32>
    %354 = vector.multi_reduction <maximumf>, %349, %cst_114 [1] : vector<16x256xf32> to vector<16xf32>
    %355 = vector.shape_cast %354 : vector<16xf32> to vector<16x1xf32>
    %cst_115 = arith.constant dense<0xFF800000> : vector<1xf32>
    %356 = vector.multi_reduction <maximumf>, %355, %cst_115 [0] : vector<16x1xf32> to vector<1xf32>
    %357 = vector.shape_cast %356 : vector<1xf32> to vector<1x1xf32>
    %358 = arith.subf %357, %353 : vector<1x1xf32>
    %cst_116 = arith.constant 9.99999993E-9 : f32
    %359 = vector.broadcast %cst_116 : f32 to vector<1x1xf32>
    %360 = arith.cmpf oge, %358, %359 : vector<1x1xf32>
    %cst_117 = arith.constant 0.00392156886 : f32
    %361 = vector.broadcast %cst_117 : f32 to vector<1x1xf32>
    %362 = arith.mulf %358, %361 : vector<1x1xf32>
    %cst_118 = arith.constant 1.000000e+00 : f32
    %363 = vector.broadcast %cst_118 : f32 to vector<1x1xf32>
    %364 = arith.select %360, %362, %363 : vector<1x1xi1>, vector<1x1xf32>
    %365 = arith.divf %353, %364 : vector<1x1xf32>
    %366 = math.roundeven %365 : vector<1x1xf32>
    %cst_119 = arith.constant 0.000000e+00 : f32
    %367 = vector.broadcast %cst_119 : f32 to vector<1x1xf32>
    %368 = arith.subf %367, %366 : vector<1x1xf32>
    %cst_120 = arith.constant 0.000000e+00 : f32
    %cst_121 = arith.constant 2.550000e+02 : f32
    %369 = vector.broadcast %cst_120 : f32 to vector<1x1xf32>
    %370 = arith.maximumf %369, %368 : vector<1x1xf32>
    %371 = vector.broadcast %cst_121 : f32 to vector<1x1xf32>
    %372 = arith.minimumf %371, %370 : vector<1x1xf32>
    %cst_122 = arith.constant 1.000000e+00 : f32
    %373 = vector.broadcast %cst_122 : f32 to vector<1x1xf32>
    %374 = arith.divf %373, %364 : vector<1x1xf32>
    %375 = vector.broadcast %374 : vector<1x1xf32> to vector<16x256xf32>
    %376 = arith.mulf %349, %375 : vector<16x256xf32>
    %377 = vector.broadcast %372 : vector<1x1xf32> to vector<16x256xf32>
    %378 = arith.addf %376, %377 : vector<16x256xf32>
    %379 = math.roundeven %378 : vector<16x256xf32>
    %cst_123 = arith.constant 0.000000e+00 : f32
    %cst_124 = arith.constant 2.550000e+02 : f32
    %380 = vector.broadcast %cst_123 : f32 to vector<16x256xf32>
    %381 = arith.maximumf %380, %379 : vector<16x256xf32>
    %382 = vector.broadcast %cst_124 : f32 to vector<16x256xf32>
    %383 = arith.minimumf %382, %381 : vector<16x256xf32>
    %384 = vector.broadcast %372 : vector<1x1xf32> to vector<16x256xf32>
    %385 = arith.subf %383, %384 : vector<16x256xf32>
    %386 = vector.shape_cast %360 : vector<1x1xi1> to vector<1x1xi1>
    %387 = vector.broadcast %386 : vector<1x1xi1> to vector<16x256xi1>
    %388 = arith.select %387, %385, %349 : vector<16x256xi1>, vector<16x256xf32>
    %cst_125 = arith.constant 1.000000e+00 : f32
    %389 = vector.broadcast %cst_125 : f32 to vector<1x1xf32>
    %390 = arith.select %360, %364, %389 : vector<1x1xi1>, vector<1x1xf32>
    %391 = vector.broadcast %390 : vector<1x1xf32> to vector<16x256xf32>
    %392 = arith.mulf %388, %391 : vector<16x256xf32>
    %cst_126 = arith.constant 5.000000e-01 : f32
    %393 = vector.broadcast %cst_126 : f32 to vector<16x256xf32>
    %394 = arith.mulf %393, %392 : vector<16x256xf32>
    %cst_127 = arith.constant 4.471500e-02 : f32
    %395 = vector.broadcast %cst_127 : f32 to vector<16x256xf32>
    %396 = arith.mulf %395, %392 : vector<16x256xf32>
    %397 = arith.mulf %396, %392 : vector<16x256xf32>
    %398 = arith.mulf %397, %392 : vector<16x256xf32>
    %399 = arith.addf %392, %398 : vector<16x256xf32>
    %cst_128 = arith.constant 0.797884583 : f32
    %400 = vector.broadcast %cst_128 : f32 to vector<16x256xf32>
    %401 = arith.mulf %400, %399 : vector<16x256xf32>
    %402 = math.tanh %401 : vector<16x256xf32>
    %cst_129 = arith.constant 1.000000e+00 : f32
    %403 = vector.broadcast %cst_129 : f32 to vector<16x256xf32>
    %404 = arith.addf %403, %402 : vector<16x256xf32>
    %405 = arith.mulf %394, %404 : vector<16x256xf32>
    %cst_130 = arith.constant dense<0x7F800000> : vector<16xf32>
    %406 = vector.multi_reduction <minimumf>, %405, %cst_130 [1] : vector<16x256xf32> to vector<16xf32>
    %407 = vector.shape_cast %406 : vector<16xf32> to vector<16x1xf32>
    %cst_131 = arith.constant dense<0x7F800000> : vector<1xf32>
    %408 = vector.multi_reduction <minimumf>, %407, %cst_131 [0] : vector<16x1xf32> to vector<1xf32>
    %409 = vector.shape_cast %408 : vector<1xf32> to vector<1x1xf32>
    %cst_132 = arith.constant dense<0xFF800000> : vector<16xf32>
    %410 = vector.multi_reduction <maximumf>, %405, %cst_132 [1] : vector<16x256xf32> to vector<16xf32>
    %411 = vector.shape_cast %410 : vector<16xf32> to vector<16x1xf32>
    %cst_133 = arith.constant dense<0xFF800000> : vector<1xf32>
    %412 = vector.multi_reduction <maximumf>, %411, %cst_133 [0] : vector<16x1xf32> to vector<1xf32>
    %413 = vector.shape_cast %412 : vector<1xf32> to vector<1x1xf32>
    %414 = arith.subf %413, %409 : vector<1x1xf32>
    %cst_134 = arith.constant 9.99999993E-9 : f32
    %415 = vector.broadcast %cst_134 : f32 to vector<1x1xf32>
    %416 = arith.cmpf oge, %414, %415 : vector<1x1xf32>
    %cst_135 = arith.constant 0.00392156886 : f32
    %417 = vector.broadcast %cst_135 : f32 to vector<1x1xf32>
    %418 = arith.mulf %414, %417 : vector<1x1xf32>
    %cst_136 = arith.constant 1.000000e+00 : f32
    %419 = vector.broadcast %cst_136 : f32 to vector<1x1xf32>
    %420 = arith.select %416, %418, %419 : vector<1x1xi1>, vector<1x1xf32>
    %421 = arith.divf %409, %420 : vector<1x1xf32>
    %422 = math.roundeven %421 : vector<1x1xf32>
    %cst_137 = arith.constant 0.000000e+00 : f32
    %423 = vector.broadcast %cst_137 : f32 to vector<1x1xf32>
    %424 = arith.subf %423, %422 : vector<1x1xf32>
    %cst_138 = arith.constant 0.000000e+00 : f32
    %cst_139 = arith.constant 2.550000e+02 : f32
    %425 = vector.broadcast %cst_138 : f32 to vector<1x1xf32>
    %426 = arith.maximumf %425, %424 : vector<1x1xf32>
    %427 = vector.broadcast %cst_139 : f32 to vector<1x1xf32>
    %428 = arith.minimumf %427, %426 : vector<1x1xf32>
    %cst_140 = arith.constant 1.000000e+00 : f32
    %429 = vector.broadcast %cst_140 : f32 to vector<1x1xf32>
    %430 = arith.divf %429, %420 : vector<1x1xf32>
    %431 = vector.broadcast %430 : vector<1x1xf32> to vector<16x256xf32>
    %432 = arith.mulf %405, %431 : vector<16x256xf32>
    %433 = vector.broadcast %428 : vector<1x1xf32> to vector<16x256xf32>
    %434 = arith.addf %432, %433 : vector<16x256xf32>
    %435 = math.roundeven %434 : vector<16x256xf32>
    %cst_141 = arith.constant 0.000000e+00 : f32
    %cst_142 = arith.constant 2.550000e+02 : f32
    %436 = vector.broadcast %cst_141 : f32 to vector<16x256xf32>
    %437 = arith.maximumf %436, %435 : vector<16x256xf32>
    %438 = vector.broadcast %cst_142 : f32 to vector<16x256xf32>
    %439 = arith.minimumf %438, %437 : vector<16x256xf32>
    %440 = vector.broadcast %428 : vector<1x1xf32> to vector<16x256xf32>
    %441 = arith.subf %439, %440 : vector<16x256xf32>
    %442 = vector.shape_cast %416 : vector<1x1xi1> to vector<1x1xi1>
    %443 = vector.broadcast %442 : vector<1x1xi1> to vector<16x256xi1>
    %444 = arith.select %443, %441, %405 : vector<16x256xi1>, vector<16x256xf32>
    %cst_143 = arith.constant 1.000000e+00 : f32
    %445 = vector.broadcast %cst_143 : f32 to vector<1x1xf32>
    %446 = arith.select %416, %420, %445 : vector<1x1xi1>, vector<1x1xf32>
    %c0_144 = arith.constant 0 : index
    %c0_145 = arith.constant 0 : index
    %447 = vector.load %arg6[%c0_144, %c0_145] : memref<256x128xf32, #tpu.memory_space<vmem>>, vector<256x128xf32>
    %448 = math.absf %447 : vector<256x128xf32>
    %cst_146 = arith.constant dense<0xFF800000> : vector<128xf32>
    %449 = vector.multi_reduction <maximumf>, %448, %cst_146 [0] : vector<256x128xf32> to vector<128xf32>
    %450 = vector.shape_cast %449 : vector<128xf32> to vector<1x128xf32>
    %cst_147 = arith.constant 1.270000e+02 : f32
    %451 = vector.broadcast %cst_147 : f32 to vector<1x128xf32>
    %452 = arith.divf %450, %451 : vector<1x128xf32>
    %cst_148 = arith.constant 9.99999993E-9 : f32
    %453 = vector.broadcast %cst_148 : f32 to vector<1x128xf32>
    %454 = arith.maximumf %452, %453 : vector<1x128xf32>
    %cst_149 = arith.constant 1.000000e+00 : f32
    %455 = vector.broadcast %cst_149 : f32 to vector<1x128xf32>
    %456 = arith.divf %455, %454 : vector<1x128xf32>
    %457 = vector.broadcast %456 : vector<1x128xf32> to vector<256x128xf32>
    %458 = arith.mulf %447, %457 : vector<256x128xf32>
    %459 = math.roundeven %458 : vector<256x128xf32>
    %cst_150 = arith.constant -1.280000e+02 : f32
    %cst_151 = arith.constant 1.270000e+02 : f32
    %460 = vector.broadcast %cst_150 : f32 to vector<256x128xf32>
    %461 = arith.maximumf %460, %459 : vector<256x128xf32>
    %462 = vector.broadcast %cst_151 : f32 to vector<256x128xf32>
    %463 = arith.minimumf %462, %461 : vector<256x128xf32>
    %464 = arith.truncf %444 : vector<16x256xf32> to vector<16x256xbf16>
    %465 = arith.truncf %463 : vector<256x128xf32> to vector<256x128xbf16>
    %cst_152 = arith.constant dense<0.000000e+00> : vector<16x128xf32>
    %466 = tpu.matmul %464, %465, %cst_152 {dimension_numbers = #tpu.dot_dimension_numbers<[1], [0], [0], [1], [0, 0, 1, 1], [], []>} : vector<16x256xbf16>, vector<256x128xbf16>, vector<16x128xf32> -> vector<16x128xf32>
    %467 = vector.broadcast %446 : vector<1x1xf32> to vector<1x128xf32>
    %468 = arith.mulf %467, %454 : vector<1x128xf32>
    %469 = vector.broadcast %468 : vector<1x128xf32> to vector<16x128xf32>
    %470 = arith.mulf %466, %469 : vector<16x128xf32>
    %471 = vector.broadcast %5 : vector<1x128xf32> to vector<16x128xf32>
    %472 = arith.addf %470, %471 : vector<16x128xf32>
    %cst_153 = arith.constant dense<0x7F800000> : vector<16xf32>
    %473 = vector.multi_reduction <minimumf>, %472, %cst_153 [1] : vector<16x128xf32> to vector<16xf32>
    %474 = vector.shape_cast %473 : vector<16xf32> to vector<16x1xf32>
    %cst_154 = arith.constant dense<0x7F800000> : vector<1xf32>
    %475 = vector.multi_reduction <minimumf>, %474, %cst_154 [0] : vector<16x1xf32> to vector<1xf32>
    %476 = vector.shape_cast %475 : vector<1xf32> to vector<1x1xf32>
    %cst_155 = arith.constant dense<0xFF800000> : vector<16xf32>
    %477 = vector.multi_reduction <maximumf>, %472, %cst_155 [1] : vector<16x128xf32> to vector<16xf32>
    %478 = vector.shape_cast %477 : vector<16xf32> to vector<16x1xf32>
    %cst_156 = arith.constant dense<0xFF800000> : vector<1xf32>
    %479 = vector.multi_reduction <maximumf>, %478, %cst_156 [0] : vector<16x1xf32> to vector<1xf32>
    %480 = vector.shape_cast %479 : vector<1xf32> to vector<1x1xf32>
    %481 = arith.subf %480, %476 : vector<1x1xf32>
    %cst_157 = arith.constant 9.99999993E-9 : f32
    %482 = vector.broadcast %cst_157 : f32 to vector<1x1xf32>
    %483 = arith.cmpf oge, %481, %482 : vector<1x1xf32>
    %cst_158 = arith.constant 0.00392156886 : f32
    %484 = vector.broadcast %cst_158 : f32 to vector<1x1xf32>
    %485 = arith.mulf %481, %484 : vector<1x1xf32>
    %cst_159 = arith.constant 1.000000e+00 : f32
    %486 = vector.broadcast %cst_159 : f32 to vector<1x1xf32>
    %487 = arith.select %483, %485, %486 : vector<1x1xi1>, vector<1x1xf32>
    %488 = arith.divf %476, %487 : vector<1x1xf32>
    %489 = math.roundeven %488 : vector<1x1xf32>
    %cst_160 = arith.constant 0.000000e+00 : f32
    %490 = vector.broadcast %cst_160 : f32 to vector<1x1xf32>
    %491 = arith.subf %490, %489 : vector<1x1xf32>
    %cst_161 = arith.constant 0.000000e+00 : f32
    %cst_162 = arith.constant 2.550000e+02 : f32
    %492 = vector.broadcast %cst_161 : f32 to vector<1x1xf32>
    %493 = arith.maximumf %492, %491 : vector<1x1xf32>
    %494 = vector.broadcast %cst_162 : f32 to vector<1x1xf32>
    %495 = arith.minimumf %494, %493 : vector<1x1xf32>
    %cst_163 = arith.constant 1.000000e+00 : f32
    %496 = vector.broadcast %cst_163 : f32 to vector<1x1xf32>
    %497 = arith.divf %496, %487 : vector<1x1xf32>
    %498 = vector.broadcast %497 : vector<1x1xf32> to vector<16x128xf32>
    %499 = arith.mulf %472, %498 : vector<16x128xf32>
    %500 = vector.broadcast %495 : vector<1x1xf32> to vector<16x128xf32>
    %501 = arith.addf %499, %500 : vector<16x128xf32>
    %502 = math.roundeven %501 : vector<16x128xf32>
    %cst_164 = arith.constant 0.000000e+00 : f32
    %cst_165 = arith.constant 2.550000e+02 : f32
    %503 = vector.broadcast %cst_164 : f32 to vector<16x128xf32>
    %504 = arith.maximumf %503, %502 : vector<16x128xf32>
    %505 = vector.broadcast %cst_165 : f32 to vector<16x128xf32>
    %506 = arith.minimumf %505, %504 : vector<16x128xf32>
    %507 = vector.broadcast %495 : vector<1x1xf32> to vector<16x128xf32>
    %508 = arith.subf %506, %507 : vector<16x128xf32>
    %509 = vector.shape_cast %483 : vector<1x1xi1> to vector<1x1xi1>
    %510 = vector.broadcast %509 : vector<1x1xi1> to vector<16x128xi1>
    %511 = arith.select %510, %508, %472 : vector<16x128xi1>, vector<16x128xf32>
    %cst_166 = arith.constant 1.000000e+00 : f32
    %512 = vector.broadcast %cst_166 : f32 to vector<1x1xf32>
    %513 = arith.select %483, %487, %512 : vector<1x1xi1>, vector<1x1xf32>
    %514 = vector.broadcast %513 : vector<1x1xf32> to vector<16x128xf32>
    %515 = arith.mulf %511, %514 : vector<16x128xf32>
    %516 = arith.addf %515, %281 : vector<16x128xf32>
    %cst_167 = arith.constant dense<0.000000e+00> : vector<16xf32>
    %517 = vector.multi_reduction <add>, %516, %cst_167 [1] : vector<16x128xf32> to vector<16xf32>
    %518 = vector.shape_cast %517 : vector<16xf32> to vector<16x1xf32>
    %cst_168 = arith.constant 1.280000e+02 : f32
    %519 = vector.broadcast %cst_168 : f32 to vector<16x1xf32>
    %520 = arith.divf %518, %519 : vector<16x1xf32>
    %521 = vector.broadcast %520 : vector<16x1xf32> to vector<16x128xf32>
    %522 = arith.subf %516, %521 : vector<16x128xf32>
    %523 = arith.mulf %522, %522 : vector<16x128xf32>
    %cst_169 = arith.constant dense<0.000000e+00> : vector<16xf32>
    %524 = vector.multi_reduction <add>, %523, %cst_169 [1] : vector<16x128xf32> to vector<16xf32>
    %525 = vector.shape_cast %524 : vector<16xf32> to vector<16x1xf32>
    %cst_170 = arith.constant 1.280000e+02 : f32
    %526 = vector.broadcast %cst_170 : f32 to vector<16x1xf32>
    %527 = arith.divf %525, %526 : vector<16x1xf32>
    %528 = vector.broadcast %520 : vector<16x1xf32> to vector<16x128xf32>
    %529 = arith.subf %516, %528 : vector<16x128xf32>
    %cst_171 = arith.constant 9.99999996E-13 : f32
    %530 = vector.broadcast %cst_171 : f32 to vector<16x1xf32>
    %531 = arith.addf %527, %530 : vector<16x1xf32>
    %532 = math.rsqrt %531 : vector<16x1xf32>
    %533 = vector.broadcast %532 : vector<16x1xf32> to vector<16x128xf32>
    %534 = arith.mulf %529, %533 : vector<16x128xf32>
    %535 = vector.broadcast %6 : vector<1x128xf32> to vector<16x128xf32>
    %536 = arith.mulf %534, %535 : vector<16x128xf32>
    %537 = vector.broadcast %7 : vector<1x128xf32> to vector<16x128xf32>
    %538 = arith.addf %536, %537 : vector<16x128xf32>
    %c0_172 = arith.constant 0 : index
    %c0_173 = arith.constant 0 : index
    %539 = vector.load %arg8[%c0_172, %c0_173] : memref<16x128xf32, #tpu.memory_space<vmem>>, vector<16x128xf32>
    tpu.vector_store %arg8[%c0_172, %c0_173], %538 {strides = array<i32>} : memref<16x128xf32, #tpu.memory_space<vmem>>, vector<16x128xf32>,
    return
  }
}

</mosaic_0001>

<bundles_post_ra>
// kernel: bitbert_layer.1
= control target key start
LH: loop header
LB: loop body
LE: loop exit
PB: predicated region body
PF: predicated region fallthrough
CT: control target
= control target key end

     0   :  { %s4049_s0 = inlined_call_operand.vmem [shape: f32[16,128], index: 0, kind: input, shape index: {}]   ;;  %s4050_s1 = inlined_call_operand.vmem [shape: f32[256,384], index: 1, kind: input, shape index: {}]   ;;  %s4051_s2 = inlined_call_operand.vmem [shape: f32[1,384], index: 2, kind: input, shape index: {}]   ;;  %s4052_s3 = inlined_call_operand.vmem [shape: f32[128,128], index: 3, kind: input, shape index: {}]   ;;  %s4053_s4 = inlined_call_operand.vmem [shape: f32[128,256], index: 4, kind: input, shape index: {}]   ;;  %s4054_s5 = inlined_call_operand.vmem [shape: f32[1,256], index: 5, kind: input, shape index: {}]   ;;  %s4055_s6 = inlined_call_operand.vmem [shape: f32[256,128], index: 6, kind: input, shape index: {}]   ;;  %s4056_s7 = inlined_call_operand.vmem [shape: f32[6,128], index: 7, kind: input, shape index: {}]   ;;  %s4057_s8 = inlined_call_operand.hbm [shape: f32[16,128], index: 8, kind: output, shape index: {}]  }
   0x1   :  { %v2946_v0 = vld [vmem:[%s4049_s0] sm:$0xff]  ;;  %v86_v1 = vld [vmem:[%s4050_s1 + $0x8] sm:$0xff]  ;;  %v88_v4 = vld [vmem:[%s4050_s1 + $0x18] sm:$0xff] }
   0x2   :  { %45 = vmax.xlane.f32.xlu1 %v2946_v0  ;;  %34 = vmin.xlane.f32.xlu0 %v2946_v0  ;;  %v89_v2 = vld [vmem:[%s4050_s1 + $0x20] sm:$0xff]  ;;  %v2965_v5 = vld [vmem:[%s4049_s0 + $0x8] sm:$0xff]  ;;  %v92_v8 = vld [vmem:[%s4050_s1 + $0x38] sm:$0xff] }
   0x3   :  { %v85_v3 = vld [vmem:[%s4050_s1] sm:$0xff]  ;;  %v2506_v6 = vpack.c.bf16 %v89_v2, %v86_v1  ;;  %v95_v9 = vld [vmem:[%s4050_s1 + $0x50] sm:$0xff]  ;;  %262 = vmatprep.mubr.f32.mxu0 %v2946_v0  ;;  %339 = vmatprep.mubr.f32.mxu1 %v2946_v0  ;;  %v94_v12 = vld [vmem:[%s4050_s1 + $0x48] sm:$0xff] }
   0x4   :  { %v2508_v7 = vpack.c.bf16 %v88_v4, %v85_v3  ;;  %v2510_v10 = vpack.c.bf16 %v95_v9, %v92_v8  ;;  %v91_v11 = vld [vmem:[%s4050_s1 + $0x30] sm:$0xff] }
   0x5   :  { %13 = vsyncpa [#allocation3], 0  ;;  %2507 = vmatprep.subr.bf16.mxu0 %v2506_v6  ;;  %v2512_v13 = vpack.c.bf16 %v94_v12, %v91_v11  ;;  %v98_v14 = vld [vmem:[%s4050_s1 + $0x68] sm:$0xff]  ;;  %v101_v15 = vld [vmem:[%s4050_s1 + $0x80] sm:$0xff]  ;;  %vm480_vm11 = vcmask 130048  }
   0x6   :  { %47 = vmax.xlane.f32.xlu1 %v2965_v5  ;;  %36 = vmin.xlane.f32.xlu0 %v2965_v5  ;;  %v2514_v16 = vpack.c.bf16 %v101_v15, %v98_v14  ;;  %v97_v17 = vld [vmem:[%s4050_s1 + $0x60] sm:$0xff]  ;;  %v100_v18 = vld [vmem:[%s4050_s1 + $0x78] sm:$0xff]  ;;  %v107_v21 = vld [vmem:[%s4050_s1 + $0xb0] sm:$0xff] }
   0x7   :  { %2509 = vmatpush1.bf16.msra.mxu0 %v2508_v7  ;;  %v2516_v19 = vpack.c.bf16 %v100_v18, %v97_v17  ;;  %v104_v20 = vld [vmem:[%s4050_s1 + $0x98] sm:$0xff]  ;;  %v103_v23 = vld [vmem:[%s4050_s1 + $0x90] sm:$0xff]  ;;  %v106_v24 = vld [vmem:[%s4050_s1 + $0xa8] sm:$0xff] }
   0x8   :  { %2511 = vmatprep.subr.bf16.mxu0 %v2510_v10  ;;  %v2518_v22 = vpack.c.bf16 %v107_v21, %v104_v20  ;;  %v2520_v25 = vpack.c.bf16 %v106_v24, %v103_v23  ;;  %v110_v26 = vld [vmem:[%s4050_s1 + $0xc8] sm:$0xff]  ;;  %v113_v27 = vld [vmem:[%s4050_s1 + $0xe0] sm:$0xff]  ;;  %v112_v30 = vld [vmem:[%s4050_s1 + $0xd8] sm:$0xff] }
   0x9   :  { %v2522_v28 = vpack.c.bf16 %v113_v27, %v110_v26  ;;  %v109_v29 = vld [vmem:[%s4050_s1 + $0xc0] sm:$0xff]  ;;  %v116_v32 = vld [vmem:[%s4050_s1 + $0xf8] sm:$0xff]  ;;  %v119_v33 = vld [vmem:[%s4050_s1 + $0x110] sm:$0xff] }
   0xa   :  { %v2524_v31 = vpack.c.bf16 %v112_v30, %v109_v29  ;;  %v2526_v34 = vpack.c.bf16 %v119_v33, %v116_v32  ;;  %v115_v35 = vld [vmem:[%s4050_s1 + $0xf0] sm:$0xff]  ;;  %v118_v36 = vld [vmem:[%s4050_s1 + $0x108] sm:$0xff]  ;;  %v125_v39 = vld [vmem:[%s4050_s1 + $0x140] sm:$0xff] }
   0xb   :  { %2513 = vmatpush1.bf16.msra.mxu0 %v2512_v13  ;;  %v2528_v37 = vpack.c.bf16 %v118_v36, %v115_v35  ;;  %v122_v38 = vld [vmem:[%s4050_s1 + $0x128] sm:$0xff]  ;;  %v121_v41 = vld [vmem:[%s4050_s1 + $0x120] sm:$0xff]  ;;  %v124_v42 = vld [vmem:[%s4050_s1 + $0x138] sm:$0xff] }
   0xc   :  { %2515 = vmatprep.subr.bf16.mxu0 %v2514_v16  ;;  %v2530_v40 = vpack.c.bf16 %v125_v39, %v122_v38  ;;  %v2532_v43 = vpack.c.bf16 %v124_v42, %v121_v41  ;;  %v128_v44 = vld [vmem:[%s4050_s1 + $0x158] sm:$0xff]  ;;  %v131_v45 = vld [vmem:[%s4050_s1 + $0x170] sm:$0xff]  ;;  %v130_v48 = vld [vmem:[%s4050_s1 + $0x168] sm:$0xff] }
   0xd   :  { %v127_v46 = vld [vmem:[%s4050_s1 + $0x150] sm:$0xff]  ;;  %v2534_v47 = vpack.c.bf16 %v131_v45, %v128_v44  ;;  %v134_v49 = vld [vmem:[%s4050_s1 + $0x188] sm:$0xff]  ;;  %v137_v50 = vld [vmem:[%s4050_s1 + $0x1a0] sm:$0xff] }
   0xe   :  { %v2536_v51 = vpack.c.bf16 %v130_v48, %v127_v46  ;;  %v2538_v52 = vpack.c.bf16 %v137_v50, %v134_v49  ;;  %v135_v53 = vld [vmem:[%s4050_s1 + $0x190] sm:$0xff]  ;;  %v138_v54 = vld [vmem:[%s4050_s1 + $0x1a8] sm:$0xff]  ;;  %v133_v55 = vld [vmem:[%s4050_s1 + $0x180] sm:$0xff] }
   0xf   :  { %2517 = vmatpush1.bf16.msra.mxu0 %v2516_v19  ;;  %v2570_v56 = vpack.c.bf16 %v138_v54, %v135_v53  ;;  %v136_v57 = vld [vmem:[%s4050_s1 + $0x198] sm:$0xff]  ;;  %v87_v58 = vld [vmem:[%s4050_s1 + $0x10] sm:$0xff]  ;;  %v90_v59 = vld [vmem:[%s4050_s1 + $0x28] sm:$0xff] }
  0x10   :  { %2519 = vmatprep.subr.bf16.mxu0 %v2518_v22  ;;  %v2540_v60 = vpack.c.bf16 %v136_v57, %v133_v55  ;;  %v2572_v61 = vpack.c.bf16 %v90_v59, %v87_v58  ;;  %v140_v62 = vld [vmem:[%s4050_s1 + $0x1b8] sm:$0xff]  ;;  %v143_v63 = vld [vmem:[%s4050_s1 + $0x1d0] sm:$0xff]  ;;  %v141_v1 = vld [vmem:[%s4050_s1 + $0x1c0] sm:$0xff] }
  0x11   :  { %2571 = vmatprep.subr.bf16.mxu1 %v2570_v56  ;;  %v2542_v2 = vpack.c.bf16 %v143_v63, %v140_v62  ;;  %v144_v3 = vld [vmem:[%s4050_s1 + $0x1d8] sm:$0xff]  ;;  %v139_v4 = vld [vmem:[%s4050_s1 + $0x1b0] sm:$0xff]  ;;  %v142_v6 = vld [vmem:[%s4050_s1 + $0x1c8] sm:$0xff] }
  0x12   :  { %2573 = vmatpush3.bf16.msra.mxu1 %v2572_v61  ;;  %v2574_v7 = vpack.c.bf16 %v144_v3, %v141_v1  ;;  %v93_v8 = vld [vmem:[%s4050_s1 + $0x40] sm:$0xff]  ;;  %v96_v9 = vld [vmem:[%s4050_s1 + $0x58] sm:$0xff]  ;;  %v146_v10 = vld [vmem:[%s4050_s1 + $0x1e8] sm:$0xff]  ;;  %v2544_v15 = vpack.c.bf16 %v142_v6, %v139_v4 }
  0x13   :  { %2521 = vmatpush1.bf16.msra.mxu0 %v2520_v25  ;;  %v2576_v11 = vpack.c.bf16 %v96_v9, %v93_v8  ;;  %v149_v12 = vld [vmem:[%s4050_s1 + $0x200] sm:$0xff]  ;;  %v147_v13 = vld [vmem:[%s4050_s1 + $0x1f0] sm:$0xff]  ;;  %v150_v14 = vld [vmem:[%s4050_s1 + $0x208] sm:$0xff] }
  0x14   :  { %2523 = vmatprep.subr.bf16.mxu0 %v2522_v28  ;;  %2575 = vmatprep.subr.bf16.mxu1 %v2574_v7  ;;  %v2578_v16 = vpack.c.bf16 %v150_v14, %v147_v13  ;;  %v145_v17 = vld [vmem:[%s4050_s1 + $0x1e0] sm:$0xff]  ;;  %v99_v18 = vld [vmem:[%s4050_s1 + $0x70] sm:$0xff]  ;;  %v2546_v19 = vpack.c.bf16 %v149_v12, %v146_v10  ;;  %v148_v20 = vld [vmem:[%s4050_s1 + $0x1f8] sm:$0xff] }
  0x15   :  { %v102_v21 = vld [vmem:[%s4050_s1 + $0x88] sm:$0xff]  ;;  %v152_v22 = vld [vmem:[%s4050_s1 + $0x218] sm:$0xff]  ;;  %v155_v24 = vld [vmem:[%s4050_s1 + $0x230] sm:$0xff]  ;;  %v2548_v30 = vpack.c.bf16 %v148_v20, %v145_v17 }
  0x16   :  { %2577 = vmatpush3.bf16.msra.mxu1 %v2576_v11  ;;  %v2580_v23 = vpack.c.bf16 %v102_v21, %v99_v18  ;;  %v153_v25 = vld [vmem:[%s4050_s1 + $0x220] sm:$0xff]  ;;  %v156_v26 = vld [vmem:[%s4050_s1 + $0x238] sm:$0xff]  ;;  %v2550_v32 = vpack.c.bf16 %v155_v24, %v152_v22  ;;  %v151_v33 = vld [vmem:[%s4050_s1 + $0x210] sm:$0xff] }
  0x17   :  { %2525 = vmatpush1.bf16.msra.mxu0 %v2524_v31  ;;  %2579 = vmatprep.subr.bf16.mxu1 %v2578_v16  ;;  %v2582_v27 = vpack.c.bf16 %v156_v26, %v153_v25  ;;  %v105_v28 = vld [vmem:[%s4050_s1 + $0xa0] sm:$0xff]  ;;  %v108_v29 = vld [vmem:[%s4050_s1 + $0xb8] sm:$0xff]  ;;  %v159_v31 = vld [vmem:[%s4050_s1 + $0x250] sm:$0xff] }
  0x18   :  { %2527 = vmatprep.subr.bf16.mxu0 %v2526_v34  ;;  %v154_v34 = vld [vmem:[%s4050_s1 + $0x228] sm:$0xff]  ;;  %v2584_v36 = vpack.c.bf16 %v108_v29, %v105_v28  ;;  %v161_v38 = vld [vmem:[%s4050_s1 + $0x260] sm:$0xff]  ;;  %v168_v44 = vld [vmem:[%s4050_s1 + $0x298] sm:$0xff] }
  0x19   :  { %v162_v35 = vld [vmem:[%s4050_s1 + $0x268] sm:$0xff]  ;;  %v2552_v42 = vpack.c.bf16 %v154_v34, %v151_v33  ;;  %v157_v46 = vld [vmem:[%s4050_s1 + $0x240] sm:$0xff]  ;;  %v164_v49 = vld [vmem:[%s4050_s1 + $0x278] sm:$0xff] }
  0x1a   :  { %2581 = vmatpush3.bf16.msra.mxu1 %v2580_v23  ;;  %v2586_v39 = vpack.c.bf16 %v162_v35, %v159_v31  ;;  %v114_v41 = vld [vmem:[%s4050_s1 + $0xe8] sm:$0xff]  ;;  %v167_v50 = vld [vmem:[%s4050_s1 + $0x290] sm:$0xff]  ;;  %v120_v53 = vld [vmem:[%s4050_s1 + $0x118] sm:$0xff] }
  0x1b   :  { %2529 = vmatpush1.bf16.msra.mxu0 %v2528_v37  ;;  %v158_v37 = vld [vmem:[%s4050_s1 + $0x248] sm:$0xff]  ;;  %2583 = vmatprep.subr.bf16.mxu1 %v2582_v27  ;;  %v171_v55 = vld [vmem:[%s4050_s1 + $0x2b0] sm:$0xff]  ;;  %v2558_v57 = vpack.c.bf16 %v167_v50, %v164_v49  ;;  %v173_v62 = vld [vmem:[%s4050_s1 + $0x2c0] sm:$0xff] }
  0x1c   :  { %2531 = vmatprep.subr.bf16.mxu0 %v2530_v40  ;;  %v111_v40 = vld [vmem:[%s4050_s1 + $0xd0] sm:$0xff]  ;;  %v2554_v45 = vpack.c.bf16 %v161_v38, %v158_v37  ;;  %v174_v56 = vld [vmem:[%s4050_s1 + $0x2c8] sm:$0xff]  ;;  %v177_v4 = vld [vmem:[%s4050_s1 + $0x2e0] sm:$0xff] }
  0x1d   :  { %v2588_v48 = vpack.c.bf16 %v114_v41, %v111_v40  ;;  %v163_v58 = vld [vmem:[%s4050_s1 + $0x270] sm:$0xff]  ;;  %v166_v59 = vld [vmem:[%s4050_s1 + $0x288] sm:$0xff]  ;;  %v2594_v63 = vpack.c.bf16 %v174_v56, %v171_v55  ;;  %v180_v6 = vld [vmem:[%s4050_s1 + $0x2f8] sm:$0xff] }
  0x1e   :  { %2585 = vmatpush3.bf16.msra.mxu1 %v2584_v36  ;;  %v170_v61 = vld [vmem:[%s4050_s1 + $0x2a8] sm:$0xff]  ;;  %v123_v1 = vld [vmem:[%s4050_s1 + $0x130] sm:$0xff]  ;;  %v2560_v3 = vpack.c.bf16 %v166_v59, %v163_v58  ;;  %v169_v8 = vld [vmem:[%s4050_s1 + $0x2a0] sm:$0xff]  ;;  %v2598_v13 = vpack.c.bf16 %v180_v6, %v177_v4 }
  0x1f   :  { %2533 = vmatpush1.bf16.msra.mxu0 %v2532_v43  ;;  %v165_v43 = vld [vmem:[%s4050_s1 + $0x280] sm:$0xff]  ;;  %2587 = vmatprep.subr.bf16.mxu1 %v2586_v39  ;;  %v2562_v7 = vpack.c.bf16 %v173_v62, %v170_v61  ;;  %v172_v9 = vld [vmem:[%s4050_s1 + $0x2b8] sm:$0xff]  ;;  %v179_v12 = vld [vmem:[%s4050_s1 + $0x2f0] sm:$0xff] }
  0x20   :  { %2535 = vmatprep.subr.bf16.mxu0 %v2534_v47  ;;  %v160_v47 = vld [vmem:[%s4050_s1 + $0x258] sm:$0xff]  ;;  %v129_v14 = vld [vmem:[%s4050_s1 + $0x160] sm:$0xff]  ;;  %v2564_v16 = vpack.c.bf16 %v172_v9, %v169_v8  ;;  %v175_v18 = vld [vmem:[%s4050_s1 + $0x2d0] sm:$0xff] }
  0x21   :  { %v2556_v54 = vpack.c.bf16 %v160_v47, %v157_v46  ;;  %v176_v11 = vld [vmem:[%s4050_s1 + $0x2d8] sm:$0xff]  ;;  %v181_v6 = vld [vmem:[%s4051_s2] sm:$0x7] }
  0x22   :  { %2589 = vmatpush3.bf16.msra.mxu1 %v2588_v48  ;;  %v2566_v17 = vpack.c.bf16 %v179_v12, %v176_v11 }
  0x23   :  { %2537 = vmatpush1.bf16.msra.mxu0 %v2536_v51  ;;  %v2590_v51 = vpack.c.bf16 %v168_v44, %v165_v43 }
  0x24   :  { %2539 = vmatprep.subr.bf16.mxu0 %v2538_v52  ;;  %v117_v52 = vld [vmem:[%s4050_s1 + $0x100] sm:$0xff] }
  0x25   :  { %2591 = vmatprep.subr.bf16.mxu1 %v2590_v51 }
  0x27   :  { %2541 = vmatpush1.bf16.msra.mxu0 %v2540_v60  ;;  %v2592_v60 = vpack.c.bf16 %v120_v53, %v117_v52 }
  0x28   :  { %2543 = vmatprep.subr.bf16.mxu0 %v2542_v2  ;;  %v126_v2 = vld [vmem:[%s4050_s1 + $0x148] sm:$0xff] }
  0x29   :  { %2593 = vmatpush3.bf16.msra.mxu1 %v2592_v60  ;;  %v2596_v10 = vpack.c.bf16 %v126_v2, %v123_v1  ;;  %v183_v2 = vlaneseq }
  0x2a   :  { %2595 = vmatprep.subr.bf16.mxu1 %v2594_v63 }
  0x2b   :  { %2545 = vmatpush1.bf16.msra.mxu0 %v2544_v15  ;;  %v132_v15 = vld [vmem:[%s4050_s1 + $0x178] sm:$0xff]  ;;  %v3258_v4 = vand.u32 127, %v183_v2 }
  0x2c   :  { %2547 = vmatprep.subr.bf16.mxu0 %v2546_v19  ;;  %v178_v19 = vld [vmem:[%s4050_s1 + $0x2e8] sm:$0xff]  ;;  %v2600_v20 = vpack.c.bf16 %v132_v15, %v129_v14 }
  0x2d   :  { %2597 = vmatpush3.bf16.msra.mxu1 %v2596_v10  ;;  %v2568_v21 = vpack.c.bf16 %v178_v19, %v175_v18  ;;  %vm776_vm1 = vcmp.ge.s32.totalorder %v3258_v4, 64  ;;  %vm777_vm2 = vcmp.lt.s32.totalorder %v3258_v4, 96  ;;  %vm505_vm3 = vcmp.ge.s32.totalorder %v3258_v4, 32 }
  0x2e   :  { %2599 = vmatprep.subr.bf16.mxu1 %v2598_v13  ;;  %vm506_vm4 = vcmp.lt.s32.totalorder %v3258_v4, 64  ;;  %vm778_vm5 = vmand %vm776_vm1, %vm777_vm2  ;;  %vm968_vm6 = vcmp.ge.s32.totalorder %v3258_v4, 96  ;;  %vm396_vm7 = vcmp.lt.s32.totalorder %v3258_v4, 32 }
  0x2f   :  { %2549 = vmatpush1.bf16.msra.mxu0 %v2548_v30  ;;  %vm507_vm8 = vmand %vm505_vm3, %vm506_vm4 }
  0x30   :  { %2551 = vmatprep.subr.bf16.mxu0 %v2550_v32 }
  0x31   :  { %2601 = vmatpush3.bf16.msra.mxu1 %v2600_v20 }
  0x33   :  { %2553 = vmatpush1.bf16.msra.mxu0 %v2552_v42 }
  0x34   :  { %2555 = vmatprep.subr.bf16.mxu0 %v2554_v45 }
  0x37   :  { %2557 = vmatpush1.bf16.msra.mxu0 %v2556_v54 }
  0x38   :  { %2559 = vmatprep.subr.bf16.mxu0 %v2558_v57 }
  0x3b   :  { %2561 = vmatpush1.bf16.msra.mxu0 %v2560_v3  ;;  %v3256_v3 = vshrl.u32 %v183_v2, 7 }
  0x3c   :  { %2563 = vmatprep.subr.bf16.mxu0 %v2562_v7 }
  0x3d   :  { %v3267_v7 = vsub.s32 1, %v3256_v3 }
  0x3f   :  { %2565 = vmatpush1.bf16.msra.mxu0 %v2564_v16  ;;  %v190_v9 = vrot.slane %v181_v6, %v3267_v7  ;;  %v2892_v16 = vmov 0.0  }
  0x40   :  { %2567 = vmatprep.subr.bf16.mxu0 %v2566_v17  ;;  %v779_v17 = vsel %vm778_vm5, 1.0, %v2892_v16  ;;  %v971_v20 = vsel %vm968_vm6, 1.0, %v2892_v16 }
  0x43   :  { %2569 = vmatpush1.bf16.msra.mxu0 %v2568_v21 }
  0x8f   :  { %v46_v22 = vpop.xlane.xlu1 %45  ;;  %v35_v23 = vpop.xlane.xlu0 %34 }
  0x93   :  { %v48_v24 = vpop.xlane.xlu1 %47  ;;  %v37_v25 = vpop.xlane.xlu0 %36 }
  0x94   :  { %v49_v26 = vmax.f32 %v46_v22, %v48_v24  ;;  %v38_v27 = vmin.f32 %v35_v23, %v37_v25  ;;  %v398_v24 = vsel %vm396_vm7, 1.0, %v2892_v16  ;;  %v508_v25 = vsel %vm507_vm8, 1.0, %v2892_v16 }
  0x96   :  { %v50_v28 = vrot.slane %v49_v26, 4  ;;  %v39_v29 = vrot.slane %v38_v27, 4 }
  0x98   :  { %v51_v30 = vmax.f32 %v49_v26, %v50_v28  ;;  %v40_v31 = vmin.f32 %v38_v27, %v39_v29 }
  0x9a   :  { %v52_v32 = vrot.slane %v51_v30, 2  ;;  %v41_v33 = vrot.slane %v40_v31, 2 }
  0x9c   :  { %v53_v34 = vmax.f32 %v51_v30, %v52_v32  ;;  %v42_v35 = vmin.f32 %v40_v31, %v41_v33 }
  0x9e   :  { %v54_v36 = vrot.slane %v53_v34, 1  ;;  %v43_v37 = vrot.slane %v42_v35, 1 }
  0xa0   :  { %v55_v38 = vmax.f32 %v53_v34, %v54_v36  ;;  %v44_v39 = vmin.f32 %v42_v35, %v43_v37 }
  0xa2   :  { %v56_v40 = vsub.f32 %v55_v38, %v44_v39 }
  0xa4   :  { %vm57_vm0 = vcmp.ge.f32.partialorder %v56_v40, 1e-08  ;;  %v58_v41 = vmul.f32 0.003921569, %v56_v40 }
  0xa6   :  { %v59_v42 = vsel %vm57_vm0, %v58_v41, 1.0 }
  0xa7   :  { %2764 = vrcp.f32 %v59_v42 }
  0xb1   :  { %v2765_v43 = vpop.eup %2764 }
  0xb2   :  { %v61_v44 = vmul.f32 %v2765_v43, %v44_v39  ;;  %v67_v49 = vmul.f32 %v2765_v43, %v2946_v0  ;;  %v68_v50 = vmul.f32 %v2765_v43, %v2965_v5 }
  0xb4   :  { %v2672_v45 = vround.rtne.f32 %v61_v44 }
  0xb6   :  { %v63_v46 = vsub.f32 0.0, %v2672_v45 }
  0xb8   :  { %v64_v47 = vmax.f32 %v63_v46, 0.0 }
  0xba   :  { %v65_v48 = vmin.f32 %v64_v47, 255.0 }
  0xbc   :  { %v69_v51 = vadd.f32 %v67_v49, %v65_v48  ;;  %v70_v52 = vadd.f32 %v68_v50, %v65_v48 }
  0xbe   :  { %v2673_v53 = vround.rtne.f32 %v69_v51  ;;  %v2674_v54 = vround.rtne.f32 %v70_v52 }
  0xc0   :  { %v73_v55 = vmax.f32 %v2673_v53, 0.0  ;;  %v74_v56 = vmax.f32 %v2674_v54, 0.0 }
  0xc2   :  { %v75_v57 = vmin.f32 %v73_v55, 255.0  ;;  %v76_v58 = vmin.f32 %v74_v56, 255.0  ;;  %v352_v56 = vadd.s32 8, %v3256_v3 }
  0xc4   :  { %v77_v59 = vsub.f32 %v75_v57, %v65_v48  ;;  %v78_v60 = vsub.f32 %v76_v58, %v65_v48 }
  0xc6   :  { %v81_v61 = vsel %vm57_vm0, %v77_v59, %v2946_v0  ;;  %v82_v63 = vsel %vm57_vm0, %v78_v60, %v2965_v5  ;;  %v3261_v0 = vsub.s32 0, %v3256_v3  ;;  %v364_v59 = vand.u32 1, %v352_v56 }
  0xc7   :  { %v83_v62 = vmul.f32 %v81_v61, %v59_v42  ;;  %v84_v1 = vmul.f32 %v82_v63, %v59_v42  ;;  %v383_v60 = vand.u32 1, %v3258_v4  ;;  %v357_v61 = vand.u32 1, %v3256_v3 }
  0xc8   :  { %v186_v8 = vrot.slane %v181_v6, %v3261_v0 }
  0xc9   :  { %263 = vmatmul.mubr.f32.vlgmr.msra.gmra.mrb[0].mxu0 %v83_v62  ;;  %340 = vmatmul.mubr.f32.vlgmr.msra.gmra.mrb[0].mxu1 %v83_v62  ;;  %vm392_vm9 = vcmp.eq.s32.totalorder %v364_v59, %v383_v60  ;;  %vm391_vm10 = vcmp.eq.s32.totalorder %v357_v61, %v383_v60 }
  0xca   :  { %268 = vmatprep.mubr.f32.mxu0 %v2965_v5  ;;  %344 = vmatprep.mubr.f32.mxu1 %v2965_v5  ;;  %v193_v5 = vsub.s32 2, %v3256_v3 }
  0xcc   :  { %v194_v12 = vrot.slane %v181_v6, %v193_v5 }
  0xcd   :  { %269 = vmatmul.mubr.f32.gmra.mrb[2].mxu0 %v84_v1  ;;  %345 = vmatmul.mubr.f32.gmra.mrb[2].mxu1 %v84_v1 }
 0x19c   :  { %v264_v10 = vpop.f32.mrb[0].mxu0  ;;  %v2337_v11 = vpop.f32.mrb[0].mxu1 }
 0x19d   :  { %v3279_v13 = vadd.f32 %v264_v10, %v186_v8  ;;  %v266_v14 = vpop.f32.mrb[1].mxu0  ;;  %v2338_v15 = vpop.f32.mrb[1].mxu1 }
 0x19e   :  { %v267_v18 = vadd.f32 %v266_v14, %v190_v9  ;;  %v2339_v19 = vadd.f32 %v2338_v15, %v2337_v11 }
 0x19f   :  { %2419 = vmatprep.mubr.f32.mxu1 %v3279_v13 }
 0x1a0   :  { %v342_v21 = vadd.f32 %v2339_v19, %v194_v12  ;;  %v270_v22 = vpop.f32.mrb[2].mxu0  ;;  %v2340_v23 = vpop.f32.mrb[2].mxu1  ;;  %v780_v26 = vmul.f32 %v779_v17, %v267_v18  ;;  %v972_v29 = vmul.f32 %v971_v20, %v267_v18  ;;  %v399_v32 = vmul.f32 %v398_v24, %v267_v18 }
 0x1a1   :  { %v272_v27 = vpop.f32.mrb[3].mxu0  ;;  %v2341_v28 = vpop.f32.mrb[3].mxu1  ;;  %v509_v33 = vmul.f32 %v508_v25, %v267_v18  ;;  %v3293_v55 = vadd.f32 %v270_v22, %v186_v8 }
 0x1a2   :  { %v273_v30 = vadd.f32 %v272_v27, %v190_v9  ;;  %v2342_v31 = vadd.f32 %v2341_v28, %v2340_v23  ;;  %v883_v34 = vmul.f32 %v779_v17, %v342_v21  ;;  %v1075_v35 = vmul.f32 %v971_v20, %v342_v21 }
 0x1a3   :  { %v612_v40 = vmul.f32 %v508_v25, %v342_v21  ;;  %v503_v41 = vmul.f32 %v398_v24, %v342_v21  ;;  %v2893_v9 = vmov -1e+30  }
 0x1a4   :  { %v347_v36 = vadd.f32 %v2342_v31, %v194_v12  ;;  %v400_v37 = vmul.f32 %v398_v24, %v273_v30  ;;  %v510_v38 = vmul.f32 %v508_v25, %v273_v30  ;;  %v781_v39 = vmul.f32 %v779_v17, %v273_v30 }
 0x1a5   :  { %v973_v42 = vmul.f32 %v971_v20, %v273_v30  ;;  %v3302_v10 = vsel %vm392_vm9, 0.0, %v2893_v9  ;;  %v3305_v12 = vsel %vm391_vm10, 0.0, %v2893_v9 }
 0x1a6   :  { %v2602_v43 = vpack.c.bf16 %v400_v37, %v399_v32  ;;  %v2606_v44 = vpack.c.bf16 %v510_v38, %v509_v33  ;;  %v613_v45 = vmul.f32 %v508_v25, %v347_v36  ;;  %v504_v46 = vmul.f32 %v398_v24, %v347_v36 }
 0x1a7   :  { %v3283_v47 = vpack.c.bf16 %v781_v39, %v780_v26  ;;  %v884_v48 = vmul.f32 %v779_v17, %v347_v36  ;;  %v3285_v49 = vpack.c.bf16 %v973_v42, %v972_v29  ;;  %v1076_v50 = vmul.f32 %v971_v20, %v347_v36 }
 0x1a8   :  { %2603 = vmatprep.subr.bf16.mxu1 %v2602_v43  ;;  %v2610_v51 = vpack.c.bf16 %v613_v45, %v612_v40  ;;  %v3287_v52 = vpack.c.bf16 %v504_v46, %v503_v41 }
 0x1a9   :  { %2605 = vmatpush3.bf16.xpose.msra.mxu1 %v2602_v43  ;;  %v3289_v53 = vpack.c.bf16 %v884_v48, %v883_v34  ;;  %v3291_v54 = vpack.c.bf16 %v1076_v50, %v1075_v35 }
 0x1aa   :  { %2607 = vmatprep.subr.bf16.mxu1 %v2606_v44 }
 0x1b0   :  { %2420 = vmatmul.mubr.f32.vlgmr.msra.gmra.mrb[4].mxu1 %v3293_v55 }
 0x1b1   :  { %2609 = vmatpush3.bf16.xpose.msra.mxu1 %v2606_v44  ;;  %2426 = vmatprep.mubr.f32.mxu1 %v3279_v13 }
 0x1b2   :  { %2611 = vmatprep.subr.bf16.mxu1 %v2610_v51 }
 0x1b8   :  { %2427 = vmatmul.mubr.f32.vlgmr.msra.gmra.mrb[6].mxu1 %v3293_v55 }
 0x1b9   :  { %2613 = vmatpush3.bf16.msra.mxu1 %v2610_v51 }
 0x1ba   :  { %2615 = vmatprep.subr.bf16.mxu1 %v3287_v52 }
 0x283   :  { %v2421_v57 = vpop.f32.mrb[4].mxu1 }
 0x284   :  { %v467_v58 = vpop.f32.mrb[5].mxu1  ;;  %v477_v63 = vmul.f32 0.17677669, %v2421_v57 }
 0x285   :  { %v476_v6 = vmul.f32 0.17677669, %v467_v58 }
 0x286   :  { %v479_v15 = vadd.f32 %v477_v63, %v3302_v10 }
 0x287   :  { %v478_v17 = vadd.f32 %v476_v6, %v3305_v12 }
 0x288   :  { %v484_v18 = vsel %vm480_vm11, %v479_v15, -inf }
 0x289   :  { %v481_v19 = vsel %vm480_vm11, %v478_v17, -inf }
 0x28b   :  { %v2428_v62 = vpop.f32.mrb[6].mxu1 }
 0x28c   :  { %v587_v1 = vmul.f32 0.17677669, %v2428_v62  ;;  %v577_v2 = vpop.f32.mrb[7].mxu1 }
 0x28d   :  { %v586_v8 = vmul.f32 0.17677669, %v577_v2 }
 0x28e   :  { %v589_v11 = vadd.f32 %v587_v1, %v3302_v10 }
 0x28f   :  { %v588_v4 = vadd.f32 %v586_v8, %v3305_v12 }
 0x290   :  { %v593_v14 = vsel %vm480_vm11, %v589_v11, -inf }
 0x291   :  { %594 = vmax.xlane.f32.xlu1 %v593_v14  ;;  %v590_v16 = vsel %vm480_vm11, %v588_v4, -inf }
 0x292   :  { %591 = vmax.xlane.f32.xlu0 %v590_v16 }
 0x295   :  { %485 = vmax.xlane.f32.xlu1 %v484_v18 }
 0x296   :  { %482 = vmax.xlane.f32.xlu0 %v481_v19 }
 0x31e   :  { %v595_v20 = vpop.xlane.xlu1 %594 }
 0x31f   :  { %v597_v21 = vsub.f32 %v589_v11, %v595_v20  ;;  %v592_v22 = vpop.xlane.xlu0 %591 }
 0x320   :  { %v596_v23 = vsub.f32 %v588_v4, %v592_v22 }
 0x321   :  { %v600_v24 = vmul.f32 1.442695, %v597_v21 }
 0x322   :  { %v598_v25 = vmul.f32 1.442695, %v596_v23  ;;  %v486_v26 = vpop.xlane.xlu1 %485 }
 0x323   :  { %2766 = vpow2.f32 %v600_v24  ;;  %v488_v27 = vsub.f32 %v479_v15, %v486_v26  ;;  %v483_v28 = vpop.xlane.xlu0 %482 }
 0x324   :  { %2768 = vpow2.f32 %v598_v25  ;;  %v487_v29 = vsub.f32 %v478_v17, %v483_v28 }
 0x325   :  { %v491_v30 = vmul.f32 1.442695, %v488_v27 }
 0x326   :  { %v489_v31 = vmul.f32 1.442695, %v487_v29 }
 0x327   :  { %2770 = vpow2.f32 %v491_v30 }
 0x328   :  { %2772 = vpow2.f32 %v489_v31 }
 0x32d   :  { %v2767_v32 = vpop.eup %2766 }
 0x32e   :  { %v2769_v33 = vpop.eup %2768  ;;  %v605_v34 = vsel %vm480_vm11, %v2767_v32, 0.0 }
 0x32f   :  { %606 = vadd.xlane.f32.xlu1 %v605_v34  ;;  %v602_v35 = vsel %vm480_vm11, %v2769_v33, 0.0  ;;  %v1160_v34 = vld [vmem:[%s4052_s3] sm:$0xff] }
 0x330   :  { %603 = vadd.xlane.f32.xlu0 %v602_v35  ;;  %v1161_v35 = vld [vmem:[%s4052_s3 + $0x8] sm:$0xff] }
 0x331   :  { %v2771_v36 = vpop.eup %2770 }
 0x332   :  { %v2773_v37 = vpop.eup %2772  ;;  %v496_v38 = vsel %vm480_vm11, %v2771_v36, 0.0 }
 0x333   :  { %497 = vadd.xlane.f32.xlu1 %v496_v38  ;;  %v493_v39 = vsel %vm480_vm11, %v2773_v37, 0.0  ;;  %v1163_v38 = vld [vmem:[%s4052_s3 + $0x18] sm:$0xff] }
 0x334   :  { %494 = vadd.xlane.f32.xlu0 %v493_v39 }
 0x3bc   :  { %v607_v40 = vpop.xlane.xlu1 %606 }
 0x3bd   :  { %2774 = vrcp.f32 %v607_v40  ;;  %v604_v41 = vpop.xlane.xlu0 %603  ;;  %v1164_v40 = vld [vmem:[%s4052_s3 + $0x20] sm:$0xff] }
 0x3be   :  { %2776 = vrcp.f32 %v604_v41  ;;  %v1165_v41 = vld [vmem:[%s4052_s3 + $0x28] sm:$0xff] }
 0x3c0   :  { %v498_v43 = vpop.xlane.xlu1 %497 }
 0x3c1   :  { %v495_v42 = vpop.xlane.xlu0 %494 }
 0x3c2   :  { %2778 = vrcp.f32 %v495_v42  ;;  %v2642_v42 = vpack.c.bf16 %v1165_v41, %v1164_v40 }
 0x3c3   :  { %2780 = vrcp.f32 %v498_v43  ;;  %v1166_v43 = vld [vmem:[%s4052_s3 + $0x30] sm:$0xff] }
 0x3c7   :  { %v2775_v44 = vpop.eup %2774 }
 0x3c8   :  { %v2777_v45 = vpop.eup %2776  ;;  %v611_v48 = vmul.f32 %v2775_v44, %v2767_v32  ;;  %v1167_v44 = vld [vmem:[%s4052_s3 + $0x38] sm:$0xff] }
 0x3c9   :  { %v610_v46 = vmul.f32 %v2777_v45, %v2769_v33  ;;  %v2646_v45 = vpack.c.bf16 %v1167_v44, %v1166_v43 }
 0x3cb   :  { %2433 = vmatprep.mubr.msk.f32.mxu1 %vm480_vm11, %v610_v46  ;;  %v1168_v46 = vld [vmem:[%s4052_s3 + $0x40] sm:$0xff] }
 0x3cc   :  { %v2779_v50 = vpop.eup %2778  ;;  %2434 = vmatmul.mubr.msk.f32.vlgmr.msra.gmra.mrb[8].mxu1 %vm480_vm11, %v611_v48  ;;  %v1169_v48 = vld [vmem:[%s4052_s3 + $0x48] sm:$0xff] }
 0x3cd   :  { %2617 = vmatpush3.bf16.msra.mxu1 %v3287_v52  ;;  %v501_v51 = vmul.f32 %v2779_v50, %v2773_v37  ;;  %v2781_v56 = vpop.eup %2780  ;;  %v2634_v37 = vpack.c.bf16 %v1161_v35, %v1160_v34  ;;  %v2650_v50 = vpack.c.bf16 %v1169_v48, %v1168_v46 }
 0x3ce   :  { %2619 = vmatprep.subr.bf16.mxu1 %v3283_v47  ;;  %v502_v57 = vmul.f32 %v2781_v56, %v2771_v36  ;;  %v1162_v36 = vld [vmem:[%s4052_s3 + $0x10] sm:$0xff]  ;;  %v1171_v56 = vld [vmem:[%s4052_s3 + $0x58] sm:$0xff] }
 0x3cf   :  { %2440 = vmatprep.mubr.msk.f32.mxu1 %vm480_vm11, %v501_v51  ;;  %v2638_v39 = vpack.c.bf16 %v1163_v38, %v1162_v36  ;;  %2635 = vmatprep.subr.bf16.mxu0 %v2634_v37  ;;  %v1170_v51 = vld [vmem:[%s4052_s3 + $0x50] sm:$0xff] }
 0x3d0   :  { %2637 = vmatpush3.bf16.msra.mxu0 %v2634_v37 }
 0x3d1   :  { %2639 = vmatprep.subr.bf16.mxu0 %v2638_v39 }
 0x3d4   :  { %2441 = vmatmul.mubr.msk.f32.vlgmr.msra.gmra.mrb[8].mxu1 %vm480_vm11, %v502_v57  ;;  %2641 = vmatpush3.bf16.msra.mxu0 %v2638_v39  ;;  %v2654_v57 = vpack.c.bf16 %v1171_v56, %v1170_v51 }
 0x3d5   :  { %2447 = vmatprep.mubr.f32.mxu1 %v3279_v13  ;;  %2643 = vmatprep.subr.bf16.mxu0 %v2642_v42 }
 0x3d6   :  { %2621 = vmatpush3.bf16.xpose.msra.mxu1 %v3283_v47 }
 0x3d7   :  { %2623 = vmatprep.subr.bf16.mxu1 %v3289_v53 }
 0x3d8   :  { %2645 = vmatpush3.bf16.msra.mxu0 %v2642_v42 }
 0x3d9   :  { %2647 = vmatprep.subr.bf16.mxu0 %v2646_v45 }
 0x3dc   :  { %2649 = vmatpush3.bf16.msra.mxu0 %v2646_v45 }
 0x3dd   :  { %2448 = vmatmul.mubr.f32.vlgmr.msra.gmra.mrb[10].mxu1 %v3293_v55  ;;  %2651 = vmatprep.subr.bf16.mxu0 %v2650_v50 }
 0x3de   :  { %2625 = vmatpush3.bf16.msra.mxu1 %v3289_v53 }
 0x3df   :  { %2627 = vmatprep.subr.bf16.mxu1 %v3285_v49 }
 0x3e0   :  { %2653 = vmatpush3.bf16.msra.mxu0 %v2650_v50 }
 0x3e1   :  { %2655 = vmatprep.subr.bf16.mxu0 %v2654_v57 }
 0x3e4   :  { %2657 = vmatpush3.bf16.msra.mxu0 %v2654_v57 }
 0x4b0   :  { %v2449_v52 = vpop.f32.mrb[10].mxu1 }
 0x4b1   :  { %v858_v58 = vmul.f32 0.17677669, %v2449_v52  ;;  %v848_v59 = vpop.f32.mrb[11].mxu1  ;;  %v1172_v52 = vld [vmem:[%s4052_s3 + $0x60] sm:$0xff] }
 0x4b2   :  { %v857_v60 = vmul.f32 0.17677669, %v848_v59 }
 0x4b3   :  { %v860_v61 = vadd.f32 %v858_v58, %v3302_v10  ;;  %v1173_v58 = vld [vmem:[%s4052_s3 + $0x68] sm:$0xff] }
 0x4b4   :  { %v859_v62 = vadd.f32 %v857_v60, %v3305_v12  ;;  %v2658_v59 = vpack.c.bf16 %v1173_v58, %v1172_v52  ;;  %v1174_v60 = vld [vmem:[%s4052_s3 + $0x70] sm:$0xff] }
 0x4b5   :  { %v864_v63 = vsel %vm480_vm11, %v860_v61, -inf }
 0x4b6   :  { %865 = vmax.xlane.f32.xlu1 %v864_v63  ;;  %v861_v47 = vsel %vm480_vm11, %v859_v62, -inf  ;;  %2659 = vmatprep.subr.bf16.mxu0 %v2658_v59 }
 0x4b7   :  { %862 = vmax.xlane.f32.xlu0 %v861_v47  ;;  %2661 = vmatpush3.bf16.msra.mxu0 %v2658_v59 }
 0x543   :  { %v866_v1 = vpop.xlane.xlu1 %865 }
 0x544   :  { %v868_v2 = vsub.f32 %v860_v61, %v866_v1  ;;  %v863_v6 = vpop.xlane.xlu0 %862  ;;  %v1175_v61 = vld [vmem:[%s4052_s3 + $0x78] sm:$0xff] }
 0x545   :  { %v867_v53 = vsub.f32 %v859_v62, %v863_v6  ;;  %v2662_v62 = vpack.c.bf16 %v1175_v61, %v1174_v60  ;;  %v2830_v60 = vld [vmem:[%s4049_s0 + $0x8] sm:$0xff] }
 0x546   :  { %v871_v8 = vmul.f32 1.442695, %v868_v2 }
 0x547   :  { %v869_v9 = vmul.f32 1.442695, %v867_v53  ;;  %2663 = vmatprep.subr.bf16.mxu0 %v2662_v62 }
 0x548   :  { %2782 = vpow2.f32 %v871_v8  ;;  %2665 = vmatpush3.bf16.msra.mxu0 %v2662_v62  ;;  %v2831_v62 = vld [vmem:[%s4049_s0] sm:$0xff] }
 0x549   :  { %2784 = vpow2.f32 %v869_v9 }
 0x552   :  { %v2783_v11 = vpop.eup %2782 }
 0x553   :  { %v2785_v4 = vpop.eup %2784  ;;  %v876_v14 = vsel %vm480_vm11, %v2783_v11, 0.0 }
 0x554   :  { %877 = vadd.xlane.f32.xlu1 %v876_v14  ;;  %v873_v15 = vsel %vm480_vm11, %v2785_v4, 0.0 }
 0x555   :  { %874 = vadd.xlane.f32.xlu0 %v873_v15 }
 0x5e1   :  { %v878_v16 = vpop.xlane.xlu1 %877 }
 0x5e2   :  { %2786 = vrcp.f32 %v878_v16  ;;  %v875_v17 = vpop.xlane.xlu0 %874 }
 0x5e3   :  { %2788 = vrcp.f32 %v875_v17 }
 0x5ec   :  { %v2787_v18 = vpop.eup %2786 }
 0x5ed   :  { %v2789_v19 = vpop.eup %2788  ;;  %v882_v21 = vmul.f32 %v2787_v18, %v2783_v11  ;;  %v3402_v11 = vld [vmem:[%s4056_s7] sm:$0x3f] }
 0x5ee   :  { %v881_v20 = vmul.f32 %v2789_v19, %v2785_v4  ;;  %v1179_v4 = vrot.slane %v3402_v11, %v3261_v0 }
 0x5f0   :  { %2454 = vmatprep.mubr.msk.f32.mxu1 %vm480_vm11, %v881_v20 }
 0x5f1   :  { %2455 = vmatmul.mubr.msk.f32.vlgmr.msra.gmra.mrb[8].mxu1 %vm480_vm11, %v882_v21 }
 0x5f2   :  { %2629 = vmatpush3.bf16.xpose.msra.mxu1 %v3285_v49  ;;  %2461 = vmatprep.mubr.f32.mxu1 %v3279_v13 }
 0x5f3   :  { %2631 = vmatprep.subr.bf16.mxu1 %v3291_v54 }
 0x5f9   :  { %2462 = vmatmul.mubr.f32.vlgmr.msra.gmra.mrb[12].mxu1 %v3293_v55 }
 0x5fa   :  { %2633 = vmatpush3.bf16.msra.mxu1 %v3291_v54 }
 0x6cc   :  { %v2463_v22 = vpop.f32.mrb[12].mxu1 }
 0x6cd   :  { %v1050_v23 = vmul.f32 0.17677669, %v2463_v22  ;;  %v1040_v24 = vpop.f32.mrb[13].mxu1 }
 0x6ce   :  { %v1049_v25 = vmul.f32 0.17677669, %v1040_v24 }
 0x6cf   :  { %v1052_v26 = vadd.f32 %v1050_v23, %v3302_v10 }
 0x6d0   :  { %v1051_v27 = vadd.f32 %v1049_v25, %v3305_v12 }
 0x6d1   :  { %v1056_v28 = vsel %vm480_vm11, %v1052_v26, -inf }
 0x6d2   :  { %1057 = vmax.xlane.f32.xlu1 %v1056_v28  ;;  %v1053_v49 = vsel %vm480_vm11, %v1051_v27, -inf }
 0x6d3   :  { %1054 = vmax.xlane.f32.xlu0 %v1053_v49 }
 0x75f   :  { %v1058_v13 = vpop.xlane.xlu1 %1057 }
 0x760   :  { %v1060_v29 = vsub.f32 %v1052_v26, %v1058_v13  ;;  %v1055_v30 = vpop.xlane.xlu0 %1054 }
 0x761   :  { %v1059_v55 = vsub.f32 %v1051_v27, %v1055_v30 }
 0x762   :  { %v1063_v31 = vmul.f32 1.442695, %v1060_v29 }
 0x763   :  { %v1061_v54 = vmul.f32 1.442695, %v1059_v55 }
 0x764   :  { %2790 = vpow2.f32 %v1063_v31 }
 0x765   :  { %2792 = vpow2.f32 %v1061_v54 }
 0x76e   :  { %v2791_v32 = vpop.eup %2790 }
 0x76f   :  { %v2793_v33 = vpop.eup %2792  ;;  %v1068_v10 = vsel %vm480_vm11, %v2791_v32, 0.0 }
 0x770   :  { %1069 = vadd.xlane.f32.xlu1 %v1068_v10  ;;  %v1065_v12 = vsel %vm480_vm11, %v2793_v33, 0.0 }
 0x771   :  { %1066 = vadd.xlane.f32.xlu0 %v1065_v12 }
 0x7fd   :  { %v1070_v63 = vpop.xlane.xlu1 %1069 }
 0x7fe   :  { %2794 = vrcp.f32 %v1070_v63  ;;  %v1067_v47 = vpop.xlane.xlu0 %1066 }
 0x7ff   :  { %2796 = vrcp.f32 %v1067_v47 }
 0x808   :  { %v2795_v1 = vpop.eup %2794 }
 0x809   :  { %v2797_v2 = vpop.eup %2796  ;;  %v1074_v53 = vmul.f32 %v2795_v1, %v2791_v32 }
 0x80a   :  { %v1073_v6 = vmul.f32 %v2797_v2, %v2793_v33 }
 0x80c   :  { %2468 = vmatprep.mubr.msk.f32.mxu1 %vm480_vm11, %v1073_v6 }
 0x80d   :  { %2469 = vmatmul.mubr.msk.f32.vlgmr.msra.gmra.mrb[8].mxu1 %vm480_vm11, %v1074_v53 }
 0x8e0   :  { %v2470_v8 = vpop.f32.mrb[8].mxu1 }
 0x8e1   :  { %v1149_v9 = vpop.f32.mrb[9].mxu1 }
 0x8e2   :  { %2503 = vmatprep.mubr.f32.mxu0 %v1149_v9 }
 0x8e3   :  { %2504 = vmatmul.mubr.f32.vlgmr.msra.gmra.mrb[4].mxu0 %v2470_v8 }
 0x9b6   :  { %v2505_v14 = vpop.f32.mrb[4].mxu0 }
 0x9b7   :  { %v1252_v15 = vadd.f32 %v2505_v14, %v1179_v4  ;;  %v1246_v16 = vpop.f32.mrb[5].mxu0 }
 0x9b8   :  { %v1247_v17 = vadd.f32 %v1246_v16, %v1179_v4 }
 0x9b9   :  { %1257 = vmin.xlane.f32.xlu1 %v1252_v15 }
 0x9ba   :  { %1255 = vmin.xlane.f32.xlu0 %v1247_v17 }
 0x9bd   :  { %1268 = vmax.xlane.f32.xlu1 %v1252_v15 }
 0x9be   :  { %1266 = vmax.xlane.f32.xlu0 %v1247_v17 }
 0xa46   :  { %v1258_v18 = vpop.xlane.xlu1 %1257 }
 0xa47   :  { %v1256_v19 = vpop.xlane.xlu0 %1255 }
 0xa48   :  { %v1259_v20 = vmin.f32 %v1256_v19, %v1258_v18 }
 0xa4a   :  { %v1260_v21 = vrot.slane %v1259_v20, 4  ;;  %v1269_v22 = vpop.xlane.xlu1 %1268 }
 0xa4b   :  { %v1267_v23 = vpop.xlane.xlu0 %1266 }
 0xa4c   :  { %v1261_v24 = vmin.f32 %v1259_v20, %v1260_v21  ;;  %v1270_v25 = vmax.f32 %v1267_v23, %v1269_v22  ;;  %v3418_v20 = vld [vmem:[%s4053_s4 + $0x8] sm:$0xff]  ;;  %v3423_v21 = vld [vmem:[%s4053_s4 + $0x18] sm:$0xff] }
 0xa4d   :  { %v3428_v22 = vld [vmem:[%s4053_s4 + $0x28] sm:$0xff]  ;;  %v3433_v23 = vld [vmem:[%s4053_s4 + $0x38] sm:$0xff] }
 0xa4e   :  { %v1262_v26 = vrot.slane %v1261_v24, 2  ;;  %v1271_v27 = vrot.slane %v1270_v25, 4  ;;  %2857 = vmaxabs.init.f32.vacc0 %v3418_v20, %v3428_v22 }
 0xa50   :  { %v1263_v28 = vmin.f32 %v1261_v24, %v1262_v26  ;;  %v1272_v49 = vmax.f32 %v1270_v25, %v1271_v27  ;;  %v3438_v24 = vld [vmem:[%s4053_s4 + $0x48] sm:$0xff]  ;;  %v3443_v25 = vld [vmem:[%s4053_s4 + $0x58] sm:$0xff]  ;;  %2858 = vmaxabs.f32.vacc0 %v3423_v21, %v3433_v23 }
 0xa51   :  { %v3448_v26 = vld [vmem:[%s4053_s4 + $0x68] sm:$0xff]  ;;  %v3453_v27 = vld [vmem:[%s4053_s4 + $0x78] sm:$0xff] }
 0xa52   :  { %v1273_v13 = vrot.slane %v1272_v49, 2  ;;  %v1264_v29 = vrot.slane %v1263_v28, 1  ;;  %2859 = vmaxabs.f32.vacc0 %v3438_v24, %v3443_v25 }
 0xa54   :  { %v1274_v30 = vmax.f32 %v1272_v49, %v1273_v13  ;;  %v1265_v31 = vmin.f32 %v1263_v28, %v1264_v29  ;;  %v3462_v28 = vld [vmem:[%s4053_s4] sm:$0xff]  ;;  %v3467_v49 = vld [vmem:[%s4053_s4 + $0x10] sm:$0xff]  ;;  %v3477_v29 = vld [vmem:[%s4053_s4 + $0x88] sm:$0xff]  ;;  %2860 = vmaxabs.f32.vacc0 %v3448_v26, %v3453_v27 }
 0xa55   :  { %v3472_v13 = vld [vmem:[%s4053_s4 + $0x20] sm:$0xff] }
 0xa56   :  { %v1275_v55 = vrot.slane %v1274_v30, 1  ;;  %2866 = vmaxabs.init.f32.vacc1 %v3462_v28, %v3472_v13 }
 0xa58   :  { %v1276_v54 = vmax.f32 %v1274_v30, %v1275_v55  ;;  %v3482_v30 = vld [vmem:[%s4053_s4 + $0x98] sm:$0xff]  ;;  %v3489_v55 = vld [vmem:[%s4053_s4 + $0x30] sm:$0xff] }
 0xa59   :  { %2861 = vmaxabs.f32.vacc0 %v3477_v29, %v3482_v30  ;;  %2867 = vmaxabs.f32.vacc1 %v3467_v49, %v3489_v55 }
 0xa5a   :  { %v1277_v32 = vsub.f32 %v1276_v54, %v1265_v31  ;;  %v3496_v54 = vld [vmem:[%s4053_s4 + $0xa8] sm:$0xff] }
 0xa5c   :  { %vm1278_vm12 = vcmp.ge.f32.partialorder %v1277_v32, 1e-08  ;;  %v1279_v33 = vmul.f32 0.003921569, %v1277_v32  ;;  %v3501_v32 = vld [vmem:[%s4053_s4 + $0xb8] sm:$0xff] }
 0xa5d   :  { %2862 = vmaxabs.f32.vacc0 %v3496_v54, %v3501_v32 }
 0xa5e   :  { %v1280_v10 = vsel %vm1278_vm12, %v1279_v33, 1.0  ;;  %v3508_v33 = vld [vmem:[%s4053_s4 + $0x40] sm:$0xff] }
 0xa5f   :  { %2798 = vrcp.f32 %v1280_v10 }
 0xa69   :  { %v2799_v12 = vpop.eup %2798 }
 0xa6a   :  { %v1282_v34 = vmul.f32 %v2799_v12, %v1265_v31  ;;  %v1289_v39 = vmul.f32 %v2799_v12, %v1252_v15  ;;  %v1288_v40 = vmul.f32 %v2799_v12, %v1247_v17  ;;  %v1334_v31 = vrot.slane %v3402_v11, %v3267_v7 }
 0xa6b   :  { %v1340_v12 = vrot.slane %v3402_v11, %v193_v5  ;;  %v3528_v5 = vld [vmem:[%s4053_s4 + $0x50] sm:$0xff] }
 0xa6c   :  { %v2675_v35 = vround.rtne.f32 %v1282_v34  ;;  %2868 = vmaxabs.f32.vacc1 %v3508_v33, %v3528_v5 }
 0xa6e   :  { %v1284_v36 = vsub.f32 0.0, %v2675_v35 }
 0xa70   :  { %v1285_v37 = vmax.f32 %v1284_v36, 0.0  ;;  %v3516_v36 = vld [vmem:[%s4053_s4 + $0xc8] sm:$0xff] }
 0xa72   :  { %v1286_v38 = vmin.f32 %v1285_v37, 255.0  ;;  %v3521_v37 = vld [vmem:[%s4053_s4 + $0xd8] sm:$0xff] }
 0xa73   :  { %2863 = vmaxabs.f32.vacc0 %v3516_v36, %v3521_v37 }
 0xa74   :  { %v1291_v41 = vadd.f32 %v1289_v39, %v1286_v38  ;;  %v1290_v42 = vadd.f32 %v1288_v40, %v1286_v38  ;;  %v3535_v39 = vld [vmem:[%s4053_s4 + $0xe8] sm:$0xff]  ;;  %v3540_v40 = vld [vmem:[%s4053_s4 + $0xf8] sm:$0xff] }
 0xa75   :  { %2864 = vmaxabs.f32.vacc0 %v3535_v39, %v3540_v40 }
 0xa76   :  { %v2677_v43 = vround.rtne.f32 %v1291_v41  ;;  %v2676_v44 = vround.rtne.f32 %v1290_v42  ;;  %v3547_v41 = vld [vmem:[%s4053_s4 + $0x60] sm:$0xff] }
 0xa78   :  { %v1295_v45 = vmax.f32 %v2677_v43, 0.0  ;;  %v1294_v46 = vmax.f32 %v2676_v44, 0.0  ;;  %v3552_v43 = vld [vmem:[%s4053_s4 + $0x70] sm:$0xff] }
 0xa79   :  { %2869 = vmaxabs.f32.vacc1 %v3547_v41, %v3552_v43 }
 0xa7a   :  { %v1297_v48 = vmin.f32 %v1295_v45, 255.0  ;;  %v1296_v50 = vmin.f32 %v1294_v46, 255.0  ;;  %v3563_v45 = vld [vmem:[%s4053_s4 + $0x80] sm:$0xff] }
 0xa7c   :  { %v1299_v51 = vsub.f32 %v1297_v48, %v1286_v38  ;;  %v1298_v56 = vsub.f32 %v1296_v50, %v1286_v38  ;;  %v3570_v48 = vld [vmem:[%s4053_s4 + $0x90] sm:$0xff]  ;;  %v3578_v50 = vld [vmem:[%s4053_s4 + $0xa0] sm:$0xff] }
 0xa7d   :  { %2870 = vmaxabs.f32.vacc1 %v3563_v45, %v3570_v48 }
 0xa7e   :  { %v1303_v57 = vsel %vm1278_vm12, %v1299_v51, %v1252_v15  ;;  %v1302_v52 = vsel %vm1278_vm12, %v1298_v56, %v1247_v17  ;;  %v3584_v51 = vld [vmem:[%s4053_s4 + $0xb0] sm:$0xff]  ;;  %v2865_v56 = vmovacc.low.even.vacc0 }
 0xa7f   :  { %v1305_v58 = vmul.f32 %v1303_v57, %v1280_v10  ;;  %v1304_v59 = vmul.f32 %v1302_v52, %v1280_v10  ;;  %v3589_v57 = vld [vmem:[%s4053_s4 + $0xc0] sm:$0xff]  ;;  %v3596_v52 = vld [vmem:[%s4053_s4 + $0xd0] sm:$0xff]  ;;  %2871 = vmaxabs.f32.vacc1 %v3578_v50, %v3584_v51 }
 0xa81   :  { %v1307_v61 = vadd.f32 %v2830_v60, %v1305_v58  ;;  %v1306_v63 = vadd.f32 %v2831_v62, %v1304_v59  ;;  %v1492_v58 = vrot.slane %v2865_v56, 4  ;;  %v3602_v59 = vld [vmem:[%s4053_s4 + $0xe0] sm:$0xff]  ;;  %v3610_v60 = vld [vmem:[%s4053_s4 + $0xf0] sm:$0xff]  ;;  %2872 = vmaxabs.f32.vacc1 %v3589_v57, %v3596_v52 }
 0xa83   :  { %1310 = vadd.xlane.f32.xlu1 %v1307_v61  ;;  %1308 = vadd.xlane.f32.xlu0 %v1306_v63  ;;  %2873 = vmaxabs.f32.vacc1 %v3602_v59, %v3610_v60 }
 0xb10   :  { %v1311_v47 = vpop.xlane.xlu1 %1310  ;;  %v1309_v1 = vpop.xlane.xlu0 %1308 }
 0xb11   :  { %v1314_v2 = vmul.f32 0.0078125, %v1311_v47  ;;  %v1313_v6 = vmul.f32 0.0078125, %v1309_v1 }
 0xb13   :  { %v1316_v53 = vsub.f32 %v1307_v61, %v1314_v2  ;;  %v1315_v8 = vsub.f32 %v1306_v63, %v1313_v6  ;;  %v1493_v61 = vmax.f32 %v2865_v56, %v1492_v58  ;;  %v2874_v2 = vmovacc.low.even.vacc1 }
 0xb15   :  { %v1318_v9 = vmul.f32 %v1316_v53, %v1316_v53  ;;  %v1317_v4 = vmul.f32 %v1315_v8, %v1315_v8  ;;  %v1494_v62 = vrot.slane %v1493_v61, 2 }
 0xb17   :  { %1321 = vadd.xlane.f32.xlu1 %v1318_v9  ;;  %1319 = vadd.xlane.f32.xlu0 %v1317_v4  ;;  %v1495_v63 = vmax.f32 %v1493_v61, %v1494_v62 }
 0xb19   :  { %v1496_v47 = vrot.slane %v1495_v63, 1 }
 0xb1b   :  { %v1497_v1 = vmax.f32 %v1495_v63, %v1496_v47 }
 0xb1d   :  { %v3620_v6 = vmul.f32 0.007874016, %v1497_v1 }
 0xba4   :  { %v1322_v14 = vpop.xlane.xlu1 %1321  ;;  %v1320_v15 = vpop.xlane.xlu0 %1319 }
 0xba5   :  { %v1324_v16 = vmul.f32 0.0078125, %v1322_v14  ;;  %v1323_v17 = vmul.f32 0.0078125, %v1320_v15 }
 0xba7   :  { %v1326_v18 = vadd.f32 1e-12, %v1324_v16  ;;  %v1325_v19 = vadd.f32 1e-12, %v1323_v17 }
 0xba9   :  { %2800 = vrsqrt.f32 %v1326_v18 }
 0xbaa   :  { %2802 = vrsqrt.f32 %v1325_v19 }
 0xbb3   :  { %v2801_v10 = vpop.eup %2800 }
 0xbb4   :  { %v2803_v34 = vpop.eup %2802  ;;  %v1330_v35 = vmul.f32 %v2801_v10, %v1316_v53  ;;  %v1471_v53 = vrot.slane %v2874_v2, 4 }
 0xbb5   :  { %v1329_v38 = vmul.f32 %v2803_v34, %v1315_v8  ;;  %v1502_v8 = vmax.f32 %v3620_v6, 1e-08 }
 0xbb6   :  { %v1336_v11 = vmul.f32 %v1334_v31, %v1330_v35  ;;  %v1472_v9 = vmax.f32 %v2874_v2, %v1471_v53 }
 0xbb7   :  { %v1335_v42 = vmul.f32 %v1334_v31, %v1329_v38  ;;  %2804 = vrcp.f32 %v1502_v8 }
 0xbb8   :  { %v3556_v44 = vadd.f32 %v1340_v12, %v1336_v11  ;;  %v1473_v4 = vrot.slane %v1472_v9, 2 }
 0xbb9   :  { %v3565_v46 = vadd.f32 %v1340_v12, %v1335_v42 }
 0xbba   :  { %1345 = vmin.xlane.f32.xlu1 %v3556_v44  ;;  %v1474_v14 = vmax.f32 %v1472_v9, %v1473_v4 }
 0xbbb   :  { %1343 = vmin.xlane.f32.xlu0 %v3565_v46 }
 0xbbc   :  { %v1475_v15 = vrot.slane %v1474_v14, 1 }
 0xbbe   :  { %1356 = vmax.xlane.f32.xlu1 %v3556_v44  ;;  %v1476_v16 = vmax.f32 %v1474_v14, %v1475_v15 }
 0xbbf   :  { %1354 = vmax.xlane.f32.xlu0 %v3565_v46 }
 0xbc0   :  { %v3625_v17 = vmul.f32 0.007874016, %v1476_v16 }
 0xbc1   :  { %v3627_v18 = vpop.eup %2804 }
 0xbc2   :  { %v1501_v19 = vmax.f32 %v3625_v17, 1e-08  ;;  %v1508_v31 = vmul.f32 %v3627_v18, %v3418_v20  ;;  %v1510_v10 = vmul.f32 %v3627_v18, %v3423_v21  ;;  %v1512_v35 = vmul.f32 %v3627_v18, %v3428_v22 }
 0xbc3   :  { %v1514_v38 = vmul.f32 %v3627_v18, %v3433_v23  ;;  %v1516_v21 = vmul.f32 %v3627_v18, %v3438_v24  ;;  %v1518_v47 = vmul.f32 %v3627_v18, %v3443_v25  ;;  %v1520_v22 = vmul.f32 %v3627_v18, %v3448_v26 }
 0xbc4   :  { %2806 = vrcp.f32 %v1501_v19  ;;  %v2682_v12 = vround.rtne.f32 %v1508_v31  ;;  %v2684_v34 = vround.rtne.f32 %v1510_v10  ;;  %v2686_v56 = vround.rtne.f32 %v1512_v35 }
 0xbc5   :  { %v2688_v58 = vround.rtne.f32 %v1514_v38  ;;  %v1522_v23 = vmul.f32 %v3627_v18, %v3453_v27  ;;  %v1524_v2 = vmul.f32 %v3627_v18, %v3477_v29  ;;  %v2690_v4 = vround.rtne.f32 %v1516_v21 }
 0xbc6   :  { %v1572_v11 = vmax.f32 %v2682_v12, -128.0  ;;  %v1574_v42 = vmax.f32 %v2684_v34, -128.0  ;;  %v1576_v62 = vmax.f32 %v2686_v56, -128.0  ;;  %v2692_v14 = vround.rtne.f32 %v1518_v47 }
 0xbc7   :  { %v1578_v63 = vmax.f32 %v2688_v58, -128.0  ;;  %v2694_v15 = vround.rtne.f32 %v1520_v22  ;;  %v2696_v24 = vround.rtne.f32 %v1522_v23  ;;  %v1526_v25 = vmul.f32 %v3627_v18, %v3482_v30 }
 0xbc8   :  { %v1604_v61 = vmin.f32 %v1572_v11, 127.0  ;;  %v1606_v20 = vmin.f32 %v1574_v42, 127.0  ;;  %v1608_v53 = vmin.f32 %v1576_v62, 127.0  ;;  %v2698_v16 = vround.rtne.f32 %v1524_v2 }
 0xbc9   :  { %v1610_v9 = vmin.f32 %v1578_v63, 127.0  ;;  %v1580_v10 = vmax.f32 %v2690_v4, -128.0  ;;  %v1582_v12 = vmax.f32 %v2692_v14, -128.0  ;;  %v1528_v27 = vmul.f32 %v3627_v18, %v3496_v54 }
 0xbca   :  { %v1637_v1 = vpack.c.bf16 %v1606_v20, %v1604_v61  ;;  %v1584_v63 = vmax.f32 %v2694_v15, -128.0  ;;  %v1586_v23 = vmax.f32 %v2696_v24, -128.0 }
 0xbcb   :  { %v1639_v26 = vpack.c.bf16 %v1610_v9, %v1608_v53  ;;  %v1612_v38 = vmin.f32 %v1580_v10, 127.0  ;;  %v1614_v11 = vmin.f32 %v1582_v12, 127.0 }
 0xbcc   :  { %1652 = vmatprep.subr.bf16.mxu1 %v1637_v1  ;;  %v1616_v2 = vmin.f32 %v1584_v63, 127.0  ;;  %v1618_v10 = vmin.f32 %v1586_v23, 127.0 }
 0xbcd   :  { %v1641_v20 = vpack.c.bf16 %v1614_v11, %v1612_v38  ;;  %v1588_v11 = vmax.f32 %v2698_v16, -128.0 }
 0xbce   :  { %v3652_v31 = vpop.eup %2806  ;;  %v1643_v38 = vpack.c.bf16 %v1618_v10, %v1616_v2 }
 0xbcf   :  { %v1507_v29 = vmul.f32 %v3652_v31, %v3462_v28  ;;  %v1509_v34 = vmul.f32 %v3652_v31, %v3467_v49  ;;  %v1511_v35 = vmul.f32 %v3652_v31, %v3472_v13  ;;  %v1513_v30 = vmul.f32 %v3652_v31, %v3489_v55 }
 0xbd0   :  { %v1515_v42 = vmul.f32 %v3652_v31, %v3508_v33  ;;  %v1517_v54 = vmul.f32 %v3652_v31, %v3528_v5  ;;  %v1519_v12 = vmul.f32 %v3652_v31, %v3547_v41 }
 0xbd1   :  { %v2681_v56 = vround.rtne.f32 %v1507_v29  ;;  %v2683_v58 = vround.rtne.f32 %v1509_v34  ;;  %v2685_v28 = vround.rtne.f32 %v1511_v35  ;;  %v2687_v61 = vround.rtne.f32 %v1513_v30 }
 0xbd2   :  { %v2689_v49 = vround.rtne.f32 %v1515_v42  ;;  %v2691_v62 = vround.rtne.f32 %v1517_v54  ;;  %v1521_v34 = vmul.f32 %v3652_v31, %v3552_v43  ;;  %v2700_v35 = vround.rtne.f32 %v1526_v25 }
 0xbd3   :  { %v1571_v13 = vmax.f32 %v2681_v56, -128.0  ;;  %v1573_v21 = vmax.f32 %v2683_v58, -128.0  ;;  %v1575_v47 = vmax.f32 %v2685_v28, -128.0  ;;  %v1577_v55 = vmax.f32 %v2687_v61, -128.0 }
 0xbd4   :  { %v1579_v1 = vmax.f32 %v2689_v49, -128.0  ;;  %v1581_v22 = vmax.f32 %v2691_v62, -128.0  ;;  %v2693_v24 = vround.rtne.f32 %v1519_v12  ;;  %v2695_v42 = vround.rtne.f32 %v1521_v34 }
 0xbd5   :  { %v1603_v33 = vmin.f32 %v1571_v13, 127.0  ;;  %v1605_v53 = vmin.f32 %v1573_v21, 127.0  ;;  %v1607_v9 = vmin.f32 %v1575_v47, 127.0  ;;  %v1609_v5 = vmin.f32 %v1577_v55, 127.0 }
 0xbd6   :  { %v1611_v4 = vmin.f32 %v1579_v1, 127.0  ;;  %v1613_v14 = vmin.f32 %v1581_v22, 127.0  ;;  %v1590_v54 = vmax.f32 %v2700_v35, -128.0  ;;  %v1523_v56 = vmul.f32 %v3652_v31, %v3563_v45 }
 0xbd7   :  { %v1636_v29 = vpack.c.bf16 %v1605_v53, %v1603_v33  ;;  %v1638_v15 = vpack.c.bf16 %v1609_v5, %v1607_v9  ;;  %v1525_v58 = vmul.f32 %v3652_v31, %v3570_v48  ;;  %v1583_v41 = vmax.f32 %v2693_v24, -128.0 }
 0xbd8   :  { %v1640_v30 = vpack.c.bf16 %v1613_v14, %v1611_v4  ;;  %v1620_v28 = vmin.f32 %v1588_v11, 127.0  ;;  %v1530_v43 = vmul.f32 %v3627_v18, %v3501_v32  ;;  %v2702_v25 = vround.rtne.f32 %v1528_v27 }
 0xbd9   :  { %1653 = vmatpush1.bf16.msra.mxu1 %v1636_v29  ;;  %v1585_v61 = vmax.f32 %v2695_v42, -128.0  ;;  %v1622_v49 = vmin.f32 %v1590_v54, 127.0  ;;  %v2697_v62 = vround.rtne.f32 %v1523_v56  ;;  %v2699_v16 = vround.rtne.f32 %v1525_v58 }
 0xbda   :  { %1654 = vmatprep.subr.bf16.mxu1 %v1639_v26  ;;  %v1615_v63 = vmin.f32 %v1583_v41, 127.0  ;;  %v2704_v13 = vround.rtne.f32 %v1530_v43  ;;  %v1592_v21 = vmax.f32 %v2702_v25, -128.0  ;;  %v1527_v45 = vmul.f32 %v3652_v31, %v3578_v50 }
 0xbdb   :  { %v1617_v47 = vmin.f32 %v1585_v61, 127.0  ;;  %v1645_v48 = vpack.c.bf16 %v1622_v49, %v1620_v28  ;;  %v1587_v26 = vmax.f32 %v2697_v62, -128.0  ;;  %v1589_v55 = vmax.f32 %v2699_v16, -128.0 }
 0xbdc   :  { %v1594_v1 = vmax.f32 %v2704_v13, -128.0  ;;  %v1624_v22 = vmin.f32 %v1592_v21, 127.0  ;;  %v1529_v32 = vmul.f32 %v3652_v31, %v3584_v51  ;;  %v2701_v27 = vround.rtne.f32 %v1527_v45 }
 0xbdd   :  { %1655 = vmatpush1.bf16.msra.mxu1 %v1638_v15  ;;  %v1619_v23 = vmin.f32 %v1587_v26, 127.0  ;;  %v1621_v2 = vmin.f32 %v1589_v55, 127.0  ;;  %v1532_v33 = vmul.f32 %v3627_v18, %v3516_v36  ;;  %v1534_v5 = vmul.f32 %v3627_v18, %v3521_v37 }
 0xbde   :  { %1656 = vmatprep.subr.bf16.mxu1 %v1641_v20  ;;  %v1626_v53 = vmin.f32 %v1594_v1, 127.0  ;;  %v2703_v9 = vround.rtne.f32 %v1529_v32  ;;  %v1591_v50 = vmax.f32 %v2701_v27, -128.0  ;;  %v1642_v4 = vpack.c.bf16 %v1617_v47, %v1615_v63 }
 0xbdf   :  { %v2706_v20 = vround.rtne.f32 %v1532_v33  ;;  %v1531_v14 = vmul.f32 %v3652_v31, %v3589_v57  ;;  %v1533_v51 = vmul.f32 %v3652_v31, %v3596_v52  ;;  %v1644_v10 = vpack.c.bf16 %v1621_v2, %v1619_v23 }
 0xbe0   :  { %v1647_v12 = vpack.c.bf16 %v1626_v53, %v1624_v22  ;;  %v1593_v29 = vmax.f32 %v2703_v9, -128.0  ;;  %v2708_v36 = vround.rtne.f32 %v1534_v5  ;;  %v1536_v37 = vmul.f32 %v3627_v18, %v3535_v39 }
 0xbe1   :  { %1657 = vmatpush1.bf16.msra.mxu1 %v1640_v30  ;;  %v1596_v15 = vmax.f32 %v2706_v20, -128.0  ;;  %v2705_v34 = vround.rtne.f32 %v1531_v14  ;;  %v2707_v35 = vround.rtne.f32 %v1533_v51  ;;  %v1623_v30 = vmin.f32 %v1591_v50, 127.0 }
 0xbe2   :  { %1658 = vmatprep.subr.bf16.mxu1 %v1643_v38  ;;  %v1598_v24 = vmax.f32 %v2708_v36, -128.0  ;;  %v1538_v11 = vmul.f32 %v3627_v18, %v3540_v40  ;;  %v1535_v57 = vmul.f32 %v3652_v31, %v3602_v59  ;;  %v1625_v52 = vmin.f32 %v1593_v29, 127.0 }
 0xbe3   :  { %v1595_v38 = vmax.f32 %v2705_v34, -128.0  ;;  %v1597_v42 = vmax.f32 %v2707_v35, -128.0  ;;  %v2710_v54 = vround.rtne.f32 %v1536_v37  ;;  %v1628_v56 = vmin.f32 %v1596_v15, 127.0 }
 0xbe4   :  { %v1630_v58 = vmin.f32 %v1598_v24, 127.0  ;;  %v2712_v41 = vround.rtne.f32 %v1538_v11  ;;  %v1537_v39 = vmul.f32 %v3652_v31, %v3610_v60  ;;  %v2709_v43 = vround.rtne.f32 %v1535_v57 }
 0xbe5   :  { %1659 = vmatpush1.bf16.msra.mxu1 %v1642_v4  ;;  %v1600_v28 = vmax.f32 %v2710_v54, -128.0  ;;  %v1646_v40 = vpack.c.bf16 %v1625_v52, %v1623_v30  ;;  %v1627_v18 = vmin.f32 %v1595_v38, 127.0  ;;  %v1629_v59 = vmin.f32 %v1597_v42, 127.0 }
 0xbe6   :  { %1660 = vmatprep.subr.bf16.mxu1 %v1645_v48  ;;  %v1602_v25 = vmax.f32 %v2712_v41, -128.0  ;;  %v2711_v61 = vround.rtne.f32 %v1537_v39  ;;  %v1599_v49 = vmax.f32 %v2709_v43, -128.0  ;;  %v2894_v62 = vmov 0  }
 0xbe7   :  { %1684 = vmatprep.mubr.bf16.mxu1 %v2894_v62  ;;  %v1649_v16 = vpack.c.bf16 %v1630_v58, %v1628_v56  ;;  %v1632_v63 = vmin.f32 %v1600_v28, 127.0  ;;  %v1648_v45 = vpack.c.bf16 %v1629_v59, %v1627_v18  ;;  %v1701_v18 = vld [vmem:[%s4054_s5] sm:$0x3] }
 0xbe8   :  { %v1634_v13 = vmin.f32 %v1602_v25, 127.0  ;;  %v1601_v21 = vmax.f32 %v2711_v61, -128.0  ;;  %v1631_v47 = vmin.f32 %v1599_v49, 127.0  ;;  %v1706_v49 = vrot.slane %v1701_v18, %v3261_v0 }
 0xbe9   :  { %1661 = vmatpush1.bf16.msra.mxu1 %v1644_v10 }
 0xbea   :  { %1662 = vmatprep.subr.bf16.mxu1 %v1647_v12  ;;  %v1633_v60 = vmin.f32 %v1601_v21, 127.0  ;;  %v1651_v31 = vpack.c.bf16 %v1634_v13, %v1632_v63  ;;  %v1710_v63 = vrot.slane %v1701_v18, %v3267_v7 }
 0xbec   :  { %v1650_v48 = vpack.c.bf16 %v1633_v60, %v1631_v47 }
 0xbed   :  { %1663 = vmatpush1.bf16.msra.mxu1 %v1646_v40 }
 0xbee   :  { %1664 = vmatprep.subr.bf16.mxu1 %v1649_v16 }
 0xbf1   :  { %1665 = vmatpush1.bf16.msra.mxu1 %v1648_v45 }
 0xbf2   :  { %1666 = vmatprep.subr.bf16.mxu1 %v1651_v31 }
 0xbf5   :  { %1667 = vmatpush1.bf16.msra.mxu1 %v1650_v48 }
 0xc47   :  { %v1346_v26 = vpop.xlane.xlu1 %1345 }
 0xc48   :  { %v1344_v55 = vpop.xlane.xlu0 %1343 }
 0xc49   :  { %v1347_v1 = vmin.f32 %v1344_v55, %v1346_v26 }
 0xc4b   :  { %v1348_v22 = vrot.slane %v1347_v1, 4  ;;  %v1357_v32 = vpop.xlane.xlu1 %1356 }
 0xc4c   :  { %v1355_v27 = vpop.xlane.xlu0 %1354 }
 0xc4d   :  { %v1349_v23 = vmin.f32 %v1347_v1, %v1348_v22  ;;  %v1358_v2 = vmax.f32 %v1355_v27, %v1357_v32 }
 0xc4f   :  { %v1350_v33 = vrot.slane %v1349_v23, 2  ;;  %v1359_v53 = vrot.slane %v1358_v2, 4 }
 0xc51   :  { %v1351_v9 = vmin.f32 %v1349_v23, %v1350_v33  ;;  %v1360_v50 = vmax.f32 %v1358_v2, %v1359_v53 }
 0xc53   :  { %v1361_v5 = vrot.slane %v1360_v50, 2  ;;  %v1352_v4 = vrot.slane %v1351_v9, 1 }
 0xc55   :  { %v1362_v20 = vmax.f32 %v1360_v50, %v1361_v5  ;;  %v1353_v51 = vmin.f32 %v1351_v9, %v1352_v4 }
 0xc57   :  { %v1363_v14 = vrot.slane %v1362_v20, 1 }
 0xc59   :  { %v1364_v10 = vmax.f32 %v1362_v20, %v1363_v14 }
 0xc5b   :  { %v1365_v12 = vsub.f32 %v1364_v10, %v1353_v51 }
 0xc5d   :  { %vm1366_vm13 = vcmp.ge.f32.partialorder %v1365_v12, 1e-08  ;;  %v1367_v29 = vmul.f32 0.003921569, %v1365_v12 }
 0xc5f   :  { %v1368_v36 = vsel %vm1366_vm13, %v1367_v29, 1.0 }
 0xc60   :  { %2808 = vrcp.f32 %v1368_v36  ;;  %v1695_v59 = vmul.f32 %v1501_v19, %v1368_v36  ;;  %v1696_v16 = vmul.f32 %v1502_v8, %v1368_v36 }
 0xc6a   :  { %v2809_v15 = vpop.eup %2808 }
 0xc6b   :  { %v1370_v34 = vmul.f32 %v2809_v15, %v1353_v51  ;;  %v1376_v11 = vmul.f32 %v2809_v15, %v3565_v46  ;;  %v1377_v57 = vmul.f32 %v2809_v15, %v3556_v44 }
 0xc6d   :  { %v2678_v35 = vround.rtne.f32 %v1370_v34 }
 0xc6f   :  { %v1372_v37 = vsub.f32 0.0, %v2678_v35 }
 0xc71   :  { %v1373_v30 = vmax.f32 %v1372_v37, 0.0 }
 0xc73   :  { %v1374_v24 = vmin.f32 %v1373_v30, 255.0 }
 0xc75   :  { %v1378_v52 = vadd.f32 %v1376_v11, %v1374_v24  ;;  %v1379_v38 = vadd.f32 %v1377_v57, %v1374_v24 }
 0xc77   :  { %v2679_v42 = vround.rtne.f32 %v1378_v52  ;;  %v2680_v54 = vround.rtne.f32 %v1379_v38 }
 0xc79   :  { %v1382_v56 = vmax.f32 %v2679_v42, 0.0  ;;  %v1383_v58 = vmax.f32 %v2680_v54, 0.0 }
 0xc7b   :  { %v1384_v41 = vmin.f32 %v1382_v56, 255.0  ;;  %v1385_v39 = vmin.f32 %v1383_v58, 255.0 }
 0xc7d   :  { %v1386_v28 = vsub.f32 %v1384_v41, %v1374_v24  ;;  %v1387_v43 = vsub.f32 %v1385_v39, %v1374_v24 }
 0xc7f   :  { %v1390_v25 = vsel %vm1366_vm13, %v1386_v28, %v3565_v46  ;;  %v1391_v61 = vsel %vm1366_vm13, %v1387_v43, %v3556_v44 }
 0xc80   :  { %v1635_v40 = vpack.c.bf16 %v1391_v61, %v1390_v25 }
 0xc82   :  { %1685 = vmatmul.mubr.bf16.vlgmr.msra.gmra.mrb[16].mxu1 %v1635_v40 }
 0xd55   :  { %v1686_v62 = vpop.f32.mrb[16].mxu1 }
 0xd56   :  { %v1697_v13 = vmul.f32 %v1695_v59, %v1686_v62  ;;  %v1688_v21 = vpop.f32.mrb[17].mxu1 }
 0xd57   :  { %v1698_v45 = vmul.f32 %v1696_v16, %v1688_v21  ;;  %v1690_v47 = vpop.f32.mrb[18].mxu1 }
 0xd58   :  { %v3714_v60 = vadd.f32 %v1706_v49, %v1697_v13  ;;  %v1699_v31 = vmul.f32 %v1695_v59, %v1690_v47  ;;  %v1692_v48 = vpop.f32.mrb[19].mxu1 }
 0xd59   :  { %v3716_v26 = vadd.f32 %v1710_v63, %v1698_v45  ;;  %v1700_v17 = vmul.f32 %v1696_v16, %v1692_v48 }
 0xd5a   :  { %v3718_v19 = vadd.f32 %v1706_v49, %v1699_v31 }
 0xd5b   :  { %v3720_v0 = vadd.f32 %v1710_v63, %v1700_v17  ;;  %v1717_v6 = vmin.f32 %v3714_v60, %v3716_v26  ;;  %v1730_v8 = vmax.f32 %v3714_v60, %v3716_v26 }
 0xd5d   :  { %1718 = vmin.xlane.f32.xlu0 %v1717_v6  ;;  %v1720_v7 = vmin.f32 %v3718_v19, %v3720_v0  ;;  %v1733_v55 = vmax.f32 %v3718_v19, %v3720_v0 }
 0xd5f   :  { %1721 = vmin.xlane.f32.xlu1 %v1720_v7 }
 0xd61   :  { %1731 = vmax.xlane.f32.xlu0 %v1730_v8 }
 0xd63   :  { %1734 = vmax.xlane.f32.xlu1 %v1733_v55 }
 0xdea   :  { %v1719_v1 = vpop.xlane.xlu0 %1718 }
 0xdec   :  { %v1722_v22 = vpop.xlane.xlu1 %1721 }
 0xded   :  { %v1723_v32 = vmin.f32 %v1719_v1, %v1722_v22 }
 0xdee   :  { %v1732_v23 = vpop.xlane.xlu0 %1731 }
 0xdef   :  { %v1724_v27 = vrot.slane %v1723_v32, 4 }
 0xdf0   :  { %v1735_v2 = vpop.xlane.xlu1 %1734 }
 0xdf1   :  { %v1725_v33 = vmin.f32 %v1723_v32, %v1724_v27  ;;  %v1736_v53 = vmax.f32 %v1732_v23, %v1735_v2 }
 0xdf3   :  { %v1726_v9 = vrot.slane %v1725_v33, 2  ;;  %v1737_v50 = vrot.slane %v1736_v53, 4 }
 0xdf5   :  { %v1727_v5 = vmin.f32 %v1725_v33, %v1726_v9  ;;  %v1738_v4 = vmax.f32 %v1736_v53, %v1737_v50 }
 0xdf7   :  { %v1739_v20 = vrot.slane %v1738_v4, 2  ;;  %v1728_v14 = vrot.slane %v1727_v5, 1 }
 0xdf9   :  { %v1740_v51 = vmax.f32 %v1738_v4, %v1739_v20  ;;  %v1729_v12 = vmin.f32 %v1727_v5, %v1728_v14 }
 0xdfb   :  { %v1741_v10 = vrot.slane %v1740_v51, 1 }
 0xdfd   :  { %v1742_v29 = vmax.f32 %v1740_v51, %v1741_v10 }
 0xdff   :  { %v1743_v36 = vsub.f32 %v1742_v29, %v1729_v12 }
 0xe01   :  { %vm1744_vm14 = vcmp.ge.f32.partialorder %v1743_v36, 1e-08  ;;  %v1745_v15 = vmul.f32 0.003921569, %v1743_v36  ;;  %v3746_v36 = vld [vmem:[%s4055_s6] sm:$0xff] }
 0xe03   :  { %v1746_v34 = vsel %vm1744_vm14, %v1745_v15, 1.0  ;;  %v3751_v15 = vld [vmem:[%s4055_s6 + $0x8] sm:$0xff] }
 0xe04   :  { %2810 = vrcp.f32 %v1746_v34 }
 0xe0e   :  { %v2811_v35 = vpop.eup %2810 }
 0xe0f   :  { %v1748_v37 = vmul.f32 %v2811_v35, %v1729_v12  ;;  %v1754_v57 = vmul.f32 %v2811_v35, %v3714_v60  ;;  %v1755_v38 = vmul.f32 %v2811_v35, %v3716_v26  ;;  %v1756_v42 = vmul.f32 %v2811_v35, %v3718_v19 }
 0xe10   :  { %v1757_v54 = vmul.f32 %v2811_v35, %v3720_v0  ;;  %v3761_v35 = vld [vmem:[%s4055_s6 + $0x20] sm:$0xff] }
 0xe11   :  { %v2713_v30 = vround.rtne.f32 %v1748_v37  ;;  %v3766_v37 = vld [vmem:[%s4055_s6 + $0x28] sm:$0xff]  ;;  %2875 = vmaxabs.init.f32.vacc2 %v3746_v36, %v3761_v35 }
 0xe13   :  { %v1750_v24 = vsub.f32 0.0, %v2713_v30  ;;  %v3771_v30 = vld [vmem:[%s4055_s6 + $0x18] sm:$0xff]  ;;  %2876 = vmaxabs.f32.vacc2 %v3751_v15, %v3766_v37 }
 0xe15   :  { %v1751_v11 = vmax.f32 %v1750_v24, 0.0  ;;  %v3776_v24 = vld [vmem:[%s4055_s6 + $0x30] sm:$0xff] }
 0xe17   :  { %v1752_v52 = vmin.f32 %v1751_v11, 255.0  ;;  %v3781_v11 = vld [vmem:[%s4055_s6 + $0x38] sm:$0xff] }
 0xe19   :  { %v1758_v56 = vadd.f32 %v1754_v57, %v1752_v52  ;;  %v1759_v58 = vadd.f32 %v1755_v38, %v1752_v52  ;;  %v1760_v41 = vadd.f32 %v1756_v42, %v1752_v52  ;;  %v1761_v39 = vadd.f32 %v1757_v54, %v1752_v52  ;;  %v3786_v57 = vld [vmem:[%s4055_s6 + $0x40] sm:$0xff]  ;;  %v3796_v38 = vld [vmem:[%s4055_s6 + $0x50] sm:$0xff]  ;;  %v3801_v42 = vld [vmem:[%s4055_s6 + $0x58] sm:$0xff] }
 0xe1b   :  { %v2714_v28 = vround.rtne.f32 %v1758_v56  ;;  %v2715_v43 = vround.rtne.f32 %v1759_v58  ;;  %v2716_v25 = vround.rtne.f32 %v1760_v41  ;;  %v2717_v61 = vround.rtne.f32 %v1761_v39  ;;  %v3808_v39 = vld [vmem:[%s4055_s6 + $0x60] sm:$0xff] }
 0xe1d   :  { %v1766_v40 = vmax.f32 %v2714_v28, 0.0  ;;  %v1767_v18 = vmax.f32 %v2715_v43, 0.0  ;;  %v1768_v59 = vmax.f32 %v2716_v25, 0.0  ;;  %v1769_v49 = vmax.f32 %v2717_v61, 0.0 }
 0xe1f   :  { %v1770_v62 = vmin.f32 %v1766_v40, 255.0  ;;  %v1771_v16 = vmin.f32 %v1767_v18, 255.0  ;;  %v1772_v63 = vmin.f32 %v1768_v59, 255.0  ;;  %v1773_v13 = vmin.f32 %v1769_v49, 255.0  ;;  %v3817_v40 = vld [vmem:[%s4055_s6 + $0x68] sm:$0xff] }
 0xe21   :  { %v1774_v21 = vsub.f32 %v1770_v62, %v1752_v52  ;;  %v1775_v45 = vsub.f32 %v1771_v16, %v1752_v52  ;;  %v1776_v47 = vsub.f32 %v1772_v63, %v1752_v52  ;;  %v1777_v31 = vsub.f32 %v1773_v13, %v1752_v52  ;;  %v3791_v52 = vld [vmem:[%s4055_s6 + $0x48] sm:$0xff]  ;;  %v3826_v62 = vld [vmem:[%s4055_s6 + $0x70] sm:$0xff] }
 0xe23   :  { %v1780_v48 = vsel %vm1744_vm14, %v1774_v21, %v3714_v60  ;;  %v1781_v17 = vsel %vm1744_vm14, %v1775_v45, %v3716_v26  ;;  %v1782_v6 = vsel %vm1744_vm14, %v1776_v47, %v3718_v19  ;;  %v1783_v7 = vsel %vm1744_vm14, %v1777_v31, %v3720_v0  ;;  %v3833_v21 = vld [vmem:[%s4055_s6 + $0x78] sm:$0xff]  ;;  %v1907_v45 = vld [vmem:[%s4055_s6 + $0x80] sm:$0xff]  ;;  %v1908_v31 = vld [vmem:[%s4055_s6 + $0x88] sm:$0xff] }
 0xe24   :  { %v1784_v8 = vmul.f32 %v1780_v48, %v1746_v34  ;;  %v1785_v55 = vmul.f32 %v1781_v17, %v1746_v34  ;;  %v1786_v1 = vmul.f32 %v1782_v6, %v1746_v34  ;;  %v1787_v22 = vmul.f32 %v1783_v7, %v1746_v34  ;;  %v3756_v34 = vld [vmem:[%s4055_s6 + $0x10] sm:$0xff]  ;;  %v1910_v7 = vld [vmem:[%s4055_s6 + $0x98] sm:$0xff] }
 0xe25   :  { %2877 = vmaxabs.f32.vacc2 %v3756_v34, %v3776_v24  ;;  %v1909_v48 = vld [vmem:[%s4055_s6 + $0x90] sm:$0xff] }
 0xe26   :  { %v1794_v32 = vmul.f32 0.044715, %v1786_v1  ;;  %v1795_v27 = vmul.f32 0.044715, %v1787_v22  ;;  %v1792_v23 = vmul.f32 0.044715, %v1784_v8 }
 0xe27   :  { %v1793_v2 = vmul.f32 0.044715, %v1785_v55  ;;  %v1790_v56 = vmul.f32 0.5, %v1786_v1  ;;  %v1791_v58 = vmul.f32 0.5, %v1787_v22  ;;  %v1788_v41 = vmul.f32 0.5, %v1784_v8 }
 0xe28   :  { %v1798_v33 = vmul.f32 %v1794_v32, %v1786_v1  ;;  %v1799_v53 = vmul.f32 %v1795_v27, %v1787_v22  ;;  %v1796_v60 = vmul.f32 %v1792_v23, %v1784_v8  ;;  %2878 = vmaxabs.f32.vacc2 %v3771_v30, %v3781_v11  ;;  %v3877_v32 = vld [vmem:[%s4055_s6 + $0xb8] sm:$0xff]  ;;  %v3882_v27 = vld [vmem:[%s4055_s6 + $0xc0] sm:$0xff] }
 0xe29   :  { %v1797_v9 = vmul.f32 %v1793_v2, %v1785_v55  ;;  %v1789_v63 = vmul.f32 0.5, %v1785_v55  ;;  %v3889_v2 = vld [vmem:[%s4055_s6 + $0xc8] sm:$0xff] }
 0xe2a   :  { %v1802_v50 = vmul.f32 %v1798_v33, %v1786_v1  ;;  %v1803_v26 = vmul.f32 %v1799_v53, %v1787_v22  ;;  %v1800_v5 = vmul.f32 %v1796_v60, %v1784_v8  ;;  %2879 = vmaxabs.f32.vacc2 %v3786_v57, %v3791_v52  ;;  %v3894_v33 = vld [vmem:[%s4055_s6 + $0xd0] sm:$0xff]  ;;  %v3903_v60 = vld [vmem:[%s4055_s6 + $0xd8] sm:$0xff] }
 0xe2b   :  { %v1801_v4 = vmul.f32 %v1797_v9, %v1785_v55  ;;  %v3908_v9 = vld [vmem:[%s4055_s6 + $0xe0] sm:$0xff] }
 0xe2c   :  { %v1806_v19 = vadd.f32 %v1802_v50, %v1786_v1  ;;  %v1807_v20 = vadd.f32 %v1803_v26, %v1787_v22  ;;  %v1804_v14 = vadd.f32 %v1800_v5, %v1784_v8  ;;  %v3858_v8 = vld [vmem:[%s4055_s6 + $0xa0] sm:$0xff]  ;;  %v3868_v1 = vld [vmem:[%s4055_s6 + $0xb0] sm:$0xff]  ;;  %2880 = vmaxabs.f32.vacc2 %v3796_v38, %v3801_v42  ;;  %v3913_v50 = vld [vmem:[%s4055_s6 + $0xe8] sm:$0xff] }
 0xe2d   :  { %v1805_v0 = vadd.f32 %v1801_v4, %v1785_v55  ;;  %v3863_v55 = vld [vmem:[%s4055_s6 + $0xa8] sm:$0xff]  ;;  %v3918_v26 = vld [vmem:[%s4055_s6 + $0xf0] sm:$0xff]  ;;  %v3925_v5 = vld [vmem:[%s4055_s6 + $0xf8] sm:$0xff] }
 0xe2e   :  { %v1810_v51 = vmul.f32 0.7978846, %v1806_v19  ;;  %v1811_v10 = vmul.f32 0.7978846, %v1807_v20  ;;  %v1808_v12 = vmul.f32 0.7978846, %v1804_v14  ;;  %2881 = vmaxabs.f32.vacc2 %v3808_v39, %v3817_v40 }
 0xe2f   :  { %v1809_v29 = vmul.f32 0.7978846, %v1805_v0 }
 0xe30   :  { %2812 = vtanh.f32 %v1810_v51  ;;  %2882 = vmaxabs.f32.vacc2 %v3826_v62, %v3833_v21 }
 0xe31   :  { %2814 = vtanh.f32 %v1811_v10 }
 0xe32   :  { %2816 = vtanh.f32 %v1808_v12  ;;  %2883 = vmaxabs.f32.vacc2 %v1907_v45, %v1908_v31 }
 0xe33   :  { %2818 = vtanh.f32 %v1809_v29 }
 0xe34   :  { %2884 = vmaxabs.f32.vacc2 %v1909_v48, %v1910_v7 }
 0xe36   :  { %2885 = vmaxabs.f32.vacc2 %v3858_v8, %v3863_v55 }
 0xe38   :  { %2886 = vmaxabs.f32.vacc2 %v3868_v1, %v3877_v32 }
 0xe3a   :  { %v2813_v54 = vpop.eup %2812  ;;  %2887 = vmaxabs.f32.vacc2 %v3882_v27, %v3889_v2 }
 0xe3b   :  { %v2815_v28 = vpop.eup %2814  ;;  %v1818_v43 = vadd.f32 1.0, %v2813_v54 }
 0xe3c   :  { %v2817_v25 = vpop.eup %2816  ;;  %v1819_v61 = vadd.f32 1.0, %v2815_v28  ;;  %2888 = vmaxabs.f32.vacc2 %v3894_v33, %v3903_v60 }
 0xe3d   :  { %v2819_v18 = vpop.eup %2818  ;;  %v3821_v59 = vmul.f32 %v1818_v43, %v1790_v56  ;;  %v1816_v49 = vadd.f32 1.0, %v2817_v25 }
 0xe3e   :  { %v3828_v16 = vmul.f32 %v1819_v61, %v1791_v58  ;;  %v1817_v13 = vadd.f32 1.0, %v2819_v18  ;;  %2889 = vmaxabs.f32.vacc2 %v3908_v9, %v3913_v50 }
 0xe3f   :  { %v3838_v47 = vmul.f32 %v1816_v49, %v1788_v41 }
 0xe40   :  { %v1827_v17 = vmin.f32 %v3821_v59, %v3828_v16  ;;  %v3850_v6 = vmul.f32 %v1817_v13, %v1789_v63  ;;  %v1840_v23 = vmax.f32 %v3821_v59, %v3828_v16  ;;  %2890 = vmaxabs.f32.vacc2 %v3918_v26, %v3925_v5 }
 0xe42   :  { %1828 = vmin.xlane.f32.xlu1 %v1827_v17  ;;  %v1824_v22 = vmin.f32 %v3838_v47, %v3850_v6  ;;  %v1837_v53 = vmax.f32 %v3838_v47, %v3850_v6  ;;  %v2891_v4 = vmovacc.low.even.vacc2 }
 0xe44   :  { %1825 = vmin.xlane.f32.xlu0 %v1824_v22  ;;  %v1986_v19 = vrot.slane %v2891_v4, 4 }
 0xe46   :  { %1841 = vmax.xlane.f32.xlu1 %v1840_v23  ;;  %v1987_v20 = vmax.f32 %v2891_v4, %v1986_v19 }
 0xe48   :  { %1838 = vmax.xlane.f32.xlu0 %v1837_v53  ;;  %v1988_v14 = vrot.slane %v1987_v20, 2 }
 0xe4a   :  { %v1989_v0 = vmax.f32 %v1987_v20, %v1988_v14 }
 0xe4c   :  { %v1990_v51 = vrot.slane %v1989_v0, 1 }
 0xe4e   :  { %v1991_v10 = vmax.f32 %v1989_v0, %v1990_v51 }
 0xe50   :  { %v3939_v12 = vmul.f32 0.007874016, %v1991_v10 }
 0xe52   :  { %v1993_v29 = vmax.f32 %v3939_v12, 1e-08 }
 0xe54   :  { %2820 = vrcp.f32 %v1993_v29 }
 0xe5e   :  { %v3944_v54 = vpop.eup %2820 }
 0xe5f   :  { %v2012_v56 = vmul.f32 %v3944_v54, %v1907_v45  ;;  %v2013_v58 = vmul.f32 %v3944_v54, %v1908_v31  ;;  %v1996_v41 = vmul.f32 %v3944_v54, %v3746_v36  ;;  %v1997_v28 = vmul.f32 %v3944_v54, %v3751_v15 }
 0xe60   :  { %v2014_v43 = vmul.f32 %v3944_v54, %v1909_v48  ;;  %v2015_v25 = vmul.f32 %v3944_v54, %v1910_v7  ;;  %v1998_v61 = vmul.f32 %v3944_v54, %v3756_v34  ;;  %v1999_v18 = vmul.f32 %v3944_v54, %v3771_v30 }
 0xe61   :  { %v2739_v49 = vround.rtne.f32 %v2012_v56  ;;  %v2740_v63 = vround.rtne.f32 %v2013_v58  ;;  %v2723_v13 = vround.rtne.f32 %v1996_v41  ;;  %v2724_v45 = vround.rtne.f32 %v1997_v28 }
 0xe62   :  { %v2741_v31 = vround.rtne.f32 %v2014_v43  ;;  %v2742_v17 = vround.rtne.f32 %v2015_v25  ;;  %v2725_v36 = vround.rtne.f32 %v1998_v61  ;;  %v2726_v22 = vround.rtne.f32 %v1999_v18 }
 0xe63   :  { %v2076_v23 = vmax.f32 %v2739_v49, -128.0  ;;  %v2077_v15 = vmax.f32 %v2740_v63, -128.0  ;;  %v2060_v53 = vmax.f32 %v2723_v13, -128.0  ;;  %v2061_v48 = vmax.f32 %v2724_v45, -128.0 }
 0xe64   :  { %v2078_v4 = vmax.f32 %v2741_v31, -128.0  ;;  %v2079_v7 = vmax.f32 %v2742_v17, -128.0  ;;  %v2062_v19 = vmax.f32 %v2725_v36, -128.0  ;;  %v2063_v20 = vmax.f32 %v2726_v22, -128.0 }
 0xe65   :  { %v2108_v34 = vmin.f32 %v2076_v23, 127.0  ;;  %v2109_v14 = vmin.f32 %v2077_v15, 127.0  ;;  %v2092_v0 = vmin.f32 %v2060_v53, 127.0  ;;  %v2093_v30 = vmin.f32 %v2061_v48, 127.0 }
 0xe66   :  { %v2110_v51 = vmin.f32 %v2078_v4, 127.0  ;;  %v2111_v10 = vmin.f32 %v2079_v7, 127.0  ;;  %v2094_v56 = vmin.f32 %v2062_v19, 127.0  ;;  %v2095_v58 = vmin.f32 %v2063_v20, 127.0 }
 0xe67   :  { %v2134_v41 = vpack.c.bf16 %v2109_v14, %v2108_v34  ;;  %v2126_v28 = vpack.c.bf16 %v2093_v30, %v2092_v0  ;;  %v2016_v43 = vmul.f32 %v3944_v54, %v3858_v8  ;;  %v2017_v25 = vmul.f32 %v3944_v54, %v3863_v55 }
 0xe68   :  { %v2135_v61 = vpack.c.bf16 %v2111_v10, %v2110_v51  ;;  %v2127_v18 = vpack.c.bf16 %v2095_v58, %v2094_v56  ;;  %v2000_v49 = vmul.f32 %v3944_v54, %v3761_v35  ;;  %v2001_v63 = vmul.f32 %v3944_v54, %v3766_v37 }
 0xe69   :  { %2393 = vmatprep.subr.bf16.mxu0 %v2134_v41  ;;  %v2743_v13 = vround.rtne.f32 %v2016_v43  ;;  %v2744_v45 = vround.rtne.f32 %v2017_v25  ;;  %v2018_v31 = vmul.f32 %v3944_v54, %v3868_v1  ;;  %v2019_v8 = vmul.f32 %v3944_v54, %v3877_v32 }
 0xe6a   :  { %2394 = vmatpush3.bf16.msra.mxu0 %v2126_v28  ;;  %v2727_v17 = vround.rtne.f32 %v2000_v49  ;;  %v2728_v55 = vround.rtne.f32 %v2001_v63  ;;  %v2002_v36 = vmul.f32 %v3944_v54, %v3776_v24  ;;  %v2003_v35 = vmul.f32 %v3944_v54, %v3781_v11 }
 0xe6b   :  { %2395 = vmatprep.subr.bf16.mxu0 %v2135_v61  ;;  %v2080_v37 = vmax.f32 %v2743_v13, -128.0  ;;  %v2081_v22 = vmax.f32 %v2744_v45, -128.0  ;;  %v2745_v23 = vround.rtne.f32 %v2018_v31  ;;  %v2746_v15 = vround.rtne.f32 %v2019_v8 }
 0xe6c   :  { %v2064_v53 = vmax.f32 %v2727_v17, -128.0  ;;  %v2065_v48 = vmax.f32 %v2728_v55, -128.0  ;;  %v2729_v1 = vround.rtne.f32 %v2002_v36  ;;  %v2730_v4 = vround.rtne.f32 %v2003_v35 }
 0xe6d   :  { %v2112_v7 = vmin.f32 %v2080_v37, 127.0  ;;  %v2113_v32 = vmin.f32 %v2081_v22, 127.0  ;;  %v2082_v19 = vmax.f32 %v2745_v23, -128.0  ;;  %v2083_v20 = vmax.f32 %v2746_v15, -128.0 }
 0xe6e   :  { %2396 = vmatpush3.bf16.msra.mxu0 %v2127_v18  ;;  %v2096_v34 = vmin.f32 %v2064_v53, 127.0  ;;  %v2097_v14 = vmin.f32 %v2065_v48, 127.0  ;;  %v2066_v24 = vmax.f32 %v2729_v1, -128.0  ;;  %v2067_v0 = vmax.f32 %v2730_v4, -128.0 }
 0xe6f   :  { %v2136_v30 = vpack.c.bf16 %v2113_v32, %v2112_v7  ;;  %v2114_v11 = vmin.f32 %v2082_v19, 127.0  ;;  %v2115_v51 = vmin.f32 %v2083_v20, 127.0  ;;  %v2020_v10 = vmul.f32 %v3944_v54, %v3882_v27 }
 0xe70   :  { %v2128_v56 = vpack.c.bf16 %v2097_v14, %v2096_v34  ;;  %v2098_v58 = vmin.f32 %v2066_v24, 127.0  ;;  %v2099_v41 = vmin.f32 %v2067_v0, 127.0  ;;  %v2021_v28 = vmul.f32 %v3944_v54, %v3889_v2 }
 0xe71   :  { %2397 = vmatprep.subr.bf16.mxu0 %v2136_v30  ;;  %v2137_v43 = vpack.c.bf16 %v2115_v51, %v2114_v11  ;;  %v2747_v25 = vround.rtne.f32 %v2020_v10  ;;  %v2004_v61 = vmul.f32 %v3944_v54, %v3786_v57  ;;  %v2005_v18 = vmul.f32 %v3944_v54, %v3791_v52 }
 0xe72   :  { %2398 = vmatpush3.bf16.msra.mxu0 %v2128_v56  ;;  %v2129_v49 = vpack.c.bf16 %v2099_v41, %v2098_v58  ;;  %v2748_v63 = vround.rtne.f32 %v2021_v28  ;;  %v2022_v27 = vmul.f32 %v3944_v54, %v3894_v33  ;;  %v2023_v13 = vmul.f32 %v3944_v54, %v3903_v60 }
 0xe73   :  { %2399 = vmatprep.subr.bf16.mxu0 %v2137_v43  ;;  %v2084_v2 = vmax.f32 %v2747_v25, -128.0  ;;  %v2731_v45 = vround.rtne.f32 %v2004_v61  ;;  %v2732_v31 = vround.rtne.f32 %v2005_v18  ;;  %v2006_v8 = vmul.f32 %v3944_v54, %v3796_v38 }
 0xe74   :  { %v2085_v57 = vmax.f32 %v2748_v63, -128.0  ;;  %v2749_v17 = vround.rtne.f32 %v2022_v27  ;;  %v2750_v55 = vround.rtne.f32 %v2023_v13  ;;  %v2007_v52 = vmul.f32 %v3944_v54, %v3801_v42 }
 0xe75   :  { %v2116_v36 = vmin.f32 %v2084_v2, 127.0  ;;  %v2068_v35 = vmax.f32 %v2731_v45, -128.0  ;;  %v2069_v37 = vmax.f32 %v2732_v31, -128.0  ;;  %v2733_v33 = vround.rtne.f32 %v2006_v8 }
 0xe76   :  { %2400 = vmatpush3.bf16.msra.mxu0 %v2129_v49  ;;  %v2117_v22 = vmin.f32 %v2085_v57, 127.0  ;;  %v2086_v60 = vmax.f32 %v2749_v17, -128.0  ;;  %v2087_v23 = vmax.f32 %v2750_v55, -128.0  ;;  %v2734_v15 = vround.rtne.f32 %v2007_v52 }
 0xe77   :  { %v2100_v53 = vmin.f32 %v2068_v35, 127.0  ;;  %v2101_v48 = vmin.f32 %v2069_v37, 127.0  ;;  %v2070_v1 = vmax.f32 %v2733_v33, -128.0  ;;  %v2024_v38 = vmul.f32 %v3944_v54, %v3908_v9 }
 0xe78   :  { %v2138_v4 = vpack.c.bf16 %v2117_v22, %v2116_v36  ;;  %v2118_v7 = vmin.f32 %v2086_v60, 127.0  ;;  %v2119_v32 = vmin.f32 %v2087_v23, 127.0  ;;  %v2071_v19 = vmax.f32 %v2734_v15, -128.0 }
 0xe79   :  { %v2130_v42 = vpack.c.bf16 %v2101_v48, %v2100_v53  ;;  %v2102_v20 = vmin.f32 %v2070_v1, 127.0  ;;  %v2025_v34 = vmul.f32 %v3944_v54, %v3913_v50  ;;  %v2751_v14 = vround.rtne.f32 %v2024_v38 }
 0xe7a   :  { %2401 = vmatprep.subr.bf16.mxu0 %v2138_v4  ;;  %v2139_v24 = vpack.c.bf16 %v2119_v32, %v2118_v7  ;;  %v2103_v0 = vmin.f32 %v2071_v19, 127.0  ;;  %v2008_v30 = vmul.f32 %v3944_v54, %v3808_v39  ;;  %v2009_v11 = vmul.f32 %v3944_v54, %v3817_v40 }
 0xe7b   :  { %2402 = vmatpush3.bf16.msra.mxu0 %v2130_v42  ;;  %v2752_v9 = vround.rtne.f32 %v2025_v34  ;;  %v2088_v51 = vmax.f32 %v2751_v14, -128.0  ;;  %v2026_v10 = vmul.f32 %v3944_v54, %v3918_v26  ;;  %v2027_v56 = vmul.f32 %v3944_v54, %v3925_v5 }
 0xe7c   :  { %2403 = vmatprep.subr.bf16.mxu0 %v2139_v24  ;;  %v2131_v50 = vpack.c.bf16 %v2103_v0, %v2102_v20  ;;  %v2735_v58 = vround.rtne.f32 %v2008_v30  ;;  %v2736_v41 = vround.rtne.f32 %v2009_v11  ;;  %v2010_v28 = vmul.f32 %v3944_v54, %v3826_v62 }
 0xe7d   :  { %v2089_v39 = vmax.f32 %v2752_v9, -128.0  ;;  %v2120_v43 = vmin.f32 %v2088_v51, 127.0  ;;  %v2753_v25 = vround.rtne.f32 %v2026_v10  ;;  %v2754_v40 = vround.rtne.f32 %v2027_v56 }
 0xe7e   :  { %v2072_v61 = vmax.f32 %v2735_v58, -128.0  ;;  %v2073_v18 = vmax.f32 %v2736_v41, -128.0  ;;  %v2011_v49 = vmul.f32 %v3944_v54, %v3833_v21  ;;  %v2737_v26 = vround.rtne.f32 %v2010_v28 }
 0xe7f   :  { %2404 = vmatpush3.bf16.msra.mxu0 %v2131_v50  ;;  %v2121_v63 = vmin.f32 %v2089_v39, 127.0  ;;  %v2090_v5 = vmax.f32 %v2753_v25, -128.0  ;;  %v2091_v27 = vmax.f32 %v2754_v40, -128.0 }
 0xe80   :  { %v2104_v13 = vmin.f32 %v2072_v61, 127.0  ;;  %v2105_v2 = vmin.f32 %v2073_v18, 127.0  ;;  %v2738_v45 = vround.rtne.f32 %v2011_v49  ;;  %v2074_v31 = vmax.f32 %v2737_v26, -128.0 }
 0xe81   :  { %v2140_v8 = vpack.c.bf16 %v2121_v63, %v2120_v43  ;;  %v2122_v62 = vmin.f32 %v2090_v5, 127.0  ;;  %v2123_v57 = vmin.f32 %v2091_v27, 127.0 }
 0xe82   :  { %v2132_v17 = vpack.c.bf16 %v2105_v2, %v2104_v13  ;;  %v2075_v55 = vmax.f32 %v2738_v45, -128.0  ;;  %v2106_v52 = vmin.f32 %v2074_v31, 127.0 }
 0xe83   :  { %2405 = vmatprep.subr.bf16.mxu0 %v2140_v8  ;;  %v2141_v36 = vpack.c.bf16 %v2123_v57, %v2122_v62 }
 0xe84   :  { %2406 = vmatpush3.bf16.msra.mxu0 %v2132_v17  ;;  %v2107_v35 = vmin.f32 %v2075_v55, 127.0 }
 0xe85   :  { %2407 = vmatprep.subr.bf16.mxu0 %v2141_v36 }
 0xe86   :  { %v2133_v21 = vpack.c.bf16 %v2107_v35, %v2106_v52 }
 0xe88   :  { %2408 = vmatpush3.bf16.msra.mxu0 %v2133_v21 }
 0xecf   :  { %v1829_v54 = vpop.xlane.xlu1 %1828 }
 0xed1   :  { %v1826_v37 = vpop.xlane.xlu0 %1825 }
 0xed2   :  { %v1830_v33 = vmin.f32 %v1826_v37, %v1829_v54 }
 0xed3   :  { %v1842_v22 = vpop.xlane.xlu1 %1841 }
 0xed4   :  { %v1831_v60 = vrot.slane %v1830_v33, 4 }
 0xed5   :  { %v1839_v23 = vpop.xlane.xlu0 %1838 }
 0xed6   :  { %v1832_v15 = vmin.f32 %v1830_v33, %v1831_v60  ;;  %v1843_v53 = vmax.f32 %v1839_v23, %v1842_v22  ;;  %v2188_v33 = vsub.s32 3, %v3256_v3 }
 0xed8   :  { %v1833_v48 = vrot.slane %v1832_v15, 2  ;;  %v1844_v1 = vrot.slane %v1843_v53, 4 }
 0xeda   :  { %v1834_v38 = vmin.f32 %v1832_v15, %v1833_v48  ;;  %v1845_v4 = vmax.f32 %v1843_v53, %v1844_v1 }
 0xedc   :  { %v1846_v7 = vrot.slane %v1845_v4, 2  ;;  %v1835_v32 = vrot.slane %v1834_v38, 1 }
 0xede   :  { %v1847_v19 = vmax.f32 %v1845_v4, %v1846_v7  ;;  %v1836_v20 = vmin.f32 %v1834_v38, %v1835_v32 }
 0xee0   :  { %v1848_v42 = vrot.slane %v1847_v19, 1 }
 0xee2   :  { %v1849_v34 = vmax.f32 %v1847_v19, %v1848_v42 }
 0xee4   :  { %v1850_v14 = vsub.f32 %v1849_v34, %v1836_v20 }
 0xee6   :  { %vm1851_vm15 = vcmp.ge.f32.partialorder %v1850_v14, 1e-08  ;;  %v1852_v24 = vmul.f32 0.003921569, %v1850_v14 }
 0xee8   :  { %v1853_v0 = vsel %vm1851_vm15, %v1852_v24, 1.0 }
 0xee9   :  { %2822 = vrcp.f32 %v1853_v0 }
 0xef3   :  { %v2823_v30 = vpop.eup %2822 }
 0xef4   :  { %v1855_v11 = vmul.f32 %v2823_v30, %v1836_v20  ;;  %v1862_v56 = vmul.f32 %v2823_v30, %v3850_v6  ;;  %v1864_v58 = vmul.f32 %v2823_v30, %v3828_v16  ;;  %v1861_v41 = vmul.f32 %v2823_v30, %v3838_v47 }
 0xef5   :  { %v1863_v28 = vmul.f32 %v2823_v30, %v3821_v59 }
 0xef6   :  { %v2718_v9 = vround.rtne.f32 %v1855_v11 }
 0xef8   :  { %v1857_v51 = vsub.f32 0.0, %v2718_v9 }
 0xefa   :  { %v1858_v10 = vmax.f32 %v1857_v51, 0.0 }
 0xefc   :  { %v1859_v50 = vmin.f32 %v1858_v10, 255.0 }
 0xefe   :  { %v1866_v39 = vadd.f32 %v1862_v56, %v1859_v50  ;;  %v1868_v43 = vadd.f32 %v1864_v58, %v1859_v50  ;;  %v1865_v25 = vadd.f32 %v1861_v41, %v1859_v50  ;;  %v1867_v40 = vadd.f32 %v1863_v28, %v1859_v50 }
 0xf00   :  { %v2720_v61 = vround.rtne.f32 %v1866_v39  ;;  %v2722_v18 = vround.rtne.f32 %v1868_v43  ;;  %v2719_v49 = vround.rtne.f32 %v1865_v25  ;;  %v2721_v26 = vround.rtne.f32 %v1867_v40 }
 0xf02   :  { %v1874_v63 = vmax.f32 %v2720_v61, 0.0  ;;  %v1876_v5 = vmax.f32 %v2722_v18, 0.0  ;;  %v1873_v27 = vmax.f32 %v2719_v49, 0.0  ;;  %v1875_v13 = vmax.f32 %v2721_v26, 0.0 }
 0xf04   :  { %v1878_v2 = vmin.f32 %v1874_v63, 255.0  ;;  %v1880_v45 = vmin.f32 %v1876_v5, 255.0  ;;  %v1877_v31 = vmin.f32 %v1873_v27, 255.0  ;;  %v1879_v8 = vmin.f32 %v1875_v13, 255.0 }
 0xf06   :  { %v1882_v62 = vsub.f32 %v1878_v2, %v1859_v50  ;;  %v1884_v57 = vsub.f32 %v1880_v45, %v1859_v50  ;;  %v1881_v17 = vsub.f32 %v1877_v31, %v1859_v50  ;;  %v1883_v55 = vsub.f32 %v1879_v8, %v1859_v50 }
 0xf08   :  { %v1888_v52 = vsel %vm1851_vm15, %v1882_v62, %v3850_v6  ;;  %v1890_v36 = vsel %vm1851_vm15, %v1884_v57, %v3828_v16  ;;  %v1887_v35 = vsel %vm1851_vm15, %v1881_v17, %v3838_v47  ;;  %v1889_v21 = vsel %vm1851_vm15, %v1883_v55, %v3821_v59  ;;  %v4025_v16 = vld [vmem:[%s4056_s7] sm:$0x3f]  ;;  %s2895_s7 = smov [#allocation2]  }
 0xf09   :  { %v2125_v54 = vpack.c.bf16 %v1890_v36, %v1888_v52  ;;  %v2124_v37 = vpack.c.bf16 %v1889_v21, %v1887_v35  ;;  %v2183_v6 = vmul.f32 %v1993_v29, %v1853_v0  ;;  %v2189_v47 = vrot.slane %v4025_v16, %v2188_v33  ;;  %s2286_s11 = sshll.u32 %s2895_s7, 4  ;;  %s2287_s11 = int_to_ptr.vmem [resolvable:$true] %s2286_s11 }
 0xf0a   :  { %s2833_s12 = scalar_lea.vmem %s2287_s11, 256  ;;  %p2838_p1 = scmp.lt.s32.totalorder %s2287_s11, %s2287_s11 }
 0xf0b   :  { %2174 = vmatprep.mubr.bf16.mxu0 %v2125_v54  ;;  %p2834_p0 = scmp.ne.s32.totalorder %s2287_s11, %s2833_s12  ;;  %p2839_p2 = scmp.lt.s32.totalorder %s2833_s12, %s2833_s12 }
 0xf0c   :  { %2175 = vmatmul.mubr.bf16.vlgmr.msra.gmra.mrb[8].mxu0 %v2124_v37 }
 0xf0d   :  { %p2840_p3 = por %p2839_p2, %p2838_p1 }
 0xf0f   :  { %p2841_p4 = pnand %p2840_p3, %p2834_p0 }
 0xfdf   :  { %v2409_v22 = vpop.f32.mrb[8].mxu0 }
 0xfe0   :  { %v2410_v60 = vpop.f32.mrb[9].mxu0 }
 0xfe1   :  { %v2411_v23 = vadd.f32 %v2410_v60, %v2409_v22  ;;  %v2412_v59 = vpop.f32.mrb[10].mxu0 }
 0xfe2   :  { %v2413_v15 = vpop.f32.mrb[11].mxu0 }
 0xfe3   :  { %v2184_v53 = vmul.f32 %v2411_v23, %v2183_v6  ;;  %v2414_v48 = vadd.f32 %v2413_v15, %v2412_v59 }
 0xfe5   :  { %v2190_v1 = vadd.f32 %v2189_v47, %v2184_v53  ;;  %v2185_v38 = vmul.f32 %v2414_v48, %v2183_v6 }
 0xfe7   :  { %v2191_v4 = vadd.f32 %v2189_v47, %v2185_v38  ;;  %2192 = vmin.xlane.f32.xlu0 %v2190_v1  ;;  %v2275_v38 = vsub.s32 5, %v3256_v3 }
 0xfe9   :  { %2194 = vmin.xlane.f32.xlu1 %v2191_v4 }
 0xfeb   :  { %2203 = vmax.xlane.f32.xlu0 %v2190_v1 }
 0xfed   :  { %2205 = vmax.xlane.f32.xlu1 %v2191_v4 }
0x1074   :  { %v2193_v12 = vpop.xlane.xlu0 %2192 }
0x1076   :  { %v2195_v29 = vpop.xlane.xlu1 %2194 }
0x1077   :  { %v2196_v7 = vmin.f32 %v2193_v12, %v2195_v29 }
0x1078   :  { %v2204_v19 = vpop.xlane.xlu0 %2203 }
0x1079   :  { %v2197_v32 = vrot.slane %v2196_v7, 4 }
0x107a   :  { %v2206_v42 = vpop.xlane.xlu1 %2205 }
0x107b   :  { %v2198_v20 = vmin.f32 %v2196_v7, %v2197_v32  ;;  %v2207_v34 = vmax.f32 %v2204_v19, %v2206_v42  ;;  %v2276_v32 = vrot.slane %v4025_v16, %v2275_v38 }
0x107d   :  { %v2199_v14 = vrot.slane %v2198_v20, 2  ;;  %v2208_v24 = vrot.slane %v2207_v34, 4 }
0x107f   :  { %v2200_v0 = vmin.f32 %v2198_v20, %v2199_v14  ;;  %v2209_v30 = vmax.f32 %v2207_v34, %v2208_v24 }
0x1081   :  { %v2210_v11 = vrot.slane %v2209_v30, 2  ;;  %v2201_v9 = vrot.slane %v2200_v0, 1 }
0x1083   :  { %v2211_v51 = vmax.f32 %v2209_v30, %v2210_v11  ;;  %v2202_v56 = vmin.f32 %v2200_v0, %v2201_v9 }
0x1085   :  { %v2212_v10 = vrot.slane %v2211_v51, 1 }
0x1087   :  { %v2213_v50 = vmax.f32 %v2211_v51, %v2212_v10 }
0x1089   :  { %v2214_v58 = vsub.f32 %v2213_v50, %v2202_v56 }
0x108b   :  { %vm2215_vm0 = vcmp.ge.f32.partialorder %v2214_v58, 1e-08  ;;  %v2216_v41 = vmul.f32 0.003921569, %v2214_v58 }
0x108d   :  { %v2217_v28 = vsel %vm2215_vm0, %v2216_v41, 1.0 }
0x108e   :  { %2824 = vrcp.f32 %v2217_v28 }
0x1098   :  { %v2825_v39 = vpop.eup %2824 }
0x1099   :  { %v2219_v43 = vmul.f32 %v2825_v39, %v2202_v56  ;;  %v2226_v49 = vmul.f32 %v2825_v39, %v2191_v4  ;;  %v2225_v26 = vmul.f32 %v2825_v39, %v2190_v1 }
0x109b   :  { %v2755_v25 = vround.rtne.f32 %v2219_v43 }
0x109d   :  { %v2221_v40 = vsub.f32 0.0, %v2755_v25 }
0x109f   :  { %v2222_v61 = vmax.f32 %v2221_v40, 0.0 }
0x10a1   :  { %v2223_v18 = vmin.f32 %v2222_v61, 255.0 }
0x10a3   :  { %v2228_v63 = vadd.f32 %v2226_v49, %v2223_v18  ;;  %v2227_v5 = vadd.f32 %v2225_v26, %v2223_v18 }
0x10a5   :  { %v2757_v27 = vround.rtne.f32 %v2228_v63  ;;  %v2756_v13 = vround.rtne.f32 %v2227_v5 }
0x10a7   :  { %v2232_v2 = vmax.f32 %v2757_v27, 0.0  ;;  %v2231_v45 = vmax.f32 %v2756_v13, 0.0 }
0x10a9   :  { %v2234_v31 = vmin.f32 %v2232_v2, 255.0  ;;  %v2233_v8 = vmin.f32 %v2231_v45, 255.0 }
0x10ab   :  { %v2236_v62 = vsub.f32 %v2234_v31, %v2223_v18  ;;  %v2235_v57 = vsub.f32 %v2233_v8, %v2223_v18 }
0x10ad   :  { %v2240_v17 = vsel %vm2215_vm0, %v2236_v62, %v2191_v4  ;;  %v2239_v55 = vsel %vm2215_vm0, %v2235_v57, %v2190_v1 }
0x10ae   :  { %v2242_v52 = vmul.f32 %v2240_v17, %v2217_v28  ;;  %v2241_v36 = vmul.f32 %v2239_v55, %v2217_v28 }
0x10b0   :  { %v2244_v35 = vadd.f32 %v2242_v52, %v3556_v44  ;;  %v2243_v21 = vadd.f32 %v2241_v36, %v3565_v46  ;;  %v2269_v46 = vsub.s32 4, %v3256_v3 }
0x10b2   :  { %2247 = vadd.xlane.f32.xlu1 %v2244_v35  ;;  %2245 = vadd.xlane.f32.xlu0 %v2243_v21  ;;  %v2270_v4 = vrot.slane %v4025_v16, %v2269_v46 }
0x113f   :  { %v2248_v54 = vpop.xlane.xlu1 %2247  ;;  %v2246_v37 = vpop.xlane.xlu0 %2245 }
0x1140   :  { %v2250_v33 = vmul.f32 0.0078125, %v2248_v54  ;;  %v2249_v22 = vmul.f32 0.0078125, %v2246_v37 }
0x1142   :  { %v2252_v60 = vsub.f32 %v2244_v35, %v2250_v33  ;;  %v2251_v23 = vsub.f32 %v2243_v21, %v2249_v22 }
0x1144   :  { %v2254_v6 = vmul.f32 %v2252_v60, %v2252_v60  ;;  %v2253_v47 = vmul.f32 %v2251_v23, %v2251_v23 }
0x1146   :  { %2257 = vadd.xlane.f32.xlu1 %v2254_v6  ;;  %2255 = vadd.xlane.f32.xlu0 %v2253_v47 }
0x11d3   :  { %v2258_v59 = vpop.xlane.xlu1 %2257  ;;  %v2256_v15 = vpop.xlane.xlu0 %2255 }
0x11d4   :  { %v2260_v53 = vmul.f32 0.0078125, %v2258_v59  ;;  %v2259_v48 = vmul.f32 0.0078125, %v2256_v15 }
0x11d6   :  { %v2262_v1 = vadd.f32 1e-12, %v2260_v53  ;;  %v2261_v44 = vadd.f32 1e-12, %v2259_v48 }
0x11d8   :  { %2826 = vrsqrt.f32 %v2262_v1 }
0x11d9   :  { %2828 = vrsqrt.f32 %v2261_v44 }
0x11e2   :  { %v2827_v12 = vpop.eup %2826 }
0x11e3   :  { %v2829_v29 = vpop.eup %2828  ;;  %v2266_v7 = vmul.f32 %v2827_v12, %v2252_v60 }
0x11e4   :  { %v2265_v19 = vmul.f32 %v2829_v29, %v2251_v23 }
0x11e5   :  { %v2272_v42 = vmul.f32 %v2270_v4, %v2266_v7 }
0x11e6   :  { %v2271_v20 = vmul.f32 %v2270_v4, %v2265_v19 }
0x11e7   :  { %v2278_v34 = vadd.f32 %v2276_v32, %v2272_v42 }
0x11e8   :  { %v2277_v14 = vadd.f32 %v2276_v32, %v2271_v20 }
0x11e9   :  { %2280 = vst [vmem:[#allocation2 + $0x8] sm:$0xff] %v2278_v34 }
0x11ea   :  { %2279 = vst [vmem:[#allocation2] sm:$0xff] %v2277_v14 }
0x11eb   :  { %2844 = shalt.err (!%p2841_p4)
}
0x11ec   :  { %s2845_s15 = scalar_lea.hbm %s4057_s8, 256 }
0x11ed   :  { %p2846_p5 = scmp.ne.s32.totalorder %s4057_s8, %s2845_s15  ;;  %p2849_p6 = scmp.lt.u32.totalorder %s2845_s15, %s4057_s8 }
0x11ef   :  { %p2851_p7 = pnand %p2849_p6, %p2846_p5 }
0x11f1   :  { %2854 = shalt.err (!%p2851_p7)
}
0x11f2   :  { %s2896_s19 = smov 128   ;;  %s2897_s20 = smov 8  }
0x11f3   :  { %2292 = dma.vmem_to_hbm [thread:$0]  %s2287_s11, 256, %s4057_s8, [#allocation3], %s2896_s19, %s2896_s19, %s2897_s20  }
0x11f4   :  { %2855 = dma.done.wait [#allocation3], 256  }
0x11f5   :  { %2856 = vsyncadd [#allocation3], 4294967040 }
0x11f6   :  { %2296 = vsyncpa [#allocation3], 1 }

</bundles_post_ra>
